<compile_context>
chip_gen: v7x
topology: tpu7x:2x2x1
jax: 0.10.0
libtpu: 0.0.40
codegen_flags: <defaults>
</compile_context>

<pallas_src>
import jax
import jax.numpy as jnp
import numpy as np
from jax.experimental import pallas as pl
from jax.experimental.pallas import tpu as pltpu

NEG_SLOPE = 0.01  # torch.nn.LeakyReLU default

NODE_TYPES = ("user", "item")
EDGE_TYPES = (("user", "rates", "item"), ("item", "rev_rates", "user"))
SUPERVISION_TYPES = (("user", "rates", "item"),)
HIDDEN = 32
PD = 128                       # lane-padded feature width
NPAD = 128                     # sublane-padded node count (both node types)
IN_DIMS = {"user": 12, "item": 20}
NUM_NODES = {"user": 24, "item": 40}
NUM_MSG_LAYERS = 2

_VMEM = pl.BlockSpec(memory_space=pltpu.MemorySpace.VMEM)


# ---------------------------------------------------------------------------
# Fused forward kernel
# ---------------------------------------------------------------------------
def _leaky(x):
    return jnp.where(x > 0, x, NEG_SLOPE * x)


def _l2norm(x):
    # F.normalize(x, p=2, dim=-1) semantics (eps=1e-12 on the norm).
    ss = jnp.sum(x * x, axis=-1, keepdims=True)
    return x * jax.lax.rsqrt(jnp.maximum(ss, 1e-24))


def _mm(a, w_ref):
    # bf16 MXU operands, fp32 accumulation.
    return jnp.dot(a.astype(jnp.bfloat16), w_ref[...],
                   preferred_element_type=jnp.float32)


def _fused_forward_kernel(
    x_u_ref, x_i_ref,                      # padded node features (bf16)
    a_iu_ref, a_ui_ref,                    # normalized adjacencies (bf16): user<-item, item<-user
    w_pre_u_ref, b_pre_u_ref, w_pre_i_ref, b_pre_i_ref,
    wl0_i_ref, wr0_i_ref, b0_i_ref,        # layer-0 SAGE, item destination
    wl0_u_ref, wr0_u_ref, b0_u_ref,        # layer-0 SAGE, user destination
    wl1_i_ref, wr1_i_ref, b1_i_ref,        # layer-1 SAGE, item destination
    wl1_u_ref, wr1_u_ref, b1_u_ref,        # layer-1 SAGE, user destination
    w_post_u_ref, b_post_u_ref, w_post_i_ref, b_post_i_ref,
    out_ref,
):
    f32 = jnp.float32
    bf16 = jnp.bfloat16

    # ---- pre_mlp: LazyLinear -> LeakyReLU (activate_last=True) ----
    h_u = _leaky(jnp.dot(x_u_ref[...], w_pre_u_ref[...], preferred_element_type=f32)
                 + b_pre_u_ref[...])
    h_i = _leaky(jnp.dot(x_i_ref[...], w_pre_i_ref[...], preferred_element_type=f32)
                 + b_pre_i_ref[...])

    # ---- message passing: to_hetero(SAGE), aggr='sum', skip='sum' ----
    layer_refs = (
        (wl0_i_ref, wr0_i_ref, b0_i_ref, wl0_u_ref, wr0_u_ref, b0_u_ref),
        (wl1_i_ref, wr1_i_ref, b1_i_ref, wl1_u_ref, wr1_u_ref, b1_u_ref),
    )
    for wl_i, wr_i, b_i, wl_u, wr_u, b_u in layer_refs:
        # item <- user  ('user','rates','item'): mean_agg = A_ui @ h_u
        agg_i = jnp.dot(a_ui_ref[...], h_u.astype(bf16), preferred_element_type=f32)
        conv_i = _mm(agg_i, wl_i) + _mm(h_i, wr_i) + b_i[...]
        # user <- item  ('item','rev_rates','user'): mean_agg = A_iu @ h_i
        agg_u = jnp.dot(a_iu_ref[...], h_i.astype(bf16), preferred_element_type=f32)
        conv_u = _mm(agg_u, wl_u) + _mm(h_u, wr_u) + b_u[...]
        # post_conv = LeakyReLU, then residual (layer_connectivity='sum')
        h_i = _leaky(conv_i) + h_i
        h_u = _leaky(conv_u) + h_u

    # ---- post_mlp: LazyLinear, activate_last=False ----
    h_u = _mm(h_u, w_post_u_ref) + b_post_u_ref[...]
    h_i = _mm(h_i, w_post_i_ref) + b_post_i_ref[...]

    # ---- normalize_output ----
    h_u = _l2norm(h_u)
    h_i = _l2norm(h_i)

    # ---- decoder: all-pairs scores S[u,i] = <h_u[u], h_i[i]>, sigmoid in-kernel.
    #      Lane-dense (128,128) output; label edges are gathered in the wrapper.
    s = jnp.dot(h_u.astype(bf16), h_i.astype(bf16).T, preferred_element_type=f32)
    out_ref[...] = jax.nn.sigmoid(s)


# ---------------------------------------------------------------------------
# Parameter init (deterministic, torch.nn.Linear-style uniform), pre-padded to
# (128,128) with exact zero padding.  Weights stored bf16, biases fp32.
# ---------------------------------------------------------------------------
def _init_linear_padded(key, din, dout, bias=True):
    kw, kb = jax.random.split(key)
    lim = 1.0 / np.sqrt(din)
    w = jax.random.uniform(kw, (din, dout), jnp.float32, -lim, lim)
    wp = jnp.zeros((PD, PD), jnp.float32).at[:din, :dout].set(w).astype(jnp.bfloat16)
    bp = jnp.zeros((1, PD), jnp.float32)
    if bias:
        b = jax.random.uniform(kb, (dout,), jnp.float32, -lim, lim)
        bp = bp.at[0, :dout].set(b)
    return wp, bp


def init_params(key):
    params = {"pre": {}, "post": {}, "conv": []}
    for nt in NODE_TYPES:
        key, k = jax.random.split(key)
        params["pre"][nt] = _init_linear_padded(k, IN_DIMS[nt], HIDDEN)
    for _ in range(NUM_MSG_LAYERS):
        layer_p = {}
        for et in EDGE_TYPES:
            key, kl, kr = jax.random.split(key, 3)
            w_l, b = _init_linear_padded(kl, HIDDEN, HIDDEN, bias=True)    # lin_l (bias)
            w_r, _ = _init_linear_padded(kr, HIDDEN, HIDDEN, bias=False)   # lin_r (no bias)
            layer_p[et] = (w_l, w_r, b)
        params["conv"].append(layer_p)
    for nt in NODE_TYPES:
        key, k = jax.random.split(key)
        params["post"][nt] = _init_linear_padded(k, HIDDEN, HIDDEN)
    return params


# ---------------------------------------------------------------------------
# Graph preprocessing — done ONCE on the host for the static graph (hoisted out
# of the per-call jitted hot path per the perf review).
# ---------------------------------------------------------------------------
def _build_norm_adj_padded(edge_index):
    """Dense row-normalized adjacency (scatter-mean as matmul), zero-padded to (NPAD, NPAD)."""
    src = np.asarray(edge_index[0])
    tgt = np.asarray(edge_index[1])
    a = np.zeros((NPAD, NPAD), np.float32)
    np.add.at(a, (tgt, src), 1.0)
    deg = a.sum(axis=1, keepdims=True)
    a = a / np.maximum(deg, 1.0)
    return jnp.asarray(a, jnp.bfloat16)


def preprocess_graph(edge_index_dict, edge_label_index_dict):
    et_ui = ("user", "rates", "item")
    et_iu = ("item", "rev_rates", "user")
    a_ui = _build_norm_adj_padded(edge_index_dict[et_ui])   # item <- user
    a_iu = _build_norm_adj_padded(edge_index_dict[et_iu])   # user <- item
    eli = np.asarray(edge_label_index_dict[SUPERVISION_TYPES[0]])
    src_idx = jnp.asarray(eli[0], jnp.int32)
    tgt_idx = jnp.asarray(eli[1], jnp.int32)
    return a_iu, a_ui, src_idx, tgt_idx


def _pad_nodes(x):
    n, d = x.shape
    return jnp.pad(x, ((0, NPAD - n), (0, PD - d))).astype(jnp.bfloat16)


# ---------------------------------------------------------------------------
# Full forward pass (mirrors base_model.forward) — single fused pallas_call.
# ---------------------------------------------------------------------------
@jax.jit
def base_model_forward(params, x_dict, a_iu, a_ui, src_idx, tgt_idx):
    x_u = _pad_nodes(x_dict["user"])
    x_i = _pad_nodes(x_dict["item"])

    et_ui, et_iu = EDGE_TYPES
    w_pre_u, b_pre_u = params["pre"]["user"]
    w_pre_i, b_pre_i = params["pre"]["item"]
    wl0_i, wr0_i, b0_i = params["conv"][0][et_ui]
    wl0_u, wr0_u, b0_u = params["conv"][0][et_iu]
    wl1_i, wr1_i, b1_i = params["conv"][1][et_ui]
    wl1_u, wr1_u, b1_u = params["conv"][1][et_iu]
    w_post_u, b_post_u = params["post"]["user"]
    w_post_i, b_post_i = params["post"]["item"]

    inputs = (
        x_u, x_i, a_iu, a_ui,
        w_pre_u, b_pre_u, w_pre_i, b_pre_i,
        wl0_i, wr0_i, b0_i, wl0_u, wr0_u, b0_u,
        wl1_i, wr1_i, b1_i, wl1_u, wr1_u, b1_u,
        w_post_u, b_post_u, w_post_i, b_post_i,
    )

    sig_s = pl.pallas_call(
        _fused_forward_kernel,
        out_shape=jax.ShapeDtypeStruct((NPAD, NPAD), jnp.float32),
        in_specs=[_VMEM] * len(inputs),
        out_specs=_VMEM,
    )(*inputs)

    # Gather the supervision-edge scores from the lane-dense all-pairs block.
    pred = sig_s[src_idx, tgt_idx]
    return {SUPERVISION_TYPES[0]: pred}


# ---------------------------------------------------------------------------
if __name__ == "__main__":
    key = jax.random.PRNGKey(0)
    key, kp = jax.random.split(key)
    params = init_params(kp)

    # node features
    x_dict = {}
    for nt in NODE_TYPES:
        key, k = jax.random.split(key)
        x_dict[nt] = jax.random.normal(k, (NUM_NODES[nt], IN_DIMS[nt]), jnp.float32)

    # message-passing edges
    edge_index_dict = {}
    n_edges = 64
    for et in EDGE_TYPES:
        src_t, _, tgt_t = et
        key, ks, kt = jax.random.split(key, 3)
        src = jax.random.randint(ks, (n_edges,), 0, NUM_NODES[src_t], jnp.int32)
        tgt = jax.random.randint(kt, (n_edges,), 0, NUM_NODES[tgt_t], jnp.int32)
        edge_index_dict[et] = jnp.stack([src, tgt], axis=0)

    # supervision (label) edges
    edge_label_index_dict = {}
    n_label_edges = 48
    for et in SUPERVISION_TYPES:
        src_t, _, tgt_t = et
        key, ks, kt = jax.random.split(key, 3)
        src = jax.random.randint(ks, (n_label_edges,), 0, NUM_NODES[src_t], jnp.int32)
        tgt = jax.random.randint(kt, (n_label_edges,), 0, NUM_NODES[tgt_t], jnp.int32)
        edge_label_index_dict[et] = jnp.stack([src, tgt], axis=0)

    # Static-graph preprocessing, hoisted out of the jitted hot path.
    a_iu, a_ui, src_idx, tgt_idx = preprocess_graph(edge_index_dict, edge_label_index_dict)

    pred_dict = base_model_forward(params, x_dict, a_iu, a_ui, src_idx, tgt_idx)
    for et, pred in pred_dict.items():
        jax.block_until_ready(pred)
        assert pred.shape == (n_label_edges,)
        assert bool(jnp.all(jnp.isfinite(pred)))
        assert bool(jnp.all((pred >= 0.0) & (pred <= 1.0)))
    print("KERNEL_OK")
</pallas_src>

<mosaic_0001>
module attributes {stable_mosaic.version = 11 : i64} {
  func.func @_fused_forward_kernel(%arg0: memref<128x128xbf16, #tpu.memory_space<vmem>>, %arg1: memref<128x128xbf16, #tpu.memory_space<vmem>>, %arg2: memref<128x128xbf16, #tpu.memory_space<vmem>>, %arg3: memref<128x128xbf16, #tpu.memory_space<vmem>>, %arg4: memref<128x128xbf16, #tpu.memory_space<vmem>>, %arg5: memref<1x128xf32, #tpu.memory_space<vmem>>, %arg6: memref<128x128xbf16, #tpu.memory_space<vmem>>, %arg7: memref<1x128xf32, #tpu.memory_space<vmem>>, %arg8: memref<128x128xbf16, #tpu.memory_space<vmem>>, %arg9: memref<128x128xbf16, #tpu.memory_space<vmem>>, %arg10: memref<1x128xf32, #tpu.memory_space<vmem>>, %arg11: memref<128x128xbf16, #tpu.memory_space<vmem>>, %arg12: memref<128x128xbf16, #tpu.memory_space<vmem>>, %arg13: memref<1x128xf32, #tpu.memory_space<vmem>>, %arg14: memref<128x128xbf16, #tpu.memory_space<vmem>>, %arg15: memref<128x128xbf16, #tpu.memory_space<vmem>>, %arg16: memref<1x128xf32, #tpu.memory_space<vmem>>, %arg17: memref<128x128xbf16, #tpu.memory_space<vmem>>, %arg18: memref<128x128xbf16, #tpu.memory_space<vmem>>, %arg19: memref<1x128xf32, #tpu.memory_space<vmem>>, %arg20: memref<128x128xbf16, #tpu.memory_space<vmem>>, %arg21: memref<1x128xf32, #tpu.memory_space<vmem>>, %arg22: memref<128x128xbf16, #tpu.memory_space<vmem>>, %arg23: memref<1x128xf32, #tpu.memory_space<vmem>>, %arg24: memref<128x128xf32, #tpu.memory_space<vmem>>) attributes {dimension_semantics = [], scalar_prefetch = 0 : i64, scratch_operands = 0 : i64, tpu.core_type = #tpu.core_type<tc>} {
    %c0 = arith.constant 0 : index
    %c0_0 = arith.constant 0 : index
    %0 = vector.load %arg0[%c0, %c0_0] : memref<128x128xbf16, #tpu.memory_space<vmem>>, vector<128x128xbf16>
    %c0_1 = arith.constant 0 : index
    %c0_2 = arith.constant 0 : index
    %1 = vector.load %arg4[%c0_1, %c0_2] : memref<128x128xbf16, #tpu.memory_space<vmem>>, vector<128x128xbf16>
    %cst = arith.constant dense<0.000000e+00> : vector<128x128xf32>
    %2 = tpu.matmul %0, %1, %cst {dimension_numbers = #tpu.dot_dimension_numbers<[1], [0], [0], [1], [0, 0, 1, 1], [], []>} : vector<128x128xbf16>, vector<128x128xbf16>, vector<128x128xf32> -> vector<128x128xf32>
    %c0_3 = arith.constant 0 : index
    %c0_4 = arith.constant 0 : index
    %3 = vector.load %arg5[%c0_3, %c0_4] : memref<1x128xf32, #tpu.memory_space<vmem>>, vector<1x128xf32>
    %4 = vector.broadcast %3 : vector<1x128xf32> to vector<128x128xf32>
    %5 = arith.addf %2, %4 : vector<128x128xf32>
    %cst_5 = arith.constant 0.000000e+00 : f32
    %6 = vector.broadcast %cst_5 : f32 to vector<128x128xf32>
    %7 = arith.cmpf ogt, %5, %6 : vector<128x128xf32>
    %cst_6 = arith.constant 0.00999999977 : f32
    %8 = vector.broadcast %cst_6 : f32 to vector<128x128xf32>
    %9 = arith.mulf %8, %5 : vector<128x128xf32>
    %10 = arith.select %7, %5, %9 : vector<128x128xi1>, vector<128x128xf32>
    %c0_7 = arith.constant 0 : index
    %c0_8 = arith.constant 0 : index
    %11 = vector.load %arg1[%c0_7, %c0_8] : memref<128x128xbf16, #tpu.memory_space<vmem>>, vector<128x128xbf16>
    %c0_9 = arith.constant 0 : index
    %c0_10 = arith.constant 0 : index
    %12 = vector.load %arg6[%c0_9, %c0_10] : memref<128x128xbf16, #tpu.memory_space<vmem>>, vector<128x128xbf16>
    %cst_11 = arith.constant dense<0.000000e+00> : vector<128x128xf32>
    %13 = tpu.matmul %11, %12, %cst_11 {dimension_numbers = #tpu.dot_dimension_numbers<[1], [0], [0], [1], [0, 0, 1, 1], [], []>} : vector<128x128xbf16>, vector<128x128xbf16>, vector<128x128xf32> -> vector<128x128xf32>
    %c0_12 = arith.constant 0 : index
    %c0_13 = arith.constant 0 : index
    %14 = vector.load %arg7[%c0_12, %c0_13] : memref<1x128xf32, #tpu.memory_space<vmem>>, vector<1x128xf32>
    %15 = vector.broadcast %14 : vector<1x128xf32> to vector<128x128xf32>
    %16 = arith.addf %13, %15 : vector<128x128xf32>
    %cst_14 = arith.constant 0.000000e+00 : f32
    %17 = vector.broadcast %cst_14 : f32 to vector<128x128xf32>
    %18 = arith.cmpf ogt, %16, %17 : vector<128x128xf32>
    %cst_15 = arith.constant 0.00999999977 : f32
    %19 = vector.broadcast %cst_15 : f32 to vector<128x128xf32>
    %20 = arith.mulf %19, %16 : vector<128x128xf32>
    %21 = arith.select %18, %16, %20 : vector<128x128xi1>, vector<128x128xf32>
    %c0_16 = arith.constant 0 : index
    %c0_17 = arith.constant 0 : index
    %22 = vector.load %arg3[%c0_16, %c0_17] : memref<128x128xbf16, #tpu.memory_space<vmem>>, vector<128x128xbf16>
    %23 = arith.truncf %10 : vector<128x128xf32> to vector<128x128xbf16>
    %cst_18 = arith.constant dense<0.000000e+00> : vector<128x128xf32>
    %24 = tpu.matmul %22, %23, %cst_18 {dimension_numbers = #tpu.dot_dimension_numbers<[1], [0], [0], [1], [0, 0, 1, 1], [], []>} : vector<128x128xbf16>, vector<128x128xbf16>, vector<128x128xf32> -> vector<128x128xf32>
    %25 = arith.truncf %24 : vector<128x128xf32> to vector<128x128xbf16>
    %c0_19 = arith.constant 0 : index
    %c0_20 = arith.constant 0 : index
    %26 = vector.load %arg8[%c0_19, %c0_20] : memref<128x128xbf16, #tpu.memory_space<vmem>>, vector<128x128xbf16>
    %cst_21 = arith.constant dense<0.000000e+00> : vector<128x128xf32>
    %27 = tpu.matmul %25, %26, %cst_21 {dimension_numbers = #tpu.dot_dimension_numbers<[1], [0], [0], [1], [0, 0, 1, 1], [], []>} : vector<128x128xbf16>, vector<128x128xbf16>, vector<128x128xf32> -> vector<128x128xf32>
    %28 = arith.truncf %21 : vector<128x128xf32> to vector<128x128xbf16>
    %c0_22 = arith.constant 0 : index
    %c0_23 = arith.constant 0 : index
    %29 = vector.load %arg9[%c0_22, %c0_23] : memref<128x128xbf16, #tpu.memory_space<vmem>>, vector<128x128xbf16>
    %cst_24 = arith.constant dense<0.000000e+00> : vector<128x128xf32>
    %30 = tpu.matmul %28, %29, %cst_24 {dimension_numbers = #tpu.dot_dimension_numbers<[1], [0], [0], [1], [0, 0, 1, 1], [], []>} : vector<128x128xbf16>, vector<128x128xbf16>, vector<128x128xf32> -> vector<128x128xf32>
    %31 = arith.addf %27, %30 : vector<128x128xf32>
    %c0_25 = arith.constant 0 : index
    %c0_26 = arith.constant 0 : index
    %32 = vector.load %arg10[%c0_25, %c0_26] : memref<1x128xf32, #tpu.memory_space<vmem>>, vector<1x128xf32>
    %33 = vector.broadcast %32 : vector<1x128xf32> to vector<128x128xf32>
    %34 = arith.addf %31, %33 : vector<128x128xf32>
    %c0_27 = arith.constant 0 : index
    %c0_28 = arith.constant 0 : index
    %35 = vector.load %arg2[%c0_27, %c0_28] : memref<128x128xbf16, #tpu.memory_space<vmem>>, vector<128x128xbf16>
    %36 = arith.truncf %21 : vector<128x128xf32> to vector<128x128xbf16>
    %cst_29 = arith.constant dense<0.000000e+00> : vector<128x128xf32>
    %37 = tpu.matmul %35, %36, %cst_29 {dimension_numbers = #tpu.dot_dimension_numbers<[1], [0], [0], [1], [0, 0, 1, 1], [], []>} : vector<128x128xbf16>, vector<128x128xbf16>, vector<128x128xf32> -> vector<128x128xf32>
    %38 = arith.truncf %37 : vector<128x128xf32> to vector<128x128xbf16>
    %c0_30 = arith.constant 0 : index
    %c0_31 = arith.constant 0 : index
    %39 = vector.load %arg11[%c0_30, %c0_31] : memref<128x128xbf16, #tpu.memory_space<vmem>>, vector<128x128xbf16>
    %cst_32 = arith.constant dense<0.000000e+00> : vector<128x128xf32>
    %40 = tpu.matmul %38, %39, %cst_32 {dimension_numbers = #tpu.dot_dimension_numbers<[1], [0], [0], [1], [0, 0, 1, 1], [], []>} : vector<128x128xbf16>, vector<128x128xbf16>, vector<128x128xf32> -> vector<128x128xf32>
    %41 = arith.truncf %10 : vector<128x128xf32> to vector<128x128xbf16>
    %c0_33 = arith.constant 0 : index
    %c0_34 = arith.constant 0 : index
    %42 = vector.load %arg12[%c0_33, %c0_34] : memref<128x128xbf16, #tpu.memory_space<vmem>>, vector<128x128xbf16>
    %cst_35 = arith.constant dense<0.000000e+00> : vector<128x128xf32>
    %43 = tpu.matmul %41, %42, %cst_35 {dimension_numbers = #tpu.dot_dimension_numbers<[1], [0], [0], [1], [0, 0, 1, 1], [], []>} : vector<128x128xbf16>, vector<128x128xbf16>, vector<128x128xf32> -> vector<128x128xf32>
    %44 = arith.addf %40, %43 : vector<128x128xf32>
    %c0_36 = arith.constant 0 : index
    %c0_37 = arith.constant 0 : index
    %45 = vector.load %arg13[%c0_36, %c0_37] : memref<1x128xf32, #tpu.memory_space<vmem>>, vector<1x128xf32>
    %46 = vector.broadcast %45 : vector<1x128xf32> to vector<128x128xf32>
    %47 = arith.addf %44, %46 : vector<128x128xf32>
    %cst_38 = arith.constant 0.000000e+00 : f32
    %48 = vector.broadcast %cst_38 : f32 to vector<128x128xf32>
    %49 = arith.cmpf ogt, %34, %48 : vector<128x128xf32>
    %cst_39 = arith.constant 0.00999999977 : f32
    %50 = vector.broadcast %cst_39 : f32 to vector<128x128xf32>
    %51 = arith.mulf %50, %34 : vector<128x128xf32>
    %52 = arith.select %49, %34, %51 : vector<128x128xi1>, vector<128x128xf32>
    %53 = arith.addf %52, %21 : vector<128x128xf32>
    %cst_40 = arith.constant 0.000000e+00 : f32
    %54 = vector.broadcast %cst_40 : f32 to vector<128x128xf32>
    %55 = arith.cmpf ogt, %47, %54 : vector<128x128xf32>
    %cst_41 = arith.constant 0.00999999977 : f32
    %56 = vector.broadcast %cst_41 : f32 to vector<128x128xf32>
    %57 = arith.mulf %56, %47 : vector<128x128xf32>
    %58 = arith.select %55, %47, %57 : vector<128x128xi1>, vector<128x128xf32>
    %59 = arith.addf %58, %10 : vector<128x128xf32>
    %c0_42 = arith.constant 0 : index
    %c0_43 = arith.constant 0 : index
    %60 = vector.load %arg3[%c0_42, %c0_43] : memref<128x128xbf16, #tpu.memory_space<vmem>>, vector<128x128xbf16>
    %61 = arith.truncf %59 : vector<128x128xf32> to vector<128x128xbf16>
    %cst_44 = arith.constant dense<0.000000e+00> : vector<128x128xf32>
    %62 = tpu.matmul %60, %61, %cst_44 {dimension_numbers = #tpu.dot_dimension_numbers<[1], [0], [0], [1], [0, 0, 1, 1], [], []>} : vector<128x128xbf16>, vector<128x128xbf16>, vector<128x128xf32> -> vector<128x128xf32>
    %63 = arith.truncf %62 : vector<128x128xf32> to vector<128x128xbf16>
    %c0_45 = arith.constant 0 : index
    %c0_46 = arith.constant 0 : index
    %64 = vector.load %arg14[%c0_45, %c0_46] : memref<128x128xbf16, #tpu.memory_space<vmem>>, vector<128x128xbf16>
    %cst_47 = arith.constant dense<0.000000e+00> : vector<128x128xf32>
    %65 = tpu.matmul %63, %64, %cst_47 {dimension_numbers = #tpu.dot_dimension_numbers<[1], [0], [0], [1], [0, 0, 1, 1], [], []>} : vector<128x128xbf16>, vector<128x128xbf16>, vector<128x128xf32> -> vector<128x128xf32>
    %66 = arith.truncf %53 : vector<128x128xf32> to vector<128x128xbf16>
    %c0_48 = arith.constant 0 : index
    %c0_49 = arith.constant 0 : index
    %67 = vector.load %arg15[%c0_48, %c0_49] : memref<128x128xbf16, #tpu.memory_space<vmem>>, vector<128x128xbf16>
    %cst_50 = arith.constant dense<0.000000e+00> : vector<128x128xf32>
    %68 = tpu.matmul %66, %67, %cst_50 {dimension_numbers = #tpu.dot_dimension_numbers<[1], [0], [0], [1], [0, 0, 1, 1], [], []>} : vector<128x128xbf16>, vector<128x128xbf16>, vector<128x128xf32> -> vector<128x128xf32>
    %69 = arith.addf %65, %68 : vector<128x128xf32>
    %c0_51 = arith.constant 0 : index
    %c0_52 = arith.constant 0 : index
    %70 = vector.load %arg16[%c0_51, %c0_52] : memref<1x128xf32, #tpu.memory_space<vmem>>, vector<1x128xf32>
    %71 = vector.broadcast %70 : vector<1x128xf32> to vector<128x128xf32>
    %72 = arith.addf %69, %71 : vector<128x128xf32>
    %c0_53 = arith.constant 0 : index
    %c0_54 = arith.constant 0 : index
    %73 = vector.load %arg2[%c0_53, %c0_54] : memref<128x128xbf16, #tpu.memory_space<vmem>>, vector<128x128xbf16>
    %74 = arith.truncf %53 : vector<128x128xf32> to vector<128x128xbf16>
    %cst_55 = arith.constant dense<0.000000e+00> : vector<128x128xf32>
    %75 = tpu.matmul %73, %74, %cst_55 {dimension_numbers = #tpu.dot_dimension_numbers<[1], [0], [0], [1], [0, 0, 1, 1], [], []>} : vector<128x128xbf16>, vector<128x128xbf16>, vector<128x128xf32> -> vector<128x128xf32>
    %76 = arith.truncf %75 : vector<128x128xf32> to vector<128x128xbf16>
    %c0_56 = arith.constant 0 : index
    %c0_57 = arith.constant 0 : index
    %77 = vector.load %arg17[%c0_56, %c0_57] : memref<128x128xbf16, #tpu.memory_space<vmem>>, vector<128x128xbf16>
    %cst_58 = arith.constant dense<0.000000e+00> : vector<128x128xf32>
    %78 = tpu.matmul %76, %77, %cst_58 {dimension_numbers = #tpu.dot_dimension_numbers<[1], [0], [0], [1], [0, 0, 1, 1], [], []>} : vector<128x128xbf16>, vector<128x128xbf16>, vector<128x128xf32> -> vector<128x128xf32>
    %79 = arith.truncf %59 : vector<128x128xf32> to vector<128x128xbf16>
    %c0_59 = arith.constant 0 : index
    %c0_60 = arith.constant 0 : index
    %80 = vector.load %arg18[%c0_59, %c0_60] : memref<128x128xbf16, #tpu.memory_space<vmem>>, vector<128x128xbf16>
    %cst_61 = arith.constant dense<0.000000e+00> : vector<128x128xf32>
    %81 = tpu.matmul %79, %80, %cst_61 {dimension_numbers = #tpu.dot_dimension_numbers<[1], [0], [0], [1], [0, 0, 1, 1], [], []>} : vector<128x128xbf16>, vector<128x128xbf16>, vector<128x128xf32> -> vector<128x128xf32>
    %82 = arith.addf %78, %81 : vector<128x128xf32>
    %c0_62 = arith.constant 0 : index
    %c0_63 = arith.constant 0 : index
    %83 = vector.load %arg19[%c0_62, %c0_63] : memref<1x128xf32, #tpu.memory_space<vmem>>, vector<1x128xf32>
    %84 = vector.broadcast %83 : vector<1x128xf32> to vector<128x128xf32>
    %85 = arith.addf %82, %84 : vector<128x128xf32>
    %cst_64 = arith.constant 0.000000e+00 : f32
    %86 = vector.broadcast %cst_64 : f32 to vector<128x128xf32>
    %87 = arith.cmpf ogt, %72, %86 : vector<128x128xf32>
    %cst_65 = arith.constant 0.00999999977 : f32
    %88 = vector.broadcast %cst_65 : f32 to vector<128x128xf32>
    %89 = arith.mulf %88, %72 : vector<128x128xf32>
    %90 = arith.select %87, %72, %89 : vector<128x128xi1>, vector<128x128xf32>
    %91 = arith.addf %90, %53 : vector<128x128xf32>
    %cst_66 = arith.constant 0.000000e+00 : f32
    %92 = vector.broadcast %cst_66 : f32 to vector<128x128xf32>
    %93 = arith.cmpf ogt, %85, %92 : vector<128x128xf32>
    %cst_67 = arith.constant 0.00999999977 : f32
    %94 = vector.broadcast %cst_67 : f32 to vector<128x128xf32>
    %95 = arith.mulf %94, %85 : vector<128x128xf32>
    %96 = arith.select %93, %85, %95 : vector<128x128xi1>, vector<128x128xf32>
    %97 = arith.addf %96, %59 : vector<128x128xf32>
    %98 = arith.truncf %97 : vector<128x128xf32> to vector<128x128xbf16>
    %c0_68 = arith.constant 0 : index
    %c0_69 = arith.constant 0 : index
    %99 = vector.load %arg20[%c0_68, %c0_69] : memref<128x128xbf16, #tpu.memory_space<vmem>>, vector<128x128xbf16>
    %cst_70 = arith.constant dense<0.000000e+00> : vector<128x128xf32>
    %100 = tpu.matmul %98, %99, %cst_70 {dimension_numbers = #tpu.dot_dimension_numbers<[1], [0], [0], [1], [0, 0, 1, 1], [], []>} : vector<128x128xbf16>, vector<128x128xbf16>, vector<128x128xf32> -> vector<128x128xf32>
    %c0_71 = arith.constant 0 : index
    %c0_72 = arith.constant 0 : index
    %101 = vector.load %arg21[%c0_71, %c0_72] : memref<1x128xf32, #tpu.memory_space<vmem>>, vector<1x128xf32>
    %102 = vector.broadcast %101 : vector<1x128xf32> to vector<128x128xf32>
    %103 = arith.addf %100, %102 : vector<128x128xf32>
    %104 = arith.truncf %91 : vector<128x128xf32> to vector<128x128xbf16>
    %c0_73 = arith.constant 0 : index
    %c0_74 = arith.constant 0 : index
    %105 = vector.load %arg22[%c0_73, %c0_74] : memref<128x128xbf16, #tpu.memory_space<vmem>>, vector<128x128xbf16>
    %cst_75 = arith.constant dense<0.000000e+00> : vector<128x128xf32>
    %106 = tpu.matmul %104, %105, %cst_75 {dimension_numbers = #tpu.dot_dimension_numbers<[1], [0], [0], [1], [0, 0, 1, 1], [], []>} : vector<128x128xbf16>, vector<128x128xbf16>, vector<128x128xf32> -> vector<128x128xf32>
    %c0_76 = arith.constant 0 : index
    %c0_77 = arith.constant 0 : index
    %107 = vector.load %arg23[%c0_76, %c0_77] : memref<1x128xf32, #tpu.memory_space<vmem>>, vector<1x128xf32>
    %108 = vector.broadcast %107 : vector<1x128xf32> to vector<128x128xf32>
    %109 = arith.addf %106, %108 : vector<128x128xf32>
    %110 = arith.mulf %103, %103 : vector<128x128xf32>
    %cst_78 = arith.constant dense<0.000000e+00> : vector<128xf32>
    %111 = vector.multi_reduction <add>, %110, %cst_78 [1] : vector<128x128xf32> to vector<128xf32>
    %112 = vector.shape_cast %111 : vector<128xf32> to vector<128x1xf32>
    %cst_79 = arith.constant 1.000000e-24 : f32
    %113 = vector.broadcast %cst_79 : f32 to vector<128x1xf32>
    %114 = arith.maximumf %112, %113 : vector<128x1xf32>
    %115 = math.rsqrt %114 : vector<128x1xf32>
    %116 = vector.broadcast %115 : vector<128x1xf32> to vector<128x128xf32>
    %117 = arith.mulf %103, %116 : vector<128x128xf32>
    %118 = arith.mulf %109, %109 : vector<128x128xf32>
    %cst_80 = arith.constant dense<0.000000e+00> : vector<128xf32>
    %119 = vector.multi_reduction <add>, %118, %cst_80 [1] : vector<128x128xf32> to vector<128xf32>
    %120 = vector.shape_cast %119 : vector<128xf32> to vector<128x1xf32>
    %cst_81 = arith.constant 1.000000e-24 : f32
    %121 = vector.broadcast %cst_81 : f32 to vector<128x1xf32>
    %122 = arith.maximumf %120, %121 : vector<128x1xf32>
    %123 = math.rsqrt %122 : vector<128x1xf32>
    %124 = vector.broadcast %123 : vector<128x1xf32> to vector<128x128xf32>
    %125 = arith.mulf %109, %124 : vector<128x128xf32>
    %126 = arith.truncf %117 : vector<128x128xf32> to vector<128x128xbf16>
    %127 = arith.truncf %125 : vector<128x128xf32> to vector<128x128xbf16>
    %128 = tpu.transpose %127, [1, 0] : vector<128x128xbf16> -> vector<128x128xbf16>
    %cst_82 = arith.constant dense<0.000000e+00> : vector<128x128xf32>
    %129 = tpu.matmul %126, %128, %cst_82 {dimension_numbers = #tpu.dot_dimension_numbers<[1], [0], [0], [1], [0, 0, 1, 1], [], []>} : vector<128x128xbf16>, vector<128x128xbf16>, vector<128x128xf32> -> vector<128x128xf32>
    %130 = arith.negf %129 : vector<128x128xf32>
    %131 = math.exp %130 : vector<128x128xf32>
    %cst_83 = arith.constant 1.000000e+00 : f32
    %132 = vector.broadcast %cst_83 : f32 to vector<128x128xf32>
    %133 = arith.addf %132, %131 : vector<128x128xf32>
    %134 = arith.divf %132, %133 : vector<128x128xf32>
    %c0_84 = arith.constant 0 : index
    %c0_85 = arith.constant 0 : index
    %135 = vector.load %arg24[%c0_84, %c0_85] : memref<128x128xf32, #tpu.memory_space<vmem>>, vector<128x128xf32>
    tpu.vector_store %arg24[%c0_84, %c0_85], %134 {strides = array<i32>} : memref<128x128xf32, #tpu.memory_space<vmem>>, vector<128x128xf32>,
    return
  }
}

</mosaic_0001>

<bundles_post_ra>
// kernel: base_model_forward.1
= control target key start
LH: loop header
LB: loop body
LE: loop exit
PB: predicated region body
PF: predicated region fallthrough
CT: control target
= control target key end

     0   :  { %s6852_s0 = inlined_call_operand.vmem [shape: bf16[128,128], index: 0, kind: input, shape index: {}]   ;;  %s6853_s1 = inlined_call_operand.vmem [shape: bf16[128,128], index: 1, kind: input, shape index: {}]   ;;  %s6854_s2 = inlined_call_operand.vmem [shape: bf16[128,128], index: 2, kind: input, shape index: {}]   ;;  %s6855_s3 = inlined_call_operand.vmem [shape: bf16[128,128], index: 3, kind: input, shape index: {}]   ;;  %s6856_s4 = inlined_call_operand.vmem [shape: bf16[128,128], index: 4, kind: input, shape index: {}]   ;;  %s6857_s5 = inlined_call_operand.vmem [shape: f32[1,128], index: 5, kind: input, shape index: {}]   ;;  %s6858_s6 = inlined_call_operand.vmem [shape: bf16[128,128], index: 6, kind: input, shape index: {}]   ;;  %s6859_s7 = inlined_call_operand.hbm [shape: f32[1,128], index: 7, kind: input, shape index: {}]   ;;  %s6860_s8 = inlined_call_operand.vmem [shape: bf16[128,128], index: 8, kind: input, shape index: {}]   ;;  %s6861_s9 = inlined_call_operand.hbm [shape: bf16[128,128], index: 9, kind: input, shape index: {}]   ;;  %s6862_s10 = inlined_call_operand.hbm [shape: f32[1,128], index: 10, kind: input, shape index: {}]   ;;  %s6863_s11 = inlined_call_operand.hbm [shape: bf16[128,128], index: 11, kind: input, shape index: {}]   ;;  %s6864_s12 = inlined_call_operand.hbm [shape: bf16[128,128], index: 12, kind: input, shape index: {}]   ;;  %s6865_s13 = inlined_call_operand.hbm [shape: f32[1,128], index: 13, kind: input, shape index: {}]   ;;  %s6866_s14 = inlined_call_operand.hbm [shape: bf16[128,128], index: 14, kind: input, shape index: {}]   ;;  %s6867_s15 = inlined_call_operand.hbm [shape: bf16[128,128], index: 15, kind: input, shape index: {}]   ;;  %s6868_s16 = inlined_call_operand.hbm [shape: f32[1,128], index: 16, kind: input, shape index: {}]   ;;  %s6869_s17 = inlined_call_operand.hbm [shape: bf16[128,128], index: 17, kind: input, shape index: {}]   ;;  %s6870_s18 = inlined_call_operand.hbm [shape: bf16[128,128], index: 18, kind: input, shape index: {}]   ;;  %s6871_s19 = inlined_call_operand.hbm [shape: f32[1,128], index: 19, kind: input, shape index: {}]   ;;  %s6872_s20 = inlined_call_operand.hbm [shape: bf16[128,128], index: 20, kind: input, shape index: {}]   ;;  %s6873_s21 = inlined_call_operand.hbm [shape: f32[1,128], index: 21, kind: input, shape index: {}]   ;;  %s6874_s22 = inlined_call_operand.hbm [shape: bf16[128,128], index: 22, kind: input, shape index: {}]   ;;  %s6875_s23 = inlined_call_operand.hbm [shape: f32[1,128], index: 23, kind: input, shape index: {}]   ;;  %s6876_s24 = inlined_call_operand.vmem [shape: f32[128,128], index: 24, kind: output, shape index: {}]  }
   0x1   :  { %6891 = sst [smem:[#allocation41_spill]] %s6852_s0 }
   0x2   :  { %6892 = sst [smem:[#allocation42_spill]] %s6853_s1 }
   0x3   :  { %6893 = sst [smem:[#allocation43_spill]] %s6854_s2 }
   0x4   :  { %6894 = sst [smem:[#allocation44_spill]] %s6855_s3 }
   0x5   :  { %6895 = sst [smem:[#allocation45_spill]] %s6856_s4 }
   0x6   :  { %6896 = sst [smem:[#allocation46_spill]] %s6857_s5 }
   0x7   :  { %6897 = sst [smem:[#allocation47_spill]] %s6858_s6 }
   0x8   :  { %6898 = sst [smem:[#allocation48_spill]] %s6859_s7 }
   0x9   :  { %6899 = sst [smem:[#allocation49_spill]] %s6860_s8 }
   0xa   :  { %6900 = sst [smem:[#allocation50_spill]] %s6876_s24 }
   0xb   :  { %29 = vsyncpa [#allocation3], 0 }
   0xc   :  { %30 = vsyncpa [#allocation5], 0 }
   0xd   :  { %31 = vsyncpa [#allocation8], 0 }
   0xe   :  { %32 = vsyncpa [#allocation11], 0 }
   0xf   :  { %33 = vsyncpa [#allocation14], 0 }
  0x10   :  { %34 = vsyncpa [#allocation17], 0 }
  0x11   :  { %35 = vsyncpa [#allocation20], 0 }
  0x12   :  { %36 = vsyncpa [#allocation23], 0 }
  0x13   :  { %37 = vsyncpa [#allocation26], 0  ;;  %s5520_s5 = smov [#allocation4]   ;;  %s5150_s6 = scalar_lea.hbm %s6861_s9, 1024 }
  0x14   :  { %s69_s26 = sshll.u32 %s5520_s5, 4  ;;  %p5151_p0 = scmp.ne.s32.totalorder %s6861_s9, %s5150_s6  ;;  %s70_s26 = int_to_ptr.vmem [resolvable:$true] %s69_s26 }
  0x15   :  { %p5154_p1 = scmp.lt.u32.totalorder %s5150_s6, %s6861_s9 }
  0x17   :  { %p5156_p2 = pnand %p5154_p1, %p5151_p0 }
  0x19   :  { %5159 = shalt.err (!%p5156_p2)
}
  0x1a   :  { %s5160_s30 = scalar_lea.vmem %s70_s26, 1024  ;;  %p5165_p4 = scmp.lt.s32.totalorder %s70_s26, %s70_s26 }
  0x1b   :  { %p5161_p3 = scmp.ne.s32.totalorder %s70_s26, %s5160_s30  ;;  %p5166_p5 = scmp.lt.s32.totalorder %s5160_s30, %s5160_s30 }
  0x1d   :  { %p5167_p6 = por %p5166_p5, %p5165_p4 }
  0x1f   :  { %p5168_p7 = pnand %p5167_p6, %p5161_p3 }
  0x21   :  { %5171 = shalt.err (!%p5168_p7)
}
  0x22   :  { %s5521_s3 = smov 64   ;;  %s5522_s25 = smov 4  }
  0x23   :  { %75 = dma.hbm_to_vmem [thread:$0]  %s6861_s9, 1024, %s70_s26, [#allocation5], %s5521_s3, %s5521_s3, %s5522_s25  }
  0x24   :  { %s5523_s1 = smov [#allocation7]   ;;  %s5524_s27 = smov [#allocation10]  }
  0x25   :  { %s91_s5 = sshll.u32 %s5523_s1, 4  ;;  %s116_s28 = sshll.u32 %s5524_s27, 4  ;;  %s92_s5 = int_to_ptr.vmem [resolvable:$true] %s91_s5  ;;  %s117_s28 = int_to_ptr.vmem [resolvable:$true] %s116_s28 }
  0x26   :  { %s5172_s29 = scalar_lea.hbm %s6863_s11, 1024 }
  0x27   :  { %p5173_p8 = scmp.ne.s32.totalorder %s6863_s11, %s5172_s29  ;;  %p5176_p9 = scmp.lt.u32.totalorder %s5172_s29, %s6863_s11 }
  0x29   :  { %p5178_p10 = pnand %p5176_p9, %p5173_p8 }
  0x2b   :  { %5181 = shalt.err (!%p5178_p10)
}
  0x2c   :  { %s5182_s9 = scalar_lea.vmem %s92_s5, 1024  ;;  %p5187_p12 = scmp.lt.s32.totalorder %s92_s5, %s92_s5 }
  0x2d   :  { %p5183_p11 = scmp.ne.s32.totalorder %s92_s5, %s5182_s9  ;;  %p5188_p13 = scmp.lt.s32.totalorder %s5182_s9, %s5182_s9 }
  0x2f   :  { %p5189_p0 = por %p5188_p13, %p5187_p12 }
  0x31   :  { %p5190_p1 = pnand %p5189_p0, %p5183_p11 }
  0x33   :  { %5193 = shalt.err (!%p5190_p1)
}
  0x34   :  { %97 = dma.hbm_to_vmem [thread:$0]  %s6863_s11, 1024, %s92_s5, [#allocation8], %s5521_s3, %s5521_s3, %s5522_s25  }
  0x35   :  { %s5194_s1 = scalar_lea.hbm %s6865_s13, 16 }
  0x36   :  { %p5195_p2 = scmp.ne.s32.totalorder %s6865_s13, %s5194_s1  ;;  %p5198_p3 = scmp.lt.u32.totalorder %s5194_s1, %s6865_s13 }
  0x38   :  { %p5200_p4 = pnand %p5198_p3, %p5195_p2 }
  0x3a   :  { %5203 = shalt.err (!%p5200_p4)
}
  0x3b   :  { %s5204_s0 = scalar_lea.vmem %s117_s28, 16  ;;  %s5208_s7 = scalar_lea.vmem %s117_s28, 32 }
  0x3c   :  { %p5205_p5 = scmp.ne.s32.totalorder %s117_s28, %s5204_s0  ;;  %p5209_p6 = scmp.lt.s32.totalorder %s117_s28, %s117_s28 }
  0x3d   :  { %p5210_p7 = scmp.lt.s32.totalorder %s5208_s7, %s5204_s0 }
  0x3f   :  { %p5211_p8 = por %p5210_p7, %p5209_p6 }
  0x41   :  { %p5212_p9 = pnand %p5211_p8, %p5205_p5 }
  0x43   :  { %5215 = shalt.err (!%p5212_p9)
}
  0x44   :  { %119 = dma.hbm_to_vmem [thread:$0]  %s6865_s13, 16, %s117_s28, [#allocation11]  }
  0x45   :  { %s5525_s30 = smov [#allocation13]   ;;  %s5526_s26 = smov [#allocation16]  }
  0x46   :  { %s137_s9 = sshll.u32 %s5525_s30, 4  ;;  %s159_s8 = sshll.u32 %s5526_s26, 4  ;;  %s138_s9 = int_to_ptr.vmem [resolvable:$true] %s137_s9  ;;  %s160_s8 = int_to_ptr.vmem [resolvable:$true] %s159_s8 }
  0x47   :  { %s5216_s1 = scalar_lea.hbm %s6867_s15, 1024 }
  0x48   :  { %p5217_p10 = scmp.ne.s32.totalorder %s6867_s15, %s5216_s1  ;;  %p5220_p11 = scmp.lt.u32.totalorder %s5216_s1, %s6867_s15 }
  0x4a   :  { %p5222_p12 = pnand %p5220_p11, %p5217_p10 }
  0x4c   :  { %5225 = shalt.err (!%p5222_p12)
}
  0x4d   :  { %s5226_s13 = scalar_lea.vmem %s138_s9, 1024  ;;  %p5231_p0 = scmp.lt.s32.totalorder %s138_s9, %s138_s9 }
  0x4e   :  { %p5227_p13 = scmp.ne.s32.totalorder %s138_s9, %s5226_s13  ;;  %p5232_p1 = scmp.lt.s32.totalorder %s5226_s13, %s5226_s13 }
  0x50   :  { %p5233_p2 = por %p5232_p1, %p5231_p0 }
  0x52   :  { %p5234_p3 = pnand %p5233_p2, %p5227_p13 }
  0x54   :  { %5237 = shalt.err (!%p5234_p3)
}
  0x55   :  { %143 = dma.hbm_to_vmem [thread:$0]  %s6867_s15, 1024, %s138_s9, [#allocation14], %s5521_s3, %s5521_s3, %s5522_s25  }
  0x56   :  { %s5238_s5 = scalar_lea.hbm %s6869_s17, 1024 }
  0x57   :  { %p5239_p4 = scmp.ne.s32.totalorder %s6869_s17, %s5238_s5  ;;  %p5242_p5 = scmp.lt.u32.totalorder %s5238_s5, %s6869_s17 }
  0x59   :  { %p5244_p6 = pnand %p5242_p5, %p5239_p4 }
  0x5b   :  { %5247 = shalt.err (!%p5244_p6)
}
  0x5c   :  { %s5248_s1 = scalar_lea.vmem %s160_s8, 1024  ;;  %p5253_p8 = scmp.lt.s32.totalorder %s160_s8, %s160_s8 }
  0x5d   :  { %p5249_p7 = scmp.ne.s32.totalorder %s160_s8, %s5248_s1  ;;  %p5254_p9 = scmp.lt.s32.totalorder %s5248_s1, %s5248_s1 }
  0x5f   :  { %p5255_p10 = por %p5254_p9, %p5253_p8 }
  0x61   :  { %p5256_p11 = pnand %p5255_p10, %p5249_p7 }
  0x63   :  { %5259 = shalt.err (!%p5256_p11)
}
  0x64   :  { %165 = dma.hbm_to_vmem [thread:$0]  %s6869_s17, 1024, %s160_s8, [#allocation17], %s5521_s3, %s5521_s3, %s5522_s25  }
  0x65   :  { %s5527_s27 = smov [#allocation19]   ;;  %s5528_s2 = smov [#allocation22]  }
  0x66   :  { %s184_s6 = sshll.u32 %s5527_s27, 4  ;;  %s206_s29 = sshll.u32 %s5528_s2, 4  ;;  %s185_s6 = int_to_ptr.vmem [resolvable:$true] %s184_s6  ;;  %s207_s29 = int_to_ptr.vmem [resolvable:$true] %s206_s29 }
  0x67   :  { %s5260_s0 = scalar_lea.hbm %s6871_s19, 16 }
  0x68   :  { %p5261_p12 = scmp.ne.s32.totalorder %s6871_s19, %s5260_s0  ;;  %p5264_p13 = scmp.lt.u32.totalorder %s5260_s0, %s6871_s19 }
  0x6a   :  { %p5266_p0 = pnand %p5264_p13, %p5261_p12 }
  0x6c   :  { %5269 = shalt.err (!%p5266_p0)
}
  0x6d   :  { %s5270_s17 = scalar_lea.vmem %s185_s6, 16  ;;  %s5274_s8 = scalar_lea.vmem %s185_s6, 32 }
  0x6e   :  { %p5271_p1 = scmp.ne.s32.totalorder %s185_s6, %s5270_s17  ;;  %p5275_p2 = scmp.lt.s32.totalorder %s185_s6, %s185_s6 }
  0x6f   :  { %p5276_p3 = scmp.lt.s32.totalorder %s5274_s8, %s5270_s17 }
  0x71   :  { %p5277_p4 = por %p5276_p3, %p5275_p2 }
  0x73   :  { %p5278_p5 = pnand %p5277_p4, %p5271_p1 }
  0x75   :  { %5281 = shalt.err (!%p5278_p5)
}
  0x76   :  { %187 = dma.hbm_to_vmem [thread:$0]  %s6871_s19, 16, %s185_s6, [#allocation20]  }
  0x77   :  { %s5282_s15 = scalar_lea.hbm %s6873_s21, 16 }
  0x78   :  { %p5283_p6 = scmp.ne.s32.totalorder %s6873_s21, %s5282_s15  ;;  %p5286_p7 = scmp.lt.u32.totalorder %s5282_s15, %s6873_s21 }
  0x7a   :  { %p5288_p8 = pnand %p5286_p7, %p5283_p6 }
  0x7c   :  { %5291 = shalt.err (!%p5288_p8)
}
  0x7d   :  { %s5292_s28 = scalar_lea.vmem %s207_s29, 16  ;;  %s5296_s0 = scalar_lea.vmem %s207_s29, 32 }
  0x7e   :  { %p5293_p9 = scmp.ne.s32.totalorder %s207_s29, %s5292_s28  ;;  %p5297_p10 = scmp.lt.s32.totalorder %s207_s29, %s207_s29 }
  0x7f   :  { %p5298_p11 = scmp.lt.s32.totalorder %s5296_s0, %s5292_s28 }
  0x81   :  { %p5299_p12 = por %p5298_p11, %p5297_p10 }
  0x83   :  { %p5300_p13 = pnand %p5299_p12, %p5293_p9 }
  0x85   :  { %5303 = shalt.err (!%p5300_p13)
}
  0x86   :  { %209 = dma.hbm_to_vmem [thread:$0]  %s6873_s21, 16, %s207_s29, [#allocation23]  }
  0x87   :  { %s5529_s7 = smov [#allocation2]   ;;  %s5530_s5 = smov [#allocation6]  }
  0x88   :  { %s58_s11 = sshll.u32 %s5529_s7, 4  ;;  %s82_s30 = sshll.u32 %s5530_s5, 4  ;;  %s59_s11 = int_to_ptr.vmem [resolvable:$true] %s58_s11  ;;  %s83_s30 = int_to_ptr.vmem [resolvable:$true] %s82_s30 }
  0x89   :  { %s6901_s26 = sld [smem:[#allocation48_spill]] }
  0x8f   :  { %s5304_s4 = scalar_lea.hbm %s6901_s26, 16 }
  0x90   :  { %p5305_p0 = scmp.ne.s32.totalorder %s6901_s26, %s5304_s4  ;;  %p5308_p1 = scmp.lt.u32.totalorder %s5304_s4, %s6901_s26 }
  0x92   :  { %p5310_p2 = pnand %p5308_p1, %p5305_p0 }
  0x94   :  { %5313 = shalt.err (!%p5310_p2)
}
  0x95   :  { %s5314_s21 = scalar_lea.vmem %s59_s11, 16  ;;  %s5318_s29 = scalar_lea.vmem %s59_s11, 32 }
  0x96   :  { %p5315_p3 = scmp.ne.s32.totalorder %s59_s11, %s5314_s21  ;;  %p5319_p4 = scmp.lt.s32.totalorder %s59_s11, %s59_s11 }
  0x97   :  { %p5320_p5 = scmp.lt.s32.totalorder %s5318_s29, %s5314_s21 }
  0x99   :  { %p5321_p6 = por %p5320_p5, %p5319_p4 }
  0x9b   :  { %p5322_p7 = pnand %p5321_p6, %p5315_p3 }
  0x9d   :  { %5325 = shalt.err (!%p5322_p7)
}
  0x9e   :  { %61 = dma.hbm_to_vmem [thread:$0]  %s6901_s26, 16, %s59_s11, [#allocation3]  }
  0x9f   :  { %s5326_s0 = scalar_lea.hbm %s6862_s10, 16 }
  0xa0   :  { %p5327_p8 = scmp.ne.s32.totalorder %s6862_s10, %s5326_s0  ;;  %p5330_p9 = scmp.lt.u32.totalorder %s5326_s0, %s6862_s10 }
  0xa2   :  { %p5332_p10 = pnand %p5330_p9, %p5327_p8 }
  0xa4   :  { %5335 = shalt.err (!%p5332_p10)
}
  0xa5   :  { %s5336_s17 = scalar_lea.vmem %s83_s30, 16  ;;  %s5340_s8 = scalar_lea.vmem %s83_s30, 32 }
  0xa6   :  { %p5337_p11 = scmp.ne.s32.totalorder %s83_s30, %s5336_s17  ;;  %p5341_p12 = scmp.lt.s32.totalorder %s83_s30, %s83_s30 }
  0xa7   :  { %p5342_p13 = scmp.lt.s32.totalorder %s5340_s8, %s5336_s17 }
  0xa9   :  { %p5343_p0 = por %p5342_p13, %p5341_p12 }
  0xab   :  { %p5344_p1 = pnand %p5343_p0, %p5337_p11 }
  0xad   :  { %5347 = shalt.err (!%p5344_p1)
}
  0xae   :  { %85 = dma.hbm_to_vmem [thread:$0]  %s6862_s10, 16, %s83_s30, [#allocation5]  }
  0xaf   :  { %s5531_s4 = smov [#allocation9]   ;;  %s5532_s1 = smov [#allocation12]  }
  0xb0   :  { %s103_s24 = sshll.u32 %s5531_s4, 4  ;;  %s125_s15 = sshll.u32 %s5532_s1, 4  ;;  %s104_s24 = int_to_ptr.vmem [resolvable:$true] %s103_s24  ;;  %s126_s15 = int_to_ptr.vmem [resolvable:$true] %s125_s15 }
  0xb1   :  { %s5348_s29 = scalar_lea.hbm %s6864_s12, 1024 }
  0xb2   :  { %p5349_p2 = scmp.ne.s32.totalorder %s6864_s12, %s5348_s29  ;;  %p5352_p3 = scmp.lt.u32.totalorder %s5348_s29, %s6864_s12 }
  0xb4   :  { %p5354_p4 = pnand %p5352_p3, %p5349_p2 }
  0xb6   :  { %5357 = shalt.err (!%p5354_p4)
}
  0xb7   :  { %s5358_s10 = scalar_lea.vmem %s104_s24, 1024  ;;  %p5363_p6 = scmp.lt.s32.totalorder %s104_s24, %s104_s24 }
  0xb8   :  { %p5359_p5 = scmp.ne.s32.totalorder %s104_s24, %s5358_s10  ;;  %p5364_p7 = scmp.lt.s32.totalorder %s5358_s10, %s5358_s10 }
  0xba   :  { %p5365_p8 = por %p5364_p7, %p5363_p6 }
  0xbc   :  { %p5366_p9 = pnand %p5365_p8, %p5359_p5 }
  0xbe   :  { %5369 = shalt.err (!%p5366_p9)
}
  0xbf   :  { %109 = dma.hbm_to_vmem [thread:$0]  %s6864_s12, 1024, %s104_s24, [#allocation8], %s5521_s3, %s5521_s3, %s5522_s25  }
  0xc0   :  { %s5370_s7 = scalar_lea.hbm %s6866_s14, 1024 }
  0xc1   :  { %p5371_p10 = scmp.ne.s32.totalorder %s6866_s14, %s5370_s7  ;;  %p5374_p11 = scmp.lt.u32.totalorder %s5370_s7, %s6866_s14 }
  0xc3   :  { %p5376_p12 = pnand %p5374_p11, %p5371_p10 }
  0xc5   :  { %5379 = shalt.err (!%p5376_p12)
}
  0xc6   :  { %s5380_s26 = scalar_lea.vmem %s126_s15, 1024  ;;  %p5385_p0 = scmp.lt.s32.totalorder %s126_s15, %s126_s15 }
  0xc7   :  { %p5381_p13 = scmp.ne.s32.totalorder %s126_s15, %s5380_s26  ;;  %p5386_p1 = scmp.lt.s32.totalorder %s5380_s26, %s5380_s26 }
  0xc9   :  { %p5387_p2 = por %p5386_p1, %p5385_p0 }
  0xcb   :  { %p5388_p3 = pnand %p5387_p2, %p5381_p13 }
  0xcd   :  { %5391 = shalt.err (!%p5388_p3)
}
  0xce   :  { %131 = dma.hbm_to_vmem [thread:$0]  %s6866_s14, 1024, %s126_s15, [#allocation11], %s5521_s3, %s5521_s3, %s5522_s25  }
  0xcf   :  { %s5533_s24 = smov [#allocation15]   ;;  %s5534_s9 = smov [#allocation18]  }
  0xd0   :  { %s150_s1 = sshll.u32 %s5533_s24, 4  ;;  %s171_s21 = sshll.u32 %s5534_s9, 4  ;;  %s151_s1 = int_to_ptr.vmem [resolvable:$true] %s150_s1  ;;  %s172_s21 = int_to_ptr.vmem [resolvable:$true] %s171_s21 }
  0xd1   :  { %s5392_s2 = scalar_lea.hbm %s6868_s16, 16 }
  0xd2   :  { %p5393_p4 = scmp.ne.s32.totalorder %s6868_s16, %s5392_s2  ;;  %p5396_p5 = scmp.lt.u32.totalorder %s5392_s2, %s6868_s16 }
  0xd4   :  { %p5398_p6 = pnand %p5396_p5, %p5393_p4 }
  0xd6   :  { %5401 = shalt.err (!%p5398_p6)
}
  0xd7   :  { %s5402_s14 = scalar_lea.vmem %s151_s1, 16  ;;  %s5406_s15 = scalar_lea.vmem %s151_s1, 32 }
  0xd8   :  { %p5403_p7 = scmp.ne.s32.totalorder %s151_s1, %s5402_s14  ;;  %p5407_p8 = scmp.lt.s32.totalorder %s151_s1, %s151_s1 }
  0xd9   :  { %p5408_p9 = scmp.lt.s32.totalorder %s5406_s15, %s5402_s14 }
  0xdb   :  { %p5409_p10 = por %p5408_p9, %p5407_p8 }
  0xdd   :  { %p5410_p11 = pnand %p5409_p10, %p5403_p7 }
  0xdf   :  { %5413 = shalt.err (!%p5410_p11)
}
  0xe0   :  { %153 = dma.hbm_to_vmem [thread:$0]  %s6868_s16, 16, %s151_s1, [#allocation14]  }
  0xe1   :  { %s5414_s5 = scalar_lea.hbm %s6870_s18, 1024 }
  0xe2   :  { %p5415_p12 = scmp.ne.s32.totalorder %s6870_s18, %s5414_s5  ;;  %p5418_p13 = scmp.lt.u32.totalorder %s5414_s5, %s6870_s18 }
  0xe4   :  { %p5420_p0 = pnand %p5418_p13, %p5415_p12 }
  0xe6   :  { %5423 = shalt.err (!%p5420_p0)
}
  0xe7   :  { %s5424_s12 = scalar_lea.vmem %s172_s21, 1024  ;;  %p5429_p2 = scmp.lt.s32.totalorder %s172_s21, %s172_s21 }
  0xe8   :  { %p5425_p1 = scmp.ne.s32.totalorder %s172_s21, %s5424_s12  ;;  %p5430_p3 = scmp.lt.s32.totalorder %s5424_s12, %s5424_s12 }
  0xea   :  { %p5431_p4 = por %p5430_p3, %p5429_p2 }
  0xec   :  { %p5432_p5 = pnand %p5431_p4, %p5425_p1 }
  0xee   :  { %5435 = shalt.err (!%p5432_p5)
}
  0xef   :  { %177 = dma.hbm_to_vmem [thread:$0]  %s6870_s18, 1024, %s172_s21, [#allocation17], %s5521_s3, %s5521_s3, %s5522_s25  }
  0xf0   :  { %s5535_s24 = smov [#allocation21]   ;;  %s5536_s9 = smov [#allocation24]  }
  0xf1   :  { %s193_s1 = sshll.u32 %s5535_s24, 4  ;;  %s215_s29 = sshll.u32 %s5536_s9, 4  ;;  %s194_s1 = int_to_ptr.vmem [resolvable:$true] %s193_s1  ;;  %s216_s29 = int_to_ptr.vmem [resolvable:$true] %s215_s29 }
  0xf2   :  { %s5436_s13 = scalar_lea.hbm %s6872_s20, 1024 }
  0xf3   :  { %p5437_p6 = scmp.ne.s32.totalorder %s6872_s20, %s5436_s13  ;;  %p5440_p7 = scmp.lt.u32.totalorder %s5436_s13, %s6872_s20 }
  0xf5   :  { %p5442_p8 = pnand %p5440_p7, %p5437_p6 }
  0xf7   :  { %5445 = shalt.err (!%p5442_p8)
}
  0xf8   :  { %s5446_s18 = scalar_lea.vmem %s194_s1, 1024  ;;  %p5451_p10 = scmp.lt.s32.totalorder %s194_s1, %s194_s1 }
  0xf9   :  { %p5447_p9 = scmp.ne.s32.totalorder %s194_s1, %s5446_s18  ;;  %p5452_p11 = scmp.lt.s32.totalorder %s5446_s18, %s5446_s18 }
  0xfb   :  { %p5453_p12 = por %p5452_p11, %p5451_p10 }
  0xfd   :  { %p5454_p13 = pnand %p5453_p12, %p5447_p9 }
  0xff   :  { %5457 = shalt.err (!%p5454_p13)
}
 0x100   :  { %199 = dma.hbm_to_vmem [thread:$0]  %s6872_s20, 1024, %s194_s1, [#allocation20], %s5521_s3, %s5521_s3, %s5522_s25  }
 0x101   :  { %s5458_s6 = scalar_lea.hbm %s6874_s22, 1024 }
 0x102   :  { %p5459_p0 = scmp.ne.s32.totalorder %s6874_s22, %s5458_s6  ;;  %p5462_p1 = scmp.lt.u32.totalorder %s5458_s6, %s6874_s22 }
 0x104   :  { %p5464_p2 = pnand %p5462_p1, %p5459_p0 }
 0x106   :  { %5467 = shalt.err (!%p5464_p2)
}
 0x107   :  { %s5468_s11 = scalar_lea.vmem %s216_s29, 1024  ;;  %p5473_p4 = scmp.lt.s32.totalorder %s216_s29, %s216_s29 }
 0x108   :  { %p5469_p3 = scmp.ne.s32.totalorder %s216_s29, %s5468_s11  ;;  %p5474_p5 = scmp.lt.s32.totalorder %s5468_s11, %s5468_s11 }
 0x10a   :  { %p5475_p6 = por %p5474_p5, %p5473_p4 }
 0x10c   :  { %p5476_p7 = pnand %p5475_p6, %p5469_p3 }
 0x10e   :  { %5479 = shalt.err (!%p5476_p7)
}
 0x10f   :  { %221 = dma.hbm_to_vmem [thread:$0]  %s6874_s22, 1024, %s216_s29, [#allocation23], %s5521_s3, %s5521_s3, %s5522_s25  }
 0x110   :  { %s5537_s12 = smov [#allocation25]   ;;  %s5480_s1 = scalar_lea.hbm %s6875_s23, 16 }
 0x111   :  { %s228_s16 = sshll.u32 %s5537_s12, 4  ;;  %p5481_p8 = scmp.ne.s32.totalorder %s6875_s23, %s5480_s1  ;;  %s229_s16 = int_to_ptr.vmem [resolvable:$true] %s228_s16 }
 0x112   :  { %p5484_p9 = scmp.lt.u32.totalorder %s5480_s1, %s6875_s23 }
 0x114   :  { %p5486_p10 = pnand %p5484_p9, %p5481_p8 }
 0x116   :  { %5489 = shalt.err (!%p5486_p10)
}
 0x117   :  { %s5490_s28 = scalar_lea.vmem %s229_s16, 16  ;;  %s5494_s22 = scalar_lea.vmem %s229_s16, 32 }
 0x118   :  { %p5491_p11 = scmp.ne.s32.totalorder %s229_s16, %s5490_s28  ;;  %p5495_p12 = scmp.lt.s32.totalorder %s229_s16, %s229_s16 }
 0x119   :  { %p5496_p13 = scmp.lt.s32.totalorder %s5494_s22, %s5490_s28 }
 0x11b   :  { %p5497_p0 = por %p5496_p13, %p5495_p12 }
 0x11d   :  { %p5498_p1 = pnand %p5497_p0, %p5491_p11 }
 0x11f   :  { %5501 = shalt.err (!%p5498_p1)
}
 0x120   :  { %231 = dma.hbm_to_vmem [thread:$0]  %s6875_s23, 16, %s229_s16, [#allocation26]  }
 0x121   :  { %5502 = dma.done.wait [#allocation3], 16  }
 0x122   :  { %5503 = vsyncadd [#allocation3], 4294967280 }
 0x123   :  { %5504 = dma.done.wait [#allocation5], 1040  }
 0x124   :  { %5505 = vsyncadd [#allocation5], 4294966256 }
 0x125   :  { %5506 = dma.done.wait [#allocation8], 2048  }
 0x126   :  { %5507 = vsyncadd [#allocation8], 4294965248 }
 0x127   :  { %5508 = dma.done.wait [#allocation11], 1040  }
 0x128   :  { %5509 = vsyncadd [#allocation11], 4294966256 }
 0x129   :  { %5510 = dma.done.wait [#allocation14], 1040  }
 0x12a   :  { %5511 = vsyncadd [#allocation14], 4294966256 }
 0x12b   :  { %5512 = dma.done.wait [#allocation17], 2048  }
 0x12c   :  { %5513 = vsyncadd [#allocation17], 4294965248 }
 0x12d   :  { %5514 = dma.done.wait [#allocation20], 1040  }
 0x12e   :  { %5515 = vsyncadd [#allocation20], 4294966256 }
 0x12f   :  { %5516 = dma.done.wait [#allocation23], 1040  }
 0x130   :  { %5517 = vsyncadd [#allocation23], 4294966256 }
 0x131   :  { %5518 = dma.done.wait [#allocation26], 16  }
 0x132   :  { %5519 = vsyncadd [#allocation26], 4294967280  ;;  %s6902_s10 = sld [smem:[#allocation45_spill]]  ;;  %s6903_s7 = sld [smem:[#allocation41_spill]]  ;;  %v4921_v32 = vld [vmem:[#allocation4] sm:$0xff]   ;;  %v4922_v33 = vld [vmem:[#allocation4 + $0x8] sm:$0xff]  }
 0x133   :  { %s6904_s1 = sld [smem:[#allocation47_spill]]  ;;  %s6905_s24 = sld [smem:[#allocation42_spill]]  ;;  %v4923_v34 = vld [vmem:[#allocation4 + $0x10] sm:$0xff]   ;;  %v4924_v35 = vld [vmem:[#allocation4 + $0x18] sm:$0xff]   ;;  %v4925_v36 = vld [vmem:[#allocation4 + $0x20] sm:$0xff]  }
 0x134   :  { %v4926_v37 = vld [vmem:[#allocation4 + $0x28] sm:$0xff]   ;;  %v4927_v38 = vld [vmem:[#allocation4 + $0x30] sm:$0xff]   ;;  %v4928_v39 = vld [vmem:[#allocation4 + $0x38] sm:$0xff]   ;;  %s6906_s0 = sld [smem:[#allocation44_spill]]  ;;  %s6907_s5 = sld [smem:[#allocation46_spill]] }
 0x135   :  { %s6908_s11 = sld [smem:[#allocation49_spill]]  ;;  %s6909_s19 = sld [smem:[#allocation43_spill]] }
 0x138   :  { %v4889_v0 = vld [vmem:[%s6902_s10] sm:$0xff]   ;;  %v4890_v1 = vld [vmem:[%s6902_s10 + $0x8] sm:$0xff]   ;;  %v4891_v2 = vld [vmem:[%s6902_s10 + $0x10] sm:$0xff]  }
 0x139   :  { %4263 = vmatprep.subr.bf16.mxu1 %v4889_v0  ;;  %v4892_v3 = vld [vmem:[%s6902_s10 + $0x18] sm:$0xff]   ;;  %v4897_v4 = vld [vmem:[%s6903_s7] sm:$0xff]   ;;  %v4894_v6 = vld [vmem:[%s6902_s10 + $0x28] sm:$0xff]  }
 0x13a   :  { %4264 = vmatpush3.bf16.msra.mxu1 %v4889_v0  ;;  %4279 = vmatprep.mubr.bf16.mxu1 %v4897_v4  ;;  %v4893_v5 = vld [vmem:[%s6902_s10 + $0x20] sm:$0xff]   ;;  %v4895_v7 = vld [vmem:[%s6902_s10 + $0x30] sm:$0xff]   ;;  %v4896_v8 = vld [vmem:[%s6902_s10 + $0x38] sm:$0xff]  }
 0x13b   :  { %4265 = vmatprep.subr.bf16.mxu1 %v4890_v1  ;;  %v4899_v9 = vld [vmem:[%s6904_s1] sm:$0xff]   ;;  %v4898_v10 = vld [vmem:[%s6903_s7 + $0x8] sm:$0xff]   ;;  %v4901_v12 = vld [vmem:[%s6903_s7 + $0x10] sm:$0xff]  }
 0x13c   :  { %v4900_v11 = vld [vmem:[%s6904_s1 + $0x8] sm:$0xff]   ;;  %v4903_v13 = vld [vmem:[%s6904_s1 + $0x10] sm:$0xff]   ;;  %v4902_v14 = vld [vmem:[%s6903_s7 + $0x18] sm:$0xff]  }
 0x13d   :  { %v4905_v15 = vld [vmem:[%s6903_s7 + $0x20] sm:$0xff]   ;;  %v4904_v16 = vld [vmem:[%s6904_s1 + $0x18] sm:$0xff]   ;;  %v4906_v18 = vld [vmem:[%s6903_s7 + $0x28] sm:$0xff]  }
 0x13e   :  { %4266 = vmatpush3.bf16.msra.mxu1 %v4890_v1  ;;  %v4907_v17 = vld [vmem:[%s6904_s1 + $0x20] sm:$0xff]   ;;  %v4909_v19 = vld [vmem:[%s6903_s7 + $0x30] sm:$0xff]   ;;  %v4908_v20 = vld [vmem:[%s6904_s1 + $0x28] sm:$0xff]  }
 0x13f   :  { %4267 = vmatprep.subr.bf16.mxu1 %v4891_v2  ;;  %v4911_v21 = vld [vmem:[%s6904_s1 + $0x30] sm:$0xff]   ;;  %v4910_v22 = vld [vmem:[%s6903_s7 + $0x38] sm:$0xff]   ;;  %v4913_v23 = vld [vmem:[%s6905_s24] sm:$0xff]  }
 0x140   :  { %v4912_v24 = vld [vmem:[%s6904_s1 + $0x38] sm:$0xff]   ;;  %v4914_v25 = vld [vmem:[%s6905_s24 + $0x8] sm:$0xff]   ;;  %v4915_v26 = vld [vmem:[%s6905_s24 + $0x10] sm:$0xff]  }
 0x141   :  { %v4916_v27 = vld [vmem:[%s6905_s24 + $0x18] sm:$0xff]   ;;  %v4917_v28 = vld [vmem:[%s6905_s24 + $0x20] sm:$0xff]   ;;  %v4918_v29 = vld [vmem:[%s6905_s24 + $0x28] sm:$0xff]  }
 0x142   :  { %4268 = vmatpush3.bf16.msra.mxu1 %v4891_v2  ;;  %v4919_v30 = vld [vmem:[%s6905_s24 + $0x30] sm:$0xff]   ;;  %v4920_v31 = vld [vmem:[%s6905_s24 + $0x38] sm:$0xff]   ;;  %v5981_v40 = vld [vmem:[%s6906_s0] sm:$0xff]  }
 0x143   :  { %4269 = vmatprep.subr.bf16.mxu1 %v4892_v3  ;;  %4343 = vmatprep.mubr.bf16.mxu0 %v5981_v40  ;;  %v5987_v41 = vld [vmem:[%s6907_s5] ss:$0 sm:$0xff]  ;;  %s6920_s5 = sld [smem:[#allocation50_spill]] }
 0x144   :  { %v5996_v51 = vld [vmem:[%s6908_s11] sm:$0xff]  }
 0x146   :  { %4270 = vmatpush3.bf16.msra.mxu1 %v4892_v3 }
 0x147   :  { %4271 = vmatprep.subr.bf16.mxu1 %v4893_v5 }
 0x14a   :  { %4272 = vmatpush3.bf16.msra.mxu1 %v4893_v5 }
 0x14b   :  { %4273 = vmatprep.subr.bf16.mxu1 %v4894_v6 }
 0x14e   :  { %4274 = vmatpush3.bf16.msra.mxu1 %v4894_v6 }
 0x14f   :  { %4275 = vmatprep.subr.bf16.mxu1 %v4895_v7 }
 0x152   :  { %4276 = vmatpush3.bf16.msra.mxu1 %v4895_v7 }
 0x153   :  { %4277 = vmatprep.subr.bf16.mxu1 %v4896_v8 }
 0x156   :  { %4278 = vmatpush3.bf16.msra.mxu1 %v4896_v8 }
 0x157   :  { %4295 = vmatprep.subr.bf16.mxu1 %v4899_v9 }
 0x159   :  { %4280 = vmatmul.mubr.bf16.vlgmr.msra.gmra.mrb[0].mxu1 %v4898_v10 }
 0x15a   :  { %4296 = vmatpush3.bf16.msra.mxu1 %v4899_v9  ;;  %4283 = vmatprep.mubr.bf16.mxu1 %v4901_v12 }
 0x15b   :  { %4297 = vmatprep.subr.bf16.mxu1 %v4900_v11 }
 0x15e   :  { %4298 = vmatpush3.bf16.msra.mxu1 %v4900_v11 }
 0x15f   :  { %4299 = vmatprep.subr.bf16.mxu1 %v4903_v13 }
 0x161   :  { %4284 = vmatmul.mubr.bf16.gmra.mrb[4].mxu1 %v4902_v14 }
 0x162   :  { %4300 = vmatpush3.bf16.msra.mxu1 %v4903_v13  ;;  %4287 = vmatprep.mubr.bf16.mxu1 %v4905_v15 }
 0x163   :  { %4301 = vmatprep.subr.bf16.mxu1 %v4904_v16 }
 0x166   :  { %4302 = vmatpush3.bf16.msra.mxu1 %v4904_v16 }
 0x167   :  { %4303 = vmatprep.subr.bf16.mxu1 %v4907_v17 }
 0x169   :  { %4288 = vmatmul.mubr.bf16.gmra.mrb[8].mxu1 %v4906_v18 }
 0x16a   :  { %4304 = vmatpush3.bf16.msra.mxu1 %v4907_v17  ;;  %4291 = vmatprep.mubr.bf16.mxu1 %v4909_v19 }
 0x16b   :  { %4305 = vmatprep.subr.bf16.mxu1 %v4908_v20 }
 0x16e   :  { %4306 = vmatpush3.bf16.msra.mxu1 %v4908_v20 }
 0x16f   :  { %4307 = vmatprep.subr.bf16.mxu1 %v4911_v21 }
 0x171   :  { %4292 = vmatmul.mubr.bf16.gmra.mrb[12].mxu1 %v4910_v22 }
 0x172   :  { %4308 = vmatpush3.bf16.msra.mxu1 %v4911_v21  ;;  %4311 = vmatprep.mubr.bf16.mxu1 %v4913_v23 }
 0x173   :  { %4309 = vmatprep.subr.bf16.mxu1 %v4912_v24 }
 0x176   :  { %4310 = vmatpush3.bf16.msra.mxu1 %v4912_v24 }
 0x177   :  { %4359 = vmatprep.subr.bf16.mxu1 %v4921_v32 }
 0x179   :  { %4312 = vmatmul.mubr.bf16.vlgmr.msra.gmra.mrb[16].mxu1 %v4914_v25 }
 0x17a   :  { %4315 = vmatprep.mubr.bf16.mxu1 %v4915_v26  ;;  %4360 = vmatpush3.bf16.msra.mxu1 %v4921_v32 }
 0x17b   :  { %4361 = vmatprep.subr.bf16.mxu1 %v4922_v33 }
 0x17e   :  { %4362 = vmatpush3.bf16.msra.mxu1 %v4922_v33 }
 0x17f   :  { %4363 = vmatprep.subr.bf16.mxu1 %v4923_v34 }
 0x181   :  { %4316 = vmatmul.mubr.bf16.gmra.mrb[20].mxu1 %v4916_v27 }
 0x182   :  { %4319 = vmatprep.mubr.bf16.mxu1 %v4917_v28  ;;  %4364 = vmatpush3.bf16.msra.mxu1 %v4923_v34 }
 0x183   :  { %4365 = vmatprep.subr.bf16.mxu1 %v4924_v35 }
 0x186   :  { %4366 = vmatpush3.bf16.msra.mxu1 %v4924_v35 }
 0x187   :  { %4367 = vmatprep.subr.bf16.mxu1 %v4925_v36 }
 0x189   :  { %4320 = vmatmul.mubr.bf16.gmra.mrb[24].mxu1 %v4918_v29 }
 0x18a   :  { %4323 = vmatprep.mubr.bf16.mxu1 %v4919_v30  ;;  %4368 = vmatpush3.bf16.msra.mxu1 %v4925_v36 }
 0x18b   :  { %4369 = vmatprep.subr.bf16.mxu1 %v4926_v37 }
 0x18e   :  { %4370 = vmatpush3.bf16.msra.mxu1 %v4926_v37 }
 0x18f   :  { %4371 = vmatprep.subr.bf16.mxu1 %v4927_v38 }
 0x191   :  { %4324 = vmatmul.mubr.bf16.gmra.mrb[28].mxu1 %v4920_v31 }
 0x192   :  { %4372 = vmatpush3.bf16.msra.mxu1 %v4927_v38 }
 0x193   :  { %4373 = vmatprep.subr.bf16.mxu1 %v4928_v39 }
 0x196   :  { %4374 = vmatpush3.bf16.msra.mxu1 %v4928_v39 }
 0x197   :  { %4391 = vmatprep.subr.bf16.mxu1 %v5996_v51 }
 0x22c   :  { %v4281_v42 = vpop.f32.mrb[0].mxu1 }
 0x22d   :  { %v450_v43 = vpop.f32.mrb[1].mxu1  ;;  %v459_v44 = vadd.f32 %v4281_v42, %v5987_v41 }
 0x22e   :  { %v451_v45 = vadd.f32 %v5987_v41, %v450_v43  ;;  %v4282_v46 = vpop.f32.mrb[2].mxu1 }
 0x22f   :  { %v462_v47 = vadd.f32 %v4282_v46, %v5987_v41  ;;  %v453_v48 = vpop.f32.mrb[3].mxu1  ;;  %v531_v53 = vmul.f32 0.01, %v459_v44  ;;  %vm515_vm3 = vcmp.gt.f32.partialorder %v459_v44, 0.0 }
 0x230   :  { %v529_v49 = vmul.f32 0.01, %v451_v45  ;;  %v454_v50 = vadd.f32 %v5987_v41, %v453_v48  ;;  %vm513_vm0 = vcmp.gt.f32.partialorder %v451_v45, 0.0 }
 0x231   :  { %vm516_vm1 = vcmp.gt.f32.partialorder %v462_v47, 0.0  ;;  %v532_v52 = vmul.f32 0.01, %v462_v47  ;;  %v6011_v0 = vsel %vm515_vm3, %v459_v44, %v531_v53 }
 0x232   :  { %vm514_vm2 = vcmp.gt.f32.partialorder %v454_v50, 0.0  ;;  %v530_v54 = vmul.f32 0.01, %v454_v50  ;;  %v5999_v56 = vsel %vm513_vm0, %v451_v45, %v529_v49  ;;  %v6070_v45 = vld [vmem:[#allocation2] ss:$0 sm:$0xff] }
 0x233   :  { %v6003_v58 = vsel %vm516_vm1, %v462_v47, %v532_v52 }
 0x234   :  { %v4285_v55 = vpop.f32.mrb[4].mxu1  ;;  %v6001_v57 = vsel %vm514_vm2, %v454_v50, %v530_v54  ;;  %v6017_v3 = vpack.c.bf16 %v6003_v58, %v6011_v0 }
 0x235   :  { %v466_v59 = vpop.f32.mrb[5].mxu1  ;;  %v6007_v60 = vpack.c.bf16 %v6001_v57, %v5999_v56  ;;  %v475_v61 = vadd.f32 %v4285_v55, %v5987_v41 }
 0x236   :  { %v467_v62 = vadd.f32 %v5987_v41, %v466_v59  ;;  %v4286_v63 = vpop.f32.mrb[6].mxu1 }
 0x237   :  { %v478_v1 = vadd.f32 %v4286_v63, %v5987_v41  ;;  %v469_v2 = vpop.f32.mrb[7].mxu1  ;;  %4327 = vmatprep.subr.bf16.mxu0 %v6007_v60  ;;  %v535_v7 = vmul.f32 0.01, %v475_v61  ;;  %vm519_vm7 = vcmp.gt.f32.partialorder %v475_v61, 0.0 }
 0x238   :  { %v533_v4 = vmul.f32 0.01, %v467_v62  ;;  %v470_v5 = vadd.f32 %v5987_v41, %v469_v2  ;;  %4328 = vmatpush3.bf16.msra.mxu0 %v6007_v60  ;;  %vm517_vm4 = vcmp.gt.f32.partialorder %v467_v62, 0.0 }
 0x239   :  { %vm520_vm5 = vcmp.gt.f32.partialorder %v478_v1, 0.0  ;;  %v536_v6 = vmul.f32 0.01, %v478_v1  ;;  %4329 = vmatprep.subr.bf16.mxu0 %v6017_v3  ;;  %v6035_v18 = vsel %vm519_vm7, %v475_v61, %v535_v7 }
 0x23a   :  { %vm518_vm6 = vcmp.gt.f32.partialorder %v470_v5, 0.0  ;;  %v534_v8 = vmul.f32 0.01, %v470_v5  ;;  %v6023_v10 = vsel %vm517_vm4, %v467_v62, %v533_v4 }
 0x23b   :  { %v6027_v12 = vsel %vm520_vm5, %v478_v1, %v536_v6 }
 0x23c   :  { %v4289_v9 = vpop.f32.mrb[8].mxu1  ;;  %4330 = vmatpush3.bf16.msra.mxu0 %v6017_v3  ;;  %v6025_v11 = vsel %vm518_vm6, %v470_v5, %v534_v8  ;;  %v6041_v21 = vpack.c.bf16 %v6027_v12, %v6035_v18 }
 0x23d   :  { %v482_v13 = vpop.f32.mrb[9].mxu1  ;;  %v6031_v14 = vpack.c.bf16 %v6025_v11, %v6023_v10  ;;  %v491_v15 = vadd.f32 %v4289_v9, %v5987_v41  ;;  %v4930_v9 = vld [vmem:[%s6906_s0 + $0x8] sm:$0xff]  }
 0x23e   :  { %v483_v16 = vadd.f32 %v5987_v41, %v482_v13  ;;  %v4290_v17 = vpop.f32.mrb[10].mxu1 }
 0x23f   :  { %v494_v19 = vadd.f32 %v4290_v17, %v5987_v41  ;;  %v485_v20 = vpop.f32.mrb[11].mxu1  ;;  %4331 = vmatprep.subr.bf16.mxu0 %v6031_v14  ;;  %v539_v25 = vmul.f32 0.01, %v491_v15  ;;  %vm523_vm11 = vcmp.gt.f32.partialorder %v491_v15, 0.0 }
 0x240   :  { %v537_v22 = vmul.f32 0.01, %v483_v16  ;;  %v486_v23 = vadd.f32 %v5987_v41, %v485_v20  ;;  %4332 = vmatpush3.bf16.msra.mxu0 %v6031_v14  ;;  %vm521_vm8 = vcmp.gt.f32.partialorder %v483_v16, 0.0 }
 0x241   :  { %vm524_vm9 = vcmp.gt.f32.partialorder %v494_v19, 0.0  ;;  %v540_v24 = vmul.f32 0.01, %v494_v19  ;;  %4333 = vmatprep.subr.bf16.mxu0 %v6041_v21  ;;  %v6059_v36 = vsel %vm523_vm11, %v491_v15, %v539_v25 }
 0x242   :  { %vm522_vm10 = vcmp.gt.f32.partialorder %v486_v23, 0.0  ;;  %v538_v26 = vmul.f32 0.01, %v486_v23  ;;  %v6047_v28 = vsel %vm521_vm8, %v483_v16, %v537_v22 }
 0x243   :  { %v6051_v30 = vsel %vm524_vm9, %v494_v19, %v540_v24 }
 0x244   :  { %v4293_v27 = vpop.f32.mrb[12].mxu1  ;;  %4334 = vmatpush3.bf16.msra.mxu0 %v6041_v21  ;;  %v6049_v29 = vsel %vm522_vm10, %v486_v23, %v538_v26  ;;  %v6065_v39 = vpack.c.bf16 %v6051_v30, %v6059_v36  ;;  %v4931_v23 = vld [vmem:[%s6906_s0 + $0x10] sm:$0xff]  }
 0x245   :  { %v498_v31 = vpop.f32.mrb[13].mxu1  ;;  %v6055_v32 = vpack.c.bf16 %v6049_v29, %v6047_v28  ;;  %v507_v33 = vadd.f32 %v4293_v27, %v5987_v41 }
 0x246   :  { %v499_v34 = vadd.f32 %v5987_v41, %v498_v31  ;;  %v4294_v35 = vpop.f32.mrb[14].mxu1 }
 0x247   :  { %v510_v37 = vadd.f32 %v4294_v35, %v5987_v41  ;;  %v501_v38 = vpop.f32.mrb[15].mxu1  ;;  %4335 = vmatprep.subr.bf16.mxu0 %v6055_v32  ;;  %v543_v46 = vmul.f32 0.01, %v507_v33  ;;  %vm527_vm15 = vcmp.gt.f32.partialorder %v507_v33, 0.0 }
 0x248   :  { %v541_v42 = vmul.f32 0.01, %v499_v34  ;;  %v502_v43 = vadd.f32 %v5987_v41, %v501_v38  ;;  %4336 = vmatpush3.bf16.msra.mxu0 %v6055_v32  ;;  %vm525_vm12 = vcmp.gt.f32.partialorder %v499_v34, 0.0 }
 0x249   :  { %vm528_vm13 = vcmp.gt.f32.partialorder %v510_v37, 0.0  ;;  %v544_v44 = vmul.f32 0.01, %v510_v37  ;;  %4337 = vmatprep.subr.bf16.mxu0 %v6065_v39  ;;  %v6085_v61 = vsel %vm527_vm15, %v507_v33, %v543_v46  ;;  %v4954_v33 = vld [vmem:[%s6908_s11 + $0x8] sm:$0xff]  }
 0x24a   :  { %vm526_vm14 = vcmp.gt.f32.partialorder %v502_v43, 0.0  ;;  %v542_v47 = vmul.f32 0.01, %v502_v43  ;;  %v6073_v49 = vsel %vm525_vm12, %v499_v34, %v541_v42 }
 0x24b   :  { %v6077_v41 = vsel %vm528_vm13, %v510_v37, %v544_v44 }
 0x24c   :  { %v4313_v48 = vpop.f32.mrb[16].mxu1  ;;  %4338 = vmatpush3.bf16.msra.mxu0 %v6065_v39  ;;  %v6075_v50 = vsel %vm526_vm14, %v502_v43, %v542_v47  ;;  %v6091_v1 = vpack.c.bf16 %v6077_v41, %v6085_v61  ;;  %v4932_v43 = vld [vmem:[%s6906_s0 + $0x18] sm:$0xff]  }
 0x24d   :  { %v739_v52 = vadd.f32 %v4313_v48, %v6070_v45  ;;  %v730_v53 = vpop.f32.mrb[17].mxu1  ;;  %v6082_v54 = vpack.c.bf16 %v6075_v50, %v6073_v49 }
 0x24e   :  { %v731_v55 = vadd.f32 %v6070_v45, %v730_v53  ;;  %v4314_v59 = vpop.f32.mrb[18].mxu1 }
 0x24f   :  { %v742_v62 = vadd.f32 %v4314_v59, %v6070_v45  ;;  %v733_v63 = vpop.f32.mrb[19].mxu1  ;;  %4339 = vmatprep.subr.bf16.mxu0 %v6082_v54  ;;  %v811_v5 = vmul.f32 0.01, %v739_v52  ;;  %vm795_vm2 = vcmp.gt.f32.partialorder %v739_v52, 0.0  ;;  %v4933_v59 = vld [vmem:[%s6906_s0 + $0x20] sm:$0xff]  }
 0x250   :  { %v809_v2 = vmul.f32 0.01, %v731_v55  ;;  %v734_v4 = vadd.f32 %v6070_v45, %v733_v63  ;;  %4340 = vmatpush3.bf16.msra.mxu0 %v6082_v54  ;;  %vm793_vm0 = vcmp.gt.f32.partialorder %v731_v55, 0.0 }
 0x251   :  { %vm796_vm1 = vcmp.gt.f32.partialorder %v742_v62, 0.0  ;;  %v812_v6 = vmul.f32 0.01, %v742_v62  ;;  %4341 = vmatprep.subr.bf16.mxu0 %v6091_v1  ;;  %v6106_v17 = vsel %vm795_vm2, %v739_v52, %v811_v5 }
 0x252   :  { %vm794_vm3 = vcmp.gt.f32.partialorder %v734_v4, 0.0  ;;  %v810_v7 = vmul.f32 0.01, %v734_v4  ;;  %v6102_v15 = vsel %vm793_vm0, %v731_v55, %v809_v2 }
 0x253   :  { %v6096_v8 = vsel %vm796_vm1, %v742_v62, %v812_v6 }
 0x254   :  { %v4317_v13 = vpop.f32.mrb[20].mxu1  ;;  %4342 = vmatpush3.bf16.msra.mxu0 %v6091_v1  ;;  %v6104_v16 = vsel %vm794_vm3, %v734_v4, %v810_v7  ;;  %v1035_v24 = vpack.c.bf16 %v6096_v8, %v6106_v17  ;;  %v4955_v4 = vld [vmem:[%s6908_s11 + $0x10] sm:$0xff]  }
 0x255   :  { %v755_v19 = vadd.f32 %v4317_v13, %v6070_v45  ;;  %v746_v20 = vpop.f32.mrb[21].mxu1  ;;  %v1034_v22 = vpack.c.bf16 %v6104_v16, %v6102_v15  ;;  %v4956_v13 = vld [vmem:[%s6908_s11 + $0x18] sm:$0xff]  }
 0x256   :  { %v747_v25 = vadd.f32 %v6070_v45, %v746_v20  ;;  %v4318_v26 = vpop.f32.mrb[22].mxu1 }
 0x257   :  { %v758_v27 = vadd.f32 %v4318_v26, %v6070_v45  ;;  %v749_v31 = vpop.f32.mrb[23].mxu1  ;;  %4344 = vmatmul.mubr.bf16.vlgmr.msra.gmra.mrb[0].mxu0 %v4930_v9  ;;  %4375 = vmatprep.mubr.bf16.mxu1 %v1034_v22  ;;  %v815_v37 = vmul.f32 0.01, %v755_v19  ;;  %vm799_vm6 = vcmp.gt.f32.partialorder %v755_v19, 0.0 }
 0x258   :  { %v813_v34 = vmul.f32 0.01, %v747_v25  ;;  %v750_v35 = vadd.f32 %v6070_v45, %v749_v31  ;;  %4423 = vmatprep.subr.bf16.mxu0 %v1034_v22  ;;  %4376 = vmatmul.mubr.bf16.vlgmr.msra.gmra.mrb[32].mxu1 %v1035_v24  ;;  %vm797_vm4 = vcmp.gt.f32.partialorder %v747_v25, 0.0 }
 0x259   :  { %vm800_vm5 = vcmp.gt.f32.partialorder %v758_v27, 0.0  ;;  %v816_v38 = vmul.f32 0.01, %v758_v27  ;;  %4424 = vmatpush3.bf16.msra.mxu0 %v1034_v22  ;;  %4347 = vmatprep.mubr.bf16.mxu0 %v4931_v23  ;;  %v4934_v23 = vld [vmem:[%s6906_s0 + $0x28] sm:$0xff]  }
 0x25a   :  { %vm798_vm7 = vcmp.gt.f32.partialorder %v750_v35, 0.0  ;;  %v814_v42 = vmul.f32 0.01, %v750_v35  ;;  %4425 = vmatprep.subr.bf16.mxu0 %v1035_v24  ;;  %4392 = vmatpush3.bf16.msra.mxu1 %v5996_v51  ;;  %v6128_v47 = vsel %vm797_vm4, %v747_v25, %v813_v34  ;;  %v6135_v51 = vsel %vm799_vm6, %v755_v19, %v815_v37  ;;  %v6169_v37 = vld [vmem:[%s6906_s0 + $0x30] sm:$0xff]  }
 0x25b   :  { %v6126_v44 = vsel %vm800_vm5, %v758_v27, %v816_v38  ;;  %4393 = vmatprep.subr.bf16.mxu1 %v4954_v33 }
 0x25c   :  { %v4321_v46 = vpop.f32.mrb[24].mxu1  ;;  %v6130_v48 = vsel %vm798_vm7, %v750_v35, %v814_v42  ;;  %v1037_v2 = vpack.c.bf16 %v6126_v44, %v6135_v51 }
 0x25d   :  { %v771_v52 = vadd.f32 %v4321_v46, %v6070_v45  ;;  %4426 = vmatpush3.bf16.msra.mxu0 %v1035_v24  ;;  %v762_v53 = vpop.f32.mrb[25].mxu1  ;;  %v1036_v55 = vpack.c.bf16 %v6130_v48, %v6128_v47 }
 0x25e   :  { %v763_v62 = vadd.f32 %v6070_v45, %v762_v53  ;;  %v4322_v63 = vpop.f32.mrb[26].mxu1  ;;  %4394 = vmatpush3.bf16.msra.mxu1 %v4954_v33 }
 0x25f   :  { %v774_v5 = vadd.f32 %v4322_v63, %v6070_v45  ;;  %v765_v6 = vpop.f32.mrb[27].mxu1  ;;  %4348 = vmatmul.mubr.bf16.gmra.mrb[4].mxu0 %v4932_v43  ;;  %4379 = vmatprep.mubr.bf16.mxu1 %v1036_v55  ;;  %v819_v19 = vmul.f32 0.01, %v771_v52  ;;  %vm803_vm10 = vcmp.gt.f32.partialorder %v771_v52, 0.0 }
 0x260   :  { %v817_v7 = vmul.f32 0.01, %v763_v62  ;;  %v766_v9 = vadd.f32 %v6070_v45, %v765_v6  ;;  %4427 = vmatprep.subr.bf16.mxu0 %v1036_v55  ;;  %4380 = vmatmul.mubr.bf16.gmra.mrb[36].mxu1 %v1037_v2  ;;  %vm801_vm8 = vcmp.gt.f32.partialorder %v763_v62, 0.0 }
 0x261   :  { %vm804_vm9 = vcmp.gt.f32.partialorder %v774_v5, 0.0  ;;  %v820_v20 = vmul.f32 0.01, %v774_v5  ;;  %4428 = vmatpush3.bf16.msra.mxu0 %v1036_v55  ;;  %4351 = vmatprep.mubr.bf16.mxu0 %v4933_v59  ;;  %v6164_v35 = vsel %vm803_vm10, %v771_v52, %v819_v19  ;;  %v4957_v52 = vld [vmem:[%s6908_s11 + $0x20] sm:$0xff]  }
 0x262   :  { %vm802_vm11 = vcmp.gt.f32.partialorder %v766_v9, 0.0  ;;  %v818_v22 = vmul.f32 0.01, %v766_v9  ;;  %4429 = vmatprep.subr.bf16.mxu0 %v1037_v2  ;;  %4395 = vmatprep.subr.bf16.mxu1 %v4955_v4  ;;  %v6156_v26 = vsel %vm801_vm8, %v763_v62, %v817_v7 }
 0x263   :  { %v6154_v24 = vsel %vm804_vm9, %v774_v5, %v820_v20  ;;  %4396 = vmatpush3.bf16.msra.mxu1 %v4955_v4  ;;  %v6183_v4 = vld [vmem:[%s6906_s0 + $0x38] sm:$0xff]   ;;  %v4958_v20 = vld [vmem:[%s6908_s11 + $0x28] sm:$0xff]  }
 0x264   :  { %v4325_v25 = vpop.f32.mrb[28].mxu1  ;;  %v6158_v27 = vsel %vm802_vm11, %v766_v9, %v818_v22  ;;  %4397 = vmatprep.subr.bf16.mxu1 %v4956_v13  ;;  %v1039_v43 = vpack.c.bf16 %v6154_v24, %v6164_v35  ;;  %v4959_v22 = vld [vmem:[%s6908_s11 + $0x30] sm:$0xff]  }
 0x265   :  { %v787_v31 = vadd.f32 %v4325_v25, %v6070_v45  ;;  %4430 = vmatpush3.bf16.msra.mxu0 %v1037_v2  ;;  %v778_v33 = vpop.f32.mrb[29].mxu1  ;;  %v1038_v34 = vpack.c.bf16 %v6158_v27, %v6156_v26  ;;  %v6213_v25 = vld [vmem:[%s6909_s19 + $0x8] sm:$0xff]  }
 0x266   :  { %v779_v38 = vadd.f32 %v6070_v45, %v778_v33  ;;  %v4326_v42 = vpop.f32.mrb[30].mxu1  ;;  %v4940_v33 = vld [vmem:[#allocation9 + $0x8] sm:$0xff]  }
 0x267   :  { %v790_v46 = vadd.f32 %v4326_v42, %v6070_v45  ;;  %v781_v53 = vpop.f32.mrb[31].mxu1  ;;  %4352 = vmatmul.mubr.bf16.gmra.mrb[8].mxu0 %v4934_v23  ;;  %4383 = vmatprep.mubr.bf16.mxu1 %v1038_v34  ;;  %v823_v62 = vmul.f32 0.01, %v787_v31  ;;  %vm807_vm14 = vcmp.gt.f32.partialorder %v787_v31, 0.0  ;;  %v4939_v23 = vld [vmem:[#allocation9] sm:$0xff]  }
 0x268   :  { %v821_v55 = vmul.f32 0.01, %v779_v38  ;;  %v782_v59 = vadd.f32 %v6070_v45, %v781_v53  ;;  %4431 = vmatprep.subr.bf16.mxu0 %v1038_v34  ;;  %4384 = vmatmul.mubr.bf16.gmra.mrb[40].mxu1 %v1039_v43  ;;  %vm805_vm12 = vcmp.gt.f32.partialorder %v779_v38, 0.0  ;;  %v6230_v42 = vld [vmem:[%s6909_s19 + $0x20] sm:$0xff]   ;;  %v6237_v53 = vld [vmem:[%s6909_s19 + $0x28] sm:$0xff]  }
 0x269   :  { %vm808_vm13 = vcmp.gt.f32.partialorder %v790_v46, 0.0  ;;  %v824_v63 = vmul.f32 0.01, %v790_v46  ;;  %4432 = vmatpush3.bf16.msra.mxu0 %v1038_v34  ;;  %4355 = vmatprep.mubr.bf16.mxu0 %v6169_v37  ;;  %v6193_v9 = vsel %vm807_vm14, %v787_v31, %v823_v62  ;;  %v6218_v31 = vld [vmem:[%s6909_s19 + $0x10] sm:$0xff]   ;;  %v6249_v62 = vld [vmem:[%s6909_s19 + $0x38] sm:$0xff]  }
 0x26a   :  { %vm806_vm15 = vcmp.gt.f32.partialorder %v782_v59, 0.0  ;;  %v822_v2 = vmul.f32 0.01, %v782_v59  ;;  %4433 = vmatprep.subr.bf16.mxu0 %v1039_v43  ;;  %4398 = vmatpush3.bf16.msra.mxu1 %v4956_v13  ;;  %v6187_v5 = vsel %vm805_vm12, %v779_v38, %v821_v55  ;;  %v6198_v13 = vld [vmem:[%s6909_s19] sm:$0xff]   ;;  %v4943_v34 = vld [vmem:[#allocation9 + $0x10] sm:$0xff]   ;;  %v4948_v55 = vld [vmem:[#allocation9 + $0x28] sm:$0xff]  }
 0x26b   :  { %v6185_v45 = vsel %vm808_vm13, %v790_v46, %v824_v63  ;;  %4399 = vmatprep.subr.bf16.mxu1 %v4957_v52  ;;  %v6225_v38 = vld [vmem:[%s6909_s19 + $0x18] sm:$0xff]   ;;  %v4947_v46 = vld [vmem:[#allocation9 + $0x20] sm:$0xff]  }
 0x26c   :  { %v6189_v6 = vsel %vm806_vm15, %v782_v59, %v822_v2  ;;  %v1041_v19 = vpack.c.bf16 %v6185_v45, %v6193_v9  ;;  %v4951_v59 = vld [vmem:[#allocation9 + $0x30] sm:$0xff]   ;;  %v4952_v63 = vld [vmem:[#allocation9 + $0x38] sm:$0xff]  }
 0x26d   :  { %4434 = vmatpush3.bf16.msra.mxu0 %v1039_v43  ;;  %v1040_v7 = vpack.c.bf16 %v6189_v6, %v6187_v5  ;;  %v4944_v43 = vld [vmem:[#allocation9 + $0x18] sm:$0xff]  }
 0x26e   :  { %4400 = vmatpush3.bf16.msra.mxu1 %v4957_v52  ;;  %v6242_v52 = vld [vmem:[%s6909_s19 + $0x30] sm:$0xff]   ;;  %v4960_v2 = vld [vmem:[%s6908_s11 + $0x38] sm:$0xff]  }
 0x26f   :  { %4356 = vmatmul.mubr.bf16.gmra.mrb[12].mxu0 %v6183_v4  ;;  %4387 = vmatprep.mubr.bf16.mxu1 %v1040_v7 }
 0x270   :  { %4435 = vmatprep.subr.bf16.mxu0 %v1040_v7  ;;  %4388 = vmatmul.mubr.bf16.gmra.mrb[44].mxu1 %v1041_v19 }
 0x271   :  { %4436 = vmatpush3.bf16.msra.mxu0 %v1040_v7  ;;  %4439 = vmatprep.mubr.bf16.mxu0 %v6198_v13 }
 0x272   :  { %4437 = vmatprep.subr.bf16.mxu0 %v1041_v19  ;;  %4401 = vmatprep.subr.bf16.mxu1 %v4958_v20 }
 0x273   :  { %4402 = vmatpush3.bf16.msra.mxu1 %v4958_v20 }
 0x274   :  { %4403 = vmatprep.subr.bf16.mxu1 %v4959_v22 }
 0x275   :  { %4438 = vmatpush3.bf16.msra.mxu0 %v1041_v19 }
 0x276   :  { %4455 = vmatprep.subr.bf16.mxu0 %v4939_v23 }
 0x277   :  { %4404 = vmatpush3.bf16.msra.mxu1 %v4959_v22 }
 0x278   :  { %4440 = vmatmul.mubr.bf16.vlgmr.msra.gmra.mrb[16].mxu0 %v6213_v25  ;;  %4405 = vmatprep.subr.bf16.mxu1 %v4960_v2 }
 0x279   :  { %4456 = vmatpush3.bf16.msra.mxu0 %v4939_v23  ;;  %4443 = vmatprep.mubr.bf16.mxu0 %v6218_v31 }
 0x27a   :  { %4457 = vmatprep.subr.bf16.mxu0 %v4940_v33 }
 0x27b   :  { %4406 = vmatpush3.bf16.msra.mxu1 %v4960_v2 }
 0x27d   :  { %4458 = vmatpush3.bf16.msra.mxu0 %v4940_v33 }
 0x27e   :  { %4459 = vmatprep.subr.bf16.mxu0 %v4943_v34 }
 0x280   :  { %4444 = vmatmul.mubr.bf16.gmra.mrb[20].mxu0 %v6225_v38 }
 0x281   :  { %4460 = vmatpush3.bf16.msra.mxu0 %v4943_v34  ;;  %4447 = vmatprep.mubr.bf16.mxu0 %v6230_v42 }
 0x282   :  { %4461 = vmatprep.subr.bf16.mxu0 %v4944_v43 }
 0x285   :  { %4462 = vmatpush3.bf16.msra.mxu0 %v4944_v43 }
 0x286   :  { %4463 = vmatprep.subr.bf16.mxu0 %v4947_v46 }
 0x288   :  { %4448 = vmatmul.mubr.bf16.gmra.mrb[24].mxu0 %v6237_v53 }
 0x289   :  { %4464 = vmatpush3.bf16.msra.mxu0 %v4947_v46  ;;  %4451 = vmatprep.mubr.bf16.mxu0 %v6242_v52 }
 0x28a   :  { %4465 = vmatprep.subr.bf16.mxu0 %v4948_v55 }
 0x28d   :  { %4466 = vmatpush3.bf16.msra.mxu0 %v4948_v55 }
 0x28e   :  { %4467 = vmatprep.subr.bf16.mxu0 %v4951_v59 }
 0x290   :  { %4452 = vmatmul.mubr.bf16.gmra.mrb[28].mxu0 %v6249_v62 }
 0x291   :  { %4468 = vmatpush3.bf16.msra.mxu0 %v4951_v59  ;;  %4471 = vmatprep.mubr.bf16.mxu0 %v6007_v60  ;;  %v4961_v60 = vld [vmem:[#allocation7] sm:$0xff]  }
 0x292   :  { %4469 = vmatprep.subr.bf16.mxu0 %v4952_v63 }
 0x295   :  { %4470 = vmatpush3.bf16.msra.mxu0 %v4952_v63 }
 0x296   :  { %4487 = vmatprep.subr.bf16.mxu0 %v4961_v60 }
 0x298   :  { %4472 = vmatmul.mubr.bf16.vlgmr.msra.gmra.mrb[32].mxu0 %v6017_v3  ;;  %v4962_v3 = vld [vmem:[#allocation7 + $0x8] sm:$0xff]  }
 0x299   :  { %4475 = vmatprep.mubr.bf16.mxu0 %v6031_v14  ;;  %4488 = vmatpush3.bf16.msra.mxu0 %v4961_v60  ;;  %v4963_v14 = vld [vmem:[#allocation7 + $0x10] sm:$0xff]  }
 0x29a   :  { %4489 = vmatprep.subr.bf16.mxu0 %v4962_v3 }
 0x29d   :  { %4490 = vmatpush3.bf16.msra.mxu0 %v4962_v3 }
 0x29e   :  { %4491 = vmatprep.subr.bf16.mxu0 %v4963_v14 }
 0x2a0   :  { %4476 = vmatmul.mubr.bf16.gmra.mrb[36].mxu0 %v6041_v21  ;;  %v4964_v21 = vld [vmem:[#allocation7 + $0x18] sm:$0xff]  }
 0x2a1   :  { %4479 = vmatprep.mubr.bf16.mxu0 %v6055_v32  ;;  %4492 = vmatpush3.bf16.msra.mxu0 %v4963_v14  ;;  %v4965_v32 = vld [vmem:[#allocation7 + $0x20] sm:$0xff]  }
 0x2a2   :  { %4493 = vmatprep.subr.bf16.mxu0 %v4964_v21 }
 0x2a5   :  { %4494 = vmatpush3.bf16.msra.mxu0 %v4964_v21 }
 0x2a6   :  { %4495 = vmatprep.subr.bf16.mxu0 %v4965_v32 }
 0x2a8   :  { %4480 = vmatmul.mubr.bf16.gmra.mrb[40].mxu0 %v6065_v39  ;;  %v4966_v39 = vld [vmem:[#allocation7 + $0x28] sm:$0xff]  }
 0x2a9   :  { %4483 = vmatprep.mubr.bf16.mxu0 %v6082_v54  ;;  %4496 = vmatpush3.bf16.msra.mxu0 %v4965_v32  ;;  %v4967_v54 = vld [vmem:[#allocation7 + $0x30] sm:$0xff]  }
 0x2aa   :  { %4497 = vmatprep.subr.bf16.mxu0 %v4966_v39 }
 0x2ad   :  { %4498 = vmatpush3.bf16.msra.mxu0 %v4966_v39 }
 0x2ae   :  { %4499 = vmatprep.subr.bf16.mxu0 %v4967_v54 }
 0x2b0   :  { %4484 = vmatmul.mubr.bf16.gmra.mrb[44].mxu0 %v6091_v1  ;;  %v4968_v1 = vld [vmem:[#allocation7 + $0x38] sm:$0xff]  }
 0x2b1   :  { %4500 = vmatpush3.bf16.msra.mxu0 %v4967_v54 }
 0x2b2   :  { %4501 = vmatprep.subr.bf16.mxu0 %v4968_v1 }
 0x2b5   :  { %4502 = vmatpush3.bf16.msra.mxu0 %v4968_v1 }
 0x32a   :  { %v4345_v7 = vpop.f32.mrb[0].mxu0 }
 0x32b   :  { %v947_v19 = vpop.f32.mrb[1].mxu0 }
 0x32c   :  { %v4346_v20 = vpop.f32.mrb[2].mxu0 }
 0x32d   :  { %v1011_v22 = vpack.c.bf16 %v4346_v20, %v4345_v7  ;;  %v950_v23 = vpop.f32.mrb[3].mxu0 }
 0x32e   :  { %v1010_v33 = vpack.c.bf16 %v950_v23, %v947_v19 }
 0x330   :  { %4407 = vmatprep.mubr.bf16.mxu1 %v1010_v33 }
 0x331   :  { %4408 = vmatmul.mubr.bf16.vlgmr.msra.gmra.mrb[32].mxu1 %v1011_v22 }
 0x332   :  { %v4349_v34 = vpop.f32.mrb[4].mxu0 }
 0x333   :  { %v963_v43 = vpop.f32.mrb[5].mxu0 }
 0x334   :  { %v4350_v46 = vpop.f32.mrb[6].mxu0 }
 0x335   :  { %v1013_v55 = vpack.c.bf16 %v4350_v46, %v4349_v34  ;;  %v966_v59 = vpop.f32.mrb[7].mxu0 }
 0x336   :  { %v1012_v63 = vpack.c.bf16 %v966_v59, %v963_v43 }
 0x338   :  { %4411 = vmatprep.mubr.bf16.mxu1 %v1012_v63 }
 0x339   :  { %4412 = vmatmul.mubr.bf16.gmra.mrb[36].mxu1 %v1013_v55 }
 0x33a   :  { %v4353_v2 = vpop.f32.mrb[8].mxu0 }
 0x33b   :  { %v979_v60 = vpop.f32.mrb[9].mxu0 }
 0x33c   :  { %v4354_v3 = vpop.f32.mrb[10].mxu0 }
 0x33d   :  { %v1015_v14 = vpack.c.bf16 %v4354_v3, %v4353_v2  ;;  %v982_v21 = vpop.f32.mrb[11].mxu0 }
 0x33e   :  { %v1014_v32 = vpack.c.bf16 %v982_v21, %v979_v60 }
 0x340   :  { %4415 = vmatprep.mubr.bf16.mxu1 %v1014_v32 }
 0x341   :  { %4416 = vmatmul.mubr.bf16.gmra.mrb[40].mxu1 %v1015_v14 }
 0x342   :  { %v4357_v39 = vpop.f32.mrb[12].mxu0 }
 0x343   :  { %v995_v54 = vpop.f32.mrb[13].mxu0 }
 0x344   :  { %v4358_v1 = vpop.f32.mrb[14].mxu0 }
 0x345   :  { %v1017_v7 = vpack.c.bf16 %v4358_v1, %v4357_v39  ;;  %v998_v19 = vpop.f32.mrb[15].mxu0 }
 0x346   :  { %v1016_v20 = vpack.c.bf16 %v998_v19, %v995_v54 }
 0x348   :  { %4419 = vmatprep.mubr.bf16.mxu1 %v1016_v20 }
 0x349   :  { %4420 = vmatmul.mubr.bf16.gmra.mrb[44].mxu1 %v1017_v7 }
 0x34a   :  { %4535 = vmatprep.mubr.bf16.mxu1 %v5981_v40 }
 0x34b   :  { %v4441_v22 = vpop.f32.mrb[16].mxu0 }
 0x34c   :  { %v1469_v23 = vpop.f32.mrb[17].mxu0 }
 0x34d   :  { %v4442_v33 = vpop.f32.mrb[18].mxu0 }
 0x34e   :  { %v1533_v34 = vpack.c.bf16 %v4442_v33, %v4441_v22  ;;  %v1472_v43 = vpop.f32.mrb[19].mxu0  ;;  %v6265_v33 = vld [vmem:[#allocation6] ss:$0 sm:$0xff] }
 0x34f   :  { %v1532_v46 = vpack.c.bf16 %v1472_v43, %v1469_v23 }
 0x351   :  { %4503 = vmatprep.mubr.bf16.mxu0 %v1532_v46 }
 0x352   :  { %4504 = vmatmul.mubr.bf16.vlgmr.msra.gmra.mrb[32].mxu0 %v1533_v34 }
 0x353   :  { %v4445_v55 = vpop.f32.mrb[20].mxu0 }
 0x354   :  { %v1485_v59 = vpop.f32.mrb[21].mxu0 }
 0x355   :  { %v4446_v63 = vpop.f32.mrb[22].mxu0 }
 0x356   :  { %v1535_v2 = vpack.c.bf16 %v4446_v63, %v4445_v55  ;;  %v1488_v60 = vpop.f32.mrb[23].mxu0 }
 0x357   :  { %v1534_v3 = vpack.c.bf16 %v1488_v60, %v1485_v59 }
 0x359   :  { %4507 = vmatprep.mubr.bf16.mxu0 %v1534_v3 }
 0x35a   :  { %4508 = vmatmul.mubr.bf16.gmra.mrb[36].mxu0 %v1535_v2 }
 0x35b   :  { %v4449_v14 = vpop.f32.mrb[24].mxu0 }
 0x35c   :  { %v1501_v21 = vpop.f32.mrb[25].mxu0 }
 0x35d   :  { %v4450_v32 = vpop.f32.mrb[26].mxu0 }
 0x35e   :  { %v1537_v40 = vpack.c.bf16 %v4450_v32, %v4449_v14  ;;  %v1504_v39 = vpop.f32.mrb[27].mxu0 }
 0x35f   :  { %v1536_v54 = vpack.c.bf16 %v1504_v39, %v1501_v21 }
 0x361   :  { %4511 = vmatprep.mubr.bf16.mxu0 %v1536_v54 }
 0x362   :  { %4512 = vmatmul.mubr.bf16.gmra.mrb[40].mxu0 %v1537_v40 }
 0x363   :  { %v4453_v1 = vpop.f32.mrb[28].mxu0 }
 0x364   :  { %v1517_v7 = vpop.f32.mrb[29].mxu0 }
 0x365   :  { %v4454_v19 = vpop.f32.mrb[30].mxu0 }
 0x366   :  { %v1539_v20 = vpack.c.bf16 %v4454_v19, %v4453_v1  ;;  %v1520_v22 = vpop.f32.mrb[31].mxu0 }
 0x367   :  { %v1538_v23 = vpack.c.bf16 %v1520_v22, %v1517_v7 }
 0x369   :  { %4515 = vmatprep.mubr.bf16.mxu0 %v1538_v23 }
 0x36a   :  { %4516 = vmatmul.mubr.bf16.gmra.mrb[44].mxu0 %v1539_v20 }
 0x36b   :  { %4631 = vmatprep.mubr.bf16.mxu0 %v6198_v13 }
 0x404   :  { %v4409_v34 = vpop.f32.mrb[32].mxu1 }
 0x405   :  { %v1357_v43 = vadd.f32 %v4409_v34, %v6265_v33  ;;  %v1285_v46 = vpop.f32.mrb[33].mxu1 }
 0x406   :  { %v1355_v55 = vadd.f32 %v6265_v33, %v1285_v46  ;;  %v4410_v59 = vpop.f32.mrb[34].mxu1 }
 0x407   :  { %v1358_v63 = vadd.f32 %v4410_v59, %v6265_v33  ;;  %v1288_v2 = vpop.f32.mrb[35].mxu1  ;;  %v1903_v60 = vmul.f32 0.01, %v1357_v43  ;;  %vm1887_vm1 = vcmp.gt.f32.partialorder %v1357_v43, 0.0 }
 0x408   :  { %vm1885_vm0 = vcmp.gt.f32.partialorder %v1355_v55, 0.0  ;;  %v1901_v3 = vmul.f32 0.01, %v1355_v55  ;;  %v1356_v14 = vadd.f32 %v6265_v33, %v1288_v2 }
 0x409   :  { %vm1888_vm2 = vcmp.gt.f32.partialorder %v1358_v63, 0.0  ;;  %v1904_v13 = vmul.f32 0.01, %v1358_v63  ;;  %v1919_v39 = vsel %vm1887_vm1, %v1357_v43, %v1903_v60 }
 0x40a   :  { %v1917_v21 = vsel %vm1885_vm0, %v1355_v55, %v1901_v3  ;;  %vm1886_vm3 = vcmp.gt.f32.partialorder %v1356_v14, 0.0  ;;  %v1902_v32 = vmul.f32 0.01, %v1356_v14 }
 0x40b   :  { %v1920_v40 = vsel %vm1888_vm2, %v1358_v63, %v1904_v13  ;;  %v6273_v20 = vadd.f32 %v1917_v21, %v6102_v15  ;;  %v6288_v63 = vadd.f32 %v1919_v39, %v6106_v17 }
 0x40c   :  { %v1918_v54 = vsel %vm1886_vm3, %v1356_v14, %v1902_v32  ;;  %v4413_v1 = vpop.f32.mrb[36].mxu1  ;;  %v6279_v23 = vadd.f32 %v1920_v40, %v6096_v8 }
 0x40d   :  { %v1361_v7 = vadd.f32 %v4413_v1, %v6265_v33  ;;  %v1301_v19 = vpop.f32.mrb[37].mxu1  ;;  %v6276_v22 = vadd.f32 %v1918_v54, %v6104_v16 }
 0x40e   :  { %v1359_v34 = vadd.f32 %v6265_v33, %v1301_v19  ;;  %v4414_v46 = vpop.f32.mrb[38].mxu1  ;;  %v6294_v60 = vpack.c.bf16 %v6279_v23, %v6288_v63 }
 0x40f   :  { %v1362_v55 = vadd.f32 %v4414_v46, %v6265_v33  ;;  %v1304_v43 = vpop.f32.mrb[39].mxu1  ;;  %v6285_v59 = vpack.c.bf16 %v6276_v22, %v6273_v20  ;;  %v1907_v15 = vmul.f32 0.01, %v1361_v7  ;;  %vm1891_vm5 = vcmp.gt.f32.partialorder %v1361_v7, 0.0 }
 0x410   :  { %vm1889_vm4 = vcmp.gt.f32.partialorder %v1359_v34, 0.0  ;;  %v1905_v16 = vmul.f32 0.01, %v1359_v34  ;;  %v1360_v2 = vadd.f32 %v6265_v33, %v1304_v43 }
 0x411   :  { %vm1892_vm6 = vcmp.gt.f32.partialorder %v1362_v55, 0.0  ;;  %v1908_v8 = vmul.f32 0.01, %v1362_v55  ;;  %4615 = vmatprep.subr.bf16.mxu0 %v6285_v59  ;;  %v1923_v13 = vsel %vm1891_vm5, %v1361_v7, %v1907_v15 }
 0x412   :  { %v1921_v3 = vsel %vm1889_vm4, %v1359_v34, %v1905_v16  ;;  %vm1890_vm7 = vcmp.gt.f32.partialorder %v1360_v2, 0.0  ;;  %v1906_v14 = vmul.f32 0.01, %v1360_v2  ;;  %4616 = vmatpush3.bf16.msra.mxu0 %v6285_v59 }
 0x413   :  { %v1924_v17 = vsel %vm1892_vm6, %v1362_v55, %v1908_v8  ;;  %4617 = vmatprep.subr.bf16.mxu0 %v6294_v60  ;;  %v6300_v54 = vadd.f32 %v1921_v3, %v6128_v47  ;;  %v6316_v47 = vadd.f32 %v1923_v13, %v6135_v51 }
 0x414   :  { %v1922_v21 = vsel %vm1890_vm7, %v1360_v2, %v1906_v14  ;;  %v4417_v32 = vpop.f32.mrb[40].mxu1  ;;  %v6306_v19 = vadd.f32 %v1924_v17, %v6126_v44 }
 0x415   :  { %v1365_v40 = vadd.f32 %v4417_v32, %v6265_v33  ;;  %v1317_v39 = vpop.f32.mrb[41].mxu1  ;;  %v6303_v1 = vadd.f32 %v1922_v21, %v6130_v48 }
 0x416   :  { %v1363_v34 = vadd.f32 %v6265_v33, %v1317_v39  ;;  %v4418_v46 = vpop.f32.mrb[42].mxu1  ;;  %4618 = vmatpush3.bf16.msra.mxu0 %v6294_v60  ;;  %v6322_v2 = vpack.c.bf16 %v6306_v19, %v6316_v47 }
 0x417   :  { %v1366_v7 = vadd.f32 %v4418_v46, %v6265_v33  ;;  %v1320_v55 = vpop.f32.mrb[43].mxu1  ;;  %v6313_v43 = vpack.c.bf16 %v6303_v1, %v6300_v54  ;;  %v1911_v48 = vmul.f32 0.01, %v1365_v40  ;;  %vm1895_vm9 = vcmp.gt.f32.partialorder %v1365_v40, 0.0 }
 0x418   :  { %vm1893_vm8 = vcmp.gt.f32.partialorder %v1363_v34, 0.0  ;;  %v1909_v15 = vmul.f32 0.01, %v1363_v34  ;;  %v1364_v44 = vadd.f32 %v6265_v33, %v1320_v55 }
 0x419   :  { %vm1896_vm10 = vcmp.gt.f32.partialorder %v1366_v7, 0.0  ;;  %v1912_v16 = vmul.f32 0.01, %v1366_v7  ;;  %4619 = vmatprep.subr.bf16.mxu0 %v6313_v43  ;;  %v1927_v14 = vsel %vm1895_vm9, %v1365_v40, %v1911_v48 }
 0x41a   :  { %v1925_v8 = vsel %vm1893_vm8, %v1363_v34, %v1909_v15  ;;  %vm1894_vm11 = vcmp.gt.f32.partialorder %v1364_v44, 0.0  ;;  %v1910_v3 = vmul.f32 0.01, %v1364_v44  ;;  %4620 = vmatpush3.bf16.msra.mxu0 %v6313_v43 }
 0x41b   :  { %v1928_v51 = vsel %vm1896_vm10, %v1366_v7, %v1912_v16  ;;  %4621 = vmatprep.subr.bf16.mxu0 %v6322_v2  ;;  %v6328_v39 = vadd.f32 %v1925_v8, %v6156_v26  ;;  %v6344_v26 = vadd.f32 %v1927_v14, %v6164_v35 }
 0x41c   :  { %v1926_v17 = vsel %vm1894_vm11, %v1364_v44, %v1910_v3  ;;  %v4421_v13 = vpop.f32.mrb[44].mxu1  ;;  %v6334_v34 = vadd.f32 %v1928_v51, %v6154_v24 }
 0x41d   :  { %v1369_v21 = vadd.f32 %v4421_v13, %v6265_v33  ;;  %v1333_v32 = vpop.f32.mrb[45].mxu1  ;;  %v6331_v46 = vadd.f32 %v1926_v17, %v6158_v27  ;;  %v6354_v17 = vld [vmem:[#allocation10] ss:$0 sm:$0xff] }
 0x41e   :  { %v1367_v55 = vadd.f32 %v6265_v33, %v1333_v32  ;;  %v4422_v7 = vpop.f32.mrb[46].mxu1  ;;  %4622 = vmatpush3.bf16.msra.mxu0 %v6322_v2  ;;  %v6350_v8 = vpack.c.bf16 %v6334_v34, %v6344_v26 }
 0x41f   :  { %6910 = vst [vmem:[#allocation36_spill] sm:$0xff] %v6331_v46  ;;  %v1915_v40 = vmul.f32 0.01, %v1369_v21  ;;  %v1370_v48 = vadd.f32 %v4422_v7, %v6265_v33  ;;  %v1336_v15 = vpop.f32.mrb[47].mxu1  ;;  %v6341_v44 = vpack.c.bf16 %v6331_v46, %v6328_v39  ;;  %vm1899_vm12 = vcmp.gt.f32.partialorder %v1369_v21, 0.0 }
 0x420   :  { %vm1897_vm13 = vcmp.gt.f32.partialorder %v1367_v55, 0.0  ;;  %v1913_v24 = vmul.f32 0.01, %v1367_v55  ;;  %v1368_v27 = vadd.f32 %v6265_v33, %v1336_v15 }
 0x421   :  { %vm1900_vm14 = vcmp.gt.f32.partialorder %v1370_v48, 0.0  ;;  %v1916_v16 = vmul.f32 0.01, %v1370_v48  ;;  %4623 = vmatprep.subr.bf16.mxu0 %v6341_v44  ;;  %v1931_v35 = vsel %vm1899_vm12, %v1369_v21, %v1915_v40 }
 0x422   :  { %v1929_v3 = vsel %vm1897_vm13, %v1367_v55, %v1913_v24  ;;  %vm1898_vm15 = vcmp.gt.f32.partialorder %v1368_v27, 0.0  ;;  %v1914_v51 = vmul.f32 0.01, %v1368_v27  ;;  %4624 = vmatpush3.bf16.msra.mxu0 %v6341_v44  ;;  %v6368_v21 = vadd.f32 %v1931_v35, %v6193_v9 }
 0x423   :  { %v1932_v14 = vsel %vm1900_vm14, %v1370_v48, %v1916_v16  ;;  %4625 = vmatprep.subr.bf16.mxu0 %v6350_v8  ;;  %v6360_v7 = vadd.f32 %v1929_v3, %v6187_v5 }
 0x424   :  { %v1930_v33 = vsel %vm1898_vm15, %v1368_v27, %v1914_v51  ;;  %v6357_v13 = vadd.f32 %v1932_v14, %v6185_v45  ;;  %6914 = vst [vmem:[#allocation40_spill] sm:$0xff] %v6368_v21 }
 0x425   :  { %v4505_v32 = vpop.f32.mrb[32].mxu0  ;;  %6912 = vst [vmem:[#allocation38_spill] sm:$0xff] %v6360_v7  ;;  %v6363_v55 = vadd.f32 %v1930_v33, %v6189_v6  ;;  %v4969_v33 = vld [vmem:[#allocation18] sm:$0xff]  }
 0x426   :  { %6911 = vst [vmem:[#allocation37_spill] sm:$0xff] %v6357_v13  ;;  %v1871_v15 = vadd.f32 %v4505_v32, %v6354_v17  ;;  %v1799_v24 = vpop.f32.mrb[33].mxu0  ;;  %4626 = vmatpush3.bf16.msra.mxu0 %v6350_v8  ;;  %v6378_v6 = vpack.c.bf16 %v6357_v13, %v6368_v21 }
 0x427   :  { %6913 = vst [vmem:[#allocation39_spill] sm:$0xff] %v6363_v55  ;;  %v1869_v40 = vadd.f32 %v6354_v17, %v1799_v24  ;;  %v4506_v48 = vpop.f32.mrb[34].mxu0  ;;  %v6373_v45 = vpack.c.bf16 %v6363_v55, %v6360_v7 }
 0x428   :  { %v1872_v5 = vadd.f32 %v4506_v48, %v6354_v17  ;;  %v1802_v27 = vpop.f32.mrb[35].mxu0  ;;  %v1967_v16 = vmul.f32 0.01, %v1871_v15  ;;  %vm1951_vm1 = vcmp.gt.f32.partialorder %v1871_v15, 0.0 }
 0x429   :  { %vm1949_vm0 = vcmp.gt.f32.partialorder %v1869_v40, 0.0  ;;  %v1965_v3 = vmul.f32 0.01, %v1869_v40  ;;  %v1870_v9 = vadd.f32 %v6354_v17, %v1802_v27  ;;  %4627 = vmatprep.subr.bf16.mxu0 %v6373_v45 }
 0x42a   :  { %vm1952_vm2 = vcmp.gt.f32.partialorder %v1872_v5, 0.0  ;;  %v1968_v51 = vmul.f32 0.01, %v1872_v5  ;;  %4628 = vmatpush3.bf16.msra.mxu0 %v6373_v45  ;;  %v1983_v24 = vsel %vm1951_vm1, %v1871_v15, %v1967_v16  ;;  %v4970_v15 = vld [vmem:[#allocation18 + $0x8] sm:$0xff]  }
 0x42b   :  { %v1981_v35 = vsel %vm1949_vm0, %v1869_v40, %v1965_v3  ;;  %vm1950_vm3 = vcmp.gt.f32.partialorder %v1870_v9, 0.0  ;;  %v1966_v14 = vmul.f32 0.01, %v1870_v9  ;;  %4629 = vmatprep.subr.bf16.mxu0 %v6378_v6 }
 0x42c   :  { %v1984_v32 = vsel %vm1952_vm2, %v1872_v5, %v1968_v51  ;;  %v6387_v13 = vadd.f32 %v1981_v35, %v5999_v56  ;;  %v6402_v56 = vadd.f32 %v1983_v24, %v6011_v0  ;;  %v4971_v24 = vld [vmem:[#allocation18 + $0x10] sm:$0xff]  }
 0x42d   :  { %v1982_v48 = vsel %vm1950_vm3, %v1870_v9, %v1966_v14  ;;  %v4509_v55 = vpop.f32.mrb[36].mxu0  ;;  %v6393_v40 = vadd.f32 %v1984_v32, %v6003_v58 }
 0x42e   :  { %v1875_v7 = vadd.f32 %v4509_v55, %v6354_v17  ;;  %v1815_v27 = vpop.f32.mrb[37].mxu0  ;;  %4630 = vmatpush3.bf16.msra.mxu0 %v6378_v6  ;;  %v6390_v21 = vadd.f32 %v1982_v48, %v6001_v57 }
 0x42f   :  { %v1873_v3 = vadd.f32 %v6354_v17, %v1815_v27  ;;  %v4510_v5 = vpop.f32.mrb[38].mxu0  ;;  %4647 = vmatprep.subr.bf16.mxu0 %v4969_v33  ;;  %v6409_v14 = vpack.c.bf16 %v6393_v40, %v6402_v56 }
 0x430   :  { %v1876_v16 = vadd.f32 %v4510_v5, %v6354_v17  ;;  %v1818_v55 = vpop.f32.mrb[39].mxu0  ;;  %v6399_v9 = vpack.c.bf16 %v6390_v21, %v6387_v13  ;;  %v1971_v57 = vmul.f32 0.01, %v1875_v7  ;;  %vm1955_vm5 = vcmp.gt.f32.partialorder %v1875_v7, 0.0 }
 0x431   :  { %vm1953_vm4 = vcmp.gt.f32.partialorder %v1873_v3, 0.0  ;;  %v1969_v51 = vmul.f32 0.01, %v1873_v3  ;;  %v1874_v58 = vadd.f32 %v6354_v17, %v1818_v55  ;;  %4632 = vmatmul.mubr.bf16.vlgmr.msra.gmra.mrb[48].mxu0 %v6213_v25 }
 0x432   :  { %vm1956_vm6 = vcmp.gt.f32.partialorder %v1876_v16, 0.0  ;;  %v1972_v35 = vmul.f32 0.01, %v1876_v16  ;;  %4519 = vmatprep.subr.bf16.mxu1 %v6399_v9  ;;  %4648 = vmatpush3.bf16.msra.mxu0 %v4969_v33  ;;  %v1987_v25 = vsel %vm1955_vm5, %v1875_v7, %v1971_v57 }
 0x433   :  { %v1985_v32 = vsel %vm1953_vm4, %v1873_v3, %v1969_v51  ;;  %vm1954_vm7 = vcmp.gt.f32.partialorder %v1874_v58, 0.0  ;;  %v1970_v0 = vmul.f32 0.01, %v1874_v58  ;;  %4520 = vmatpush3.bf16.msra.mxu1 %v6399_v9  ;;  %4649 = vmatprep.subr.bf16.mxu0 %v4970_v15 }
 0x434   :  { %v1988_v48 = vsel %vm1956_vm6, %v1876_v16, %v1972_v35  ;;  %4521 = vmatprep.subr.bf16.mxu1 %v6409_v14  ;;  %4635 = vmatprep.mubr.bf16.mxu0 %v6218_v31  ;;  %v6416_v3 = vadd.f32 %v1985_v32, %v6023_v10  ;;  %v4972_v31 = vld [vmem:[#allocation18 + $0x18] sm:$0xff]  }
 0x435   :  { %v1986_v27 = vsel %vm1954_vm7, %v1874_v58, %v1970_v0  ;;  %v4513_v5 = vpop.f32.mrb[40].mxu0  ;;  %v6422_v46 = vadd.f32 %v1988_v48, %v6027_v12 }
 0x436   :  { %v1879_v33 = vadd.f32 %v4513_v5, %v6354_v17  ;;  %v1831_v55 = vpop.f32.mrb[41].mxu0  ;;  %4650 = vmatpush3.bf16.msra.mxu0 %v4970_v15  ;;  %v6419_v51 = vadd.f32 %v1986_v27, %v6025_v11  ;;  %v6432_v11 = vadd.f32 %v1987_v25, %v6035_v18  ;;  %v4973_v25 = vld [vmem:[#allocation18 + $0x20] sm:$0xff]  }
 0x437   :  { %v1877_v16 = vadd.f32 %v6354_v17, %v1831_v55  ;;  %v4514_v35 = vpop.f32.mrb[42].mxu0  ;;  %4522 = vmatpush3.bf16.msra.mxu1 %v6409_v14  ;;  %4651 = vmatprep.subr.bf16.mxu0 %v4971_v24 }
 0x438   :  { %v1880_v7 = vadd.f32 %v4514_v35, %v6354_v17  ;;  %v1834_v57 = vpop.f32.mrb[43].mxu0  ;;  %v6429_v10 = vpack.c.bf16 %v6419_v51, %v6416_v3  ;;  %v1975_v15 = vmul.f32 0.01, %v1879_v33  ;;  %vm1959_vm9 = vcmp.gt.f32.partialorder %v1879_v33, 0.0 }
 0x439   :  { %vm1957_vm8 = vcmp.gt.f32.partialorder %v1877_v16, 0.0  ;;  %v1973_v12 = vmul.f32 0.01, %v1877_v16  ;;  %v1878_v58 = vadd.f32 %v6354_v17, %v1834_v57  ;;  %4636 = vmatmul.mubr.bf16.gmra.mrb[52].mxu0 %v6225_v38  ;;  %v6439_v0 = vpack.c.bf16 %v6422_v46, %v6432_v11 }
 0x43a   :  { %vm1960_vm10 = vcmp.gt.f32.partialorder %v1880_v7, 0.0  ;;  %v1976_v32 = vmul.f32 0.01, %v1880_v7  ;;  %4523 = vmatprep.subr.bf16.mxu1 %v6429_v10  ;;  %4652 = vmatpush3.bf16.msra.mxu0 %v4971_v24  ;;  %v1991_v38 = vsel %vm1959_vm9, %v1879_v33, %v1975_v15 }
 0x43b   :  { %v1989_v48 = vsel %vm1957_vm8, %v1877_v16, %v1973_v12  ;;  %vm1958_vm11 = vcmp.gt.f32.partialorder %v1878_v58, 0.0  ;;  %v1974_v18 = vmul.f32 0.01, %v1878_v58  ;;  %4524 = vmatpush3.bf16.msra.mxu1 %v6429_v10  ;;  %4653 = vmatprep.subr.bf16.mxu0 %v4972_v31 }
 0x43c   :  { %v1992_v27 = vsel %vm1960_vm10, %v1880_v7, %v1976_v32  ;;  %4525 = vmatprep.subr.bf16.mxu1 %v6439_v0  ;;  %4639 = vmatprep.mubr.bf16.mxu0 %v6230_v42  ;;  %v6446_v16 = vadd.f32 %v1989_v48, %v6047_v28  ;;  %v4974_v42 = vld [vmem:[#allocation18 + $0x28] sm:$0xff]  }
 0x43d   :  { %v1990_v5 = vsel %vm1958_vm11, %v1878_v58, %v1974_v18  ;;  %v4517_v55 = vpop.f32.mrb[44].mxu0  ;;  %v6452_v12 = vadd.f32 %v1992_v27, %v6051_v30 }
 0x43e   :  { %v1883_v24 = vadd.f32 %v4517_v55, %v6354_v17  ;;  %v1847_v35 = vpop.f32.mrb[45].mxu0  ;;  %4654 = vmatpush3.bf16.msra.mxu0 %v4972_v31  ;;  %v6449_v57 = vadd.f32 %v1990_v5, %v6049_v29  ;;  %v6462_v29 = vadd.f32 %v1991_v38, %v6059_v36  ;;  %v4975_v38 = vld [vmem:[#allocation18 + $0x30] sm:$0xff]  }
 0x43f   :  { %v1881_v7 = vadd.f32 %v6354_v17, %v1847_v35  ;;  %v4518_v32 = vpop.f32.mrb[46].mxu0  ;;  %4526 = vmatpush3.bf16.msra.mxu1 %v6439_v0  ;;  %4655 = vmatprep.subr.bf16.mxu0 %v4973_v25 }
 0x440   :  { %v1884_v33 = vadd.f32 %v4518_v32, %v6354_v17  ;;  %v1850_v15 = vpop.f32.mrb[47].mxu0  ;;  %v6459_v28 = vpack.c.bf16 %v6449_v57, %v6446_v16  ;;  %v1979_v31 = vmul.f32 0.01, %v1883_v24  ;;  %vm1963_vm13 = vcmp.gt.f32.partialorder %v1883_v24, 0.0  ;;  %v5145_v32 = vld [vmem:[%s6906_s0 + $0x8] sm:$0xff]  }
 0x441   :  { %vm1961_vm12 = vcmp.gt.f32.partialorder %v1881_v7, 0.0  ;;  %v1977_v30 = vmul.f32 0.01, %v1881_v7  ;;  %v1882_v58 = vadd.f32 %v6354_v17, %v1850_v15  ;;  %4640 = vmatmul.mubr.bf16.gmra.mrb[56].mxu0 %v6237_v53  ;;  %v6469_v18 = vpack.c.bf16 %v6452_v12, %v6462_v29  ;;  %v4988_v15 = vld [vmem:[#allocation16 + $0x18] sm:$0xff]  }
 0x442   :  { %vm1964_vm14 = vcmp.gt.f32.partialorder %v1884_v33, 0.0  ;;  %v1980_v48 = vmul.f32 0.01, %v1884_v33  ;;  %4527 = vmatprep.subr.bf16.mxu1 %v6459_v28  ;;  %4656 = vmatpush3.bf16.msra.mxu0 %v4973_v25  ;;  %v1995_v53 = vsel %vm1963_vm13, %v1883_v24, %v1979_v31  ;;  %v4976_v24 = vld [vmem:[#allocation18 + $0x38] sm:$0xff]  }
 0x443   :  { %v1993_v27 = vsel %vm1961_vm12, %v1881_v7, %v1977_v30  ;;  %vm1962_vm15 = vcmp.gt.f32.partialorder %v1882_v58, 0.0  ;;  %v1978_v36 = vmul.f32 0.01, %v1882_v58  ;;  %4528 = vmatpush3.bf16.msra.mxu1 %v6459_v28  ;;  %4657 = vmatprep.subr.bf16.mxu0 %v4974_v42  ;;  %v5148_v31 = vld [vmem:[%s6906_s0 + $0x20] sm:$0xff]  }
 0x444   :  { %v1996_v17 = vsel %vm1964_vm14, %v1884_v33, %v1980_v48  ;;  %4529 = vmatprep.subr.bf16.mxu1 %v6469_v18  ;;  %4643 = vmatprep.mubr.bf16.mxu0 %v6242_v52  ;;  %v6475_v25 = vadd.f32 %v1993_v27, %v6073_v49  ;;  %v6487_v52 = vadd.f32 %v1995_v53, %v6085_v61  ;;  %v4978_v61 = vld [vmem:[#allocation13 + $0x8] sm:$0xff]   ;;  %v4987_v33 = vld [vmem:[#allocation16 + $0x10] sm:$0xff]   ;;  %v4981_v30 = vld [vmem:[#allocation13 + $0x20] sm:$0xff]  }
 0x445   :  { %v1994_v5 = vsel %vm1962_vm15, %v1882_v58, %v1978_v36  ;;  %v6481_v35 = vadd.f32 %v1996_v17, %v6077_v41  ;;  %v4977_v41 = vld [vmem:[#allocation13] sm:$0xff]   ;;  %v4982_v58 = vld [vmem:[#allocation13 + $0x28] sm:$0xff]   ;;  %v4983_v27 = vld [vmem:[#allocation13 + $0x30] sm:$0xff]  }
 0x446   :  { %4658 = vmatpush3.bf16.msra.mxu0 %v4974_v42  ;;  %v6478_v55 = vadd.f32 %v1994_v5, %v6075_v50  ;;  %v4985_v50 = vld [vmem:[#allocation16] sm:$0xff]   ;;  %v4979_v42 = vld [vmem:[#allocation13 + $0x10] sm:$0xff]  }
 0x447   :  { %4530 = vmatpush3.bf16.msra.mxu1 %v6469_v18  ;;  %4659 = vmatprep.subr.bf16.mxu0 %v4975_v38  ;;  %v6492_v49 = vpack.c.bf16 %v6481_v35, %v6487_v52  ;;  %v4990_v48 = vld [vmem:[#allocation16 + $0x28] sm:$0xff]   ;;  %v4991_v36 = vld [vmem:[#allocation16 + $0x30] sm:$0xff]  }
 0x448   :  { %v2019_v7 = vpack.c.bf16 %v6478_v55, %v6475_v25 }
 0x449   :  { %4644 = vmatmul.mubr.bf16.gmra.mrb[60].mxu0 %v6249_v62  ;;  %v4986_v62 = vld [vmem:[#allocation16 + $0x8] sm:$0xff]  }
 0x44a   :  { %4531 = vmatprep.subr.bf16.mxu1 %v2019_v7  ;;  %4660 = vmatpush3.bf16.msra.mxu0 %v4975_v38  ;;  %v4984_v38 = vld [vmem:[#allocation13 + $0x38] sm:$0xff]  }
 0x44b   :  { %4532 = vmatpush3.bf16.msra.mxu1 %v2019_v7  ;;  %4663 = vmatprep.mubr.bf16.mxu0 %v6399_v9  ;;  %v5146_v9 = vld [vmem:[%s6906_s0 + $0x10] sm:$0xff]  }
 0x44c   :  { %4533 = vmatprep.subr.bf16.mxu1 %v6492_v49  ;;  %4661 = vmatprep.subr.bf16.mxu0 %v4976_v24 }
 0x44e   :  { %4662 = vmatpush3.bf16.msra.mxu0 %v4976_v24 }
 0x44f   :  { %4534 = vmatpush3.bf16.msra.mxu1 %v6492_v49  ;;  %4679 = vmatprep.subr.bf16.mxu0 %v4985_v50 }
 0x450   :  { %4551 = vmatprep.subr.bf16.mxu1 %v4977_v41 }
 0x451   :  { %4664 = vmatmul.mubr.bf16.vlgmr.msra.gmra.mrb[64].mxu0 %v6409_v14  ;;  %v4980_v14 = vld [vmem:[#allocation13 + $0x18] sm:$0xff]  }
 0x452   :  { %4536 = vmatmul.mubr.bf16.vlgmr.msra.gmra.mrb[48].mxu1 %v5145_v32  ;;  %4667 = vmatprep.mubr.bf16.mxu0 %v6429_v10  ;;  %v5147_v10 = vld [vmem:[%s6906_s0 + $0x18] sm:$0xff]  }
 0x453   :  { %4552 = vmatpush3.bf16.msra.mxu1 %v4977_v41  ;;  %4539 = vmatprep.mubr.bf16.mxu1 %v5146_v9 }
 0x454   :  { %4553 = vmatprep.subr.bf16.mxu1 %v4978_v61  ;;  %4680 = vmatpush3.bf16.msra.mxu0 %v4985_v50 }
 0x455   :  { %4681 = vmatprep.subr.bf16.mxu0 %v4986_v62 }
 0x457   :  { %4554 = vmatpush3.bf16.msra.mxu1 %v4978_v61 }
 0x458   :  { %4555 = vmatprep.subr.bf16.mxu1 %v4979_v42  ;;  %4682 = vmatpush3.bf16.msra.mxu0 %v4986_v62 }
 0x459   :  { %4668 = vmatmul.mubr.bf16.gmra.mrb[68].mxu0 %v6439_v0  ;;  %4683 = vmatprep.subr.bf16.mxu0 %v4987_v33  ;;  %v4989_v0 = vld [vmem:[#allocation16 + $0x20] sm:$0xff]  }
 0x45a   :  { %4540 = vmatmul.mubr.bf16.gmra.mrb[52].mxu1 %v5147_v10  ;;  %4671 = vmatprep.mubr.bf16.mxu0 %v6459_v28  ;;  %v5149_v28 = vld [vmem:[%s6906_s0 + $0x28] sm:$0xff]  }
 0x45b   :  { %4556 = vmatpush3.bf16.msra.mxu1 %v4979_v42  ;;  %4543 = vmatprep.mubr.bf16.mxu1 %v5148_v31 }
 0x45c   :  { %4557 = vmatprep.subr.bf16.mxu1 %v4980_v14  ;;  %4684 = vmatpush3.bf16.msra.mxu0 %v4987_v33 }
 0x45d   :  { %4685 = vmatprep.subr.bf16.mxu0 %v4988_v15 }
 0x45f   :  { %4558 = vmatpush3.bf16.msra.mxu1 %v4980_v14 }
 0x460   :  { %4559 = vmatprep.subr.bf16.mxu1 %v4981_v30  ;;  %4686 = vmatpush3.bf16.msra.mxu0 %v4988_v15 }
 0x461   :  { %4672 = vmatmul.mubr.bf16.gmra.mrb[72].mxu0 %v6469_v18  ;;  %4687 = vmatprep.subr.bf16.mxu0 %v4989_v0 }
 0x462   :  { %4544 = vmatmul.mubr.bf16.gmra.mrb[56].mxu1 %v5149_v28  ;;  %4675 = vmatprep.mubr.bf16.mxu0 %v2019_v7 }
 0x463   :  { %4560 = vmatpush3.bf16.msra.mxu1 %v4981_v30  ;;  %4547 = vmatprep.mubr.bf16.mxu1 %v6169_v37  ;;  %v4992_v37 = vld [vmem:[#allocation16 + $0x38] sm:$0xff]  }
 0x464   :  { %4561 = vmatprep.subr.bf16.mxu1 %v4982_v58  ;;  %4688 = vmatpush3.bf16.msra.mxu0 %v4989_v0 }
 0x465   :  { %4689 = vmatprep.subr.bf16.mxu0 %v4990_v48 }
 0x467   :  { %4562 = vmatpush3.bf16.msra.mxu1 %v4982_v58 }
 0x468   :  { %4563 = vmatprep.subr.bf16.mxu1 %v4983_v27  ;;  %4690 = vmatpush3.bf16.msra.mxu0 %v4990_v48 }
 0x469   :  { %4676 = vmatmul.mubr.bf16.gmra.mrb[76].mxu0 %v6492_v49  ;;  %4691 = vmatprep.subr.bf16.mxu0 %v4991_v36 }
 0x46a   :  { %4548 = vmatmul.mubr.bf16.gmra.mrb[60].mxu1 %v6183_v4  ;;  %v4993_v4 = vld [vmem:[#allocation12] sm:$0xff]  }
 0x46b   :  { %4564 = vmatpush3.bf16.msra.mxu1 %v4983_v27  ;;  %4567 = vmatprep.mubr.bf16.mxu1 %v6285_v59  ;;  %v4994_v59 = vld [vmem:[#allocation12 + $0x8] sm:$0xff]  }
 0x46c   :  { %4565 = vmatprep.subr.bf16.mxu1 %v4984_v38  ;;  %4692 = vmatpush3.bf16.msra.mxu0 %v4991_v36 }
 0x46d   :  { %4693 = vmatprep.subr.bf16.mxu0 %v4992_v37 }
 0x46f   :  { %4566 = vmatpush3.bf16.msra.mxu1 %v4984_v38 }
 0x470   :  { %4694 = vmatpush3.bf16.msra.mxu0 %v4992_v37  ;;  %4583 = vmatprep.subr.bf16.mxu1 %v4993_v4 }
 0x472   :  { %4568 = vmatmul.mubr.bf16.vlgmr.msra.gmra.mrb[64].mxu1 %v6294_v60  ;;  %v4995_v60 = vld [vmem:[#allocation12 + $0x10] sm:$0xff]  }
 0x473   :  { %4571 = vmatprep.mubr.bf16.mxu1 %v6313_v43  ;;  %4584 = vmatpush3.bf16.msra.mxu1 %v4993_v4  ;;  %v4996_v43 = vld [vmem:[#allocation12 + $0x18] sm:$0xff]  }
 0x474   :  { %4585 = vmatprep.subr.bf16.mxu1 %v4994_v59 }
 0x477   :  { %4586 = vmatpush3.bf16.msra.mxu1 %v4994_v59 }
 0x478   :  { %4587 = vmatprep.subr.bf16.mxu1 %v4995_v60 }
 0x47a   :  { %4572 = vmatmul.mubr.bf16.gmra.mrb[68].mxu1 %v6322_v2  ;;  %v4997_v2 = vld [vmem:[#allocation12 + $0x20] sm:$0xff]  }
 0x47b   :  { %4575 = vmatprep.mubr.bf16.mxu1 %v6341_v44  ;;  %4588 = vmatpush3.bf16.msra.mxu1 %v4995_v60  ;;  %v4998_v44 = vld [vmem:[#allocation12 + $0x28] sm:$0xff]  }
 0x47c   :  { %4589 = vmatprep.subr.bf16.mxu1 %v4996_v43  ;;  %v5002_v60 = vld [vmem:[#allocation21 + $0x8] sm:$0xff]  }
 0x47f   :  { %4590 = vmatpush3.bf16.msra.mxu1 %v4996_v43 }
 0x480   :  { %4591 = vmatprep.subr.bf16.mxu1 %v4997_v2 }
 0x482   :  { %4576 = vmatmul.mubr.bf16.gmra.mrb[72].mxu1 %v6350_v8  ;;  %v4999_v8 = vld [vmem:[#allocation12 + $0x30] sm:$0xff]  }
 0x483   :  { %4579 = vmatprep.mubr.bf16.mxu1 %v6373_v45  ;;  %4592 = vmatpush3.bf16.msra.mxu1 %v4997_v2  ;;  %v5000_v45 = vld [vmem:[#allocation12 + $0x38] sm:$0xff]  }
 0x484   :  { %4593 = vmatprep.subr.bf16.mxu1 %v4998_v44 }
 0x487   :  { %4594 = vmatpush3.bf16.msra.mxu1 %v4998_v44  ;;  %v5003_v44 = vld [vmem:[#allocation21 + $0x10] sm:$0xff]  }
 0x488   :  { %4595 = vmatprep.subr.bf16.mxu1 %v4999_v8 }
 0x48a   :  { %4580 = vmatmul.mubr.bf16.gmra.mrb[76].mxu1 %v6378_v6  ;;  %v5001_v6 = vld [vmem:[#allocation21] sm:$0xff]  }
 0x48b   :  { %4596 = vmatpush3.bf16.msra.mxu1 %v4999_v8 }
 0x48c   :  { %4597 = vmatprep.subr.bf16.mxu1 %v5000_v45 }
 0x48f   :  { %4598 = vmatpush3.bf16.msra.mxu1 %v5000_v45 }
 0x490   :  { %4711 = vmatprep.subr.bf16.mxu1 %v5001_v6 }
 0x504   :  { %v4633_v18 = vpop.f32.mrb[48].mxu0 }
 0x505   :  { %v2513_v17 = vpop.f32.mrb[49].mxu0 }
 0x506   :  { %v4634_v53 = vpop.f32.mrb[50].mxu0 }
 0x507   :  { %v2577_v5 = vpack.c.bf16 %v4634_v53, %v4633_v18  ;;  %v2516_v7 = vpop.f32.mrb[51].mxu0  ;;  %v5004_v53 = vld [vmem:[#allocation21 + $0x18] sm:$0xff]  }
 0x508   :  { %v2576_v24 = vpack.c.bf16 %v2516_v7, %v2513_v17 }
 0x50a   :  { %4695 = vmatprep.mubr.bf16.mxu0 %v2576_v24  ;;  %v5005_v24 = vld [vmem:[#allocation21 + $0x20] sm:$0xff]  }
 0x50b   :  { %4696 = vmatmul.mubr.bf16.vlgmr.msra.gmra.mrb[64].mxu0 %v2577_v5 }
 0x50c   :  { %v4637_v49 = vpop.f32.mrb[52].mxu0 }
 0x50d   :  { %v2529_v50 = vpop.f32.mrb[53].mxu0 }
 0x50e   :  { %v4638_v41 = vpop.f32.mrb[54].mxu0 }
 0x50f   :  { %v2579_v61 = vpack.c.bf16 %v4638_v41, %v4637_v49  ;;  %v2532_v62 = vpop.f32.mrb[55].mxu0 }
 0x510   :  { %v2578_v32 = vpack.c.bf16 %v2532_v62, %v2529_v50 }
 0x512   :  { %4699 = vmatprep.mubr.bf16.mxu0 %v2578_v32 }
 0x513   :  { %4700 = vmatmul.mubr.bf16.gmra.mrb[68].mxu0 %v2579_v61 }
 0x514   :  { %v4641_v9 = vpop.f32.mrb[56].mxu0 }
 0x515   :  { %v2545_v42 = vpop.f32.mrb[57].mxu0 }
 0x516   :  { %v4642_v33 = vpop.f32.mrb[58].mxu0 }
 0x517   :  { %v2581_v14 = vpack.c.bf16 %v4642_v33, %v4641_v9  ;;  %v2548_v15 = vpop.f32.mrb[59].mxu0 }
 0x518   :  { %v2580_v10 = vpack.c.bf16 %v2548_v15, %v2545_v42  ;;  %v5007_v15 = vld [vmem:[#allocation21 + $0x30] sm:$0xff]  }
 0x51a   :  { %4703 = vmatprep.mubr.bf16.mxu0 %v2580_v10  ;;  %v5008_v10 = vld [vmem:[#allocation21 + $0x38] sm:$0xff]  }
 0x51b   :  { %4704 = vmatmul.mubr.bf16.gmra.mrb[72].mxu0 %v2581_v14  ;;  %v5006_v14 = vld [vmem:[#allocation21 + $0x28] sm:$0xff]  }
 0x51c   :  { %v4645_v31 = vpop.f32.mrb[60].mxu0 }
 0x51d   :  { %v2561_v30 = vpop.f32.mrb[61].mxu0 }
 0x51e   :  { %v4646_v0 = vpop.f32.mrb[62].mxu0 }
 0x51f   :  { %v2583_v58 = vpack.c.bf16 %v4646_v0, %v4645_v31  ;;  %v2564_v48 = vpop.f32.mrb[63].mxu0  ;;  %v5009_v31 = vld [vmem:[#allocation24] sm:$0xff]  }
 0x520   :  { %v2582_v28 = vpack.c.bf16 %v2564_v48, %v2561_v30  ;;  %v6528_v30 = vld [vmem:[#allocation19] ss:$0 sm:$0xff] }
 0x522   :  { %4707 = vmatprep.mubr.bf16.mxu0 %v2582_v28 }
 0x523   :  { %4708 = vmatmul.mubr.bf16.gmra.mrb[76].mxu0 %v2583_v58 }
 0x525   :  { %v4537_v27 = vpop.f32.mrb[48].mxu1 }
 0x526   :  { %v2055_v36 = vpop.f32.mrb[49].mxu1 }
 0x527   :  { %v4538_v38 = vpop.f32.mrb[50].mxu1 }
 0x528   :  { %v2119_v37 = vpack.c.bf16 %v4538_v38, %v4537_v27  ;;  %v2058_v4 = vpop.f32.mrb[51].mxu1 }
 0x529   :  { %v2118_v59 = vpack.c.bf16 %v2058_v4, %v2055_v36 }
 0x52b   :  { %4599 = vmatprep.mubr.bf16.mxu1 %v2118_v59 }
 0x52c   :  { %4600 = vmatmul.mubr.bf16.vlgmr.msra.gmra.mrb[64].mxu1 %v2119_v37 }
 0x52d   :  { %v4541_v43 = vpop.f32.mrb[52].mxu1  ;;  %4712 = vmatpush3.bf16.msra.mxu1 %v5001_v6 }
 0x52e   :  { %v2071_v2 = vpop.f32.mrb[53].mxu1  ;;  %4713 = vmatprep.subr.bf16.mxu1 %v5002_v60 }
 0x52f   :  { %v4542_v8 = vpop.f32.mrb[54].mxu1 }
 0x530   :  { %v2121_v45 = vpack.c.bf16 %v4542_v8, %v4541_v43  ;;  %v2074_v18 = vpop.f32.mrb[55].mxu1 }
 0x531   :  { %v2120_v17 = vpack.c.bf16 %v2074_v18, %v2071_v2  ;;  %4714 = vmatpush3.bf16.msra.mxu1 %v5002_v60 }
 0x532   :  { %4715 = vmatprep.subr.bf16.mxu1 %v5003_v44 }
 0x533   :  { %4603 = vmatprep.mubr.bf16.mxu1 %v2120_v17 }
 0x534   :  { %4604 = vmatmul.mubr.bf16.gmra.mrb[68].mxu1 %v2121_v45 }
 0x535   :  { %v4545_v5 = vpop.f32.mrb[56].mxu1  ;;  %4716 = vmatpush3.bf16.msra.mxu1 %v5003_v44 }
 0x536   :  { %v2087_v7 = vpop.f32.mrb[57].mxu1  ;;  %4717 = vmatprep.subr.bf16.mxu1 %v5004_v53 }
 0x537   :  { %v4546_v49 = vpop.f32.mrb[58].mxu1 }
 0x538   :  { %v2123_v50 = vpack.c.bf16 %v4546_v49, %v4545_v5  ;;  %v2090_v6 = vpop.f32.mrb[59].mxu1 }
 0x539   :  { %v2122_v41 = vpack.c.bf16 %v2090_v6, %v2087_v7  ;;  %4718 = vmatpush3.bf16.msra.mxu1 %v5004_v53 }
 0x53a   :  { %4719 = vmatprep.subr.bf16.mxu1 %v5005_v24 }
 0x53b   :  { %4607 = vmatprep.mubr.bf16.mxu1 %v2122_v41 }
 0x53c   :  { %4608 = vmatmul.mubr.bf16.gmra.mrb[72].mxu1 %v2123_v50 }
 0x53d   :  { %v4549_v61 = vpop.f32.mrb[60].mxu1  ;;  %4720 = vmatpush3.bf16.msra.mxu1 %v5005_v24 }
 0x53e   :  { %v2103_v62 = vpop.f32.mrb[61].mxu1  ;;  %4721 = vmatprep.subr.bf16.mxu1 %v5006_v14 }
 0x53f   :  { %v4550_v32 = vpop.f32.mrb[62].mxu1 }
 0x540   :  { %v2125_v9 = vpack.c.bf16 %v4550_v32, %v4549_v61  ;;  %v2106_v42 = vpop.f32.mrb[63].mxu1 }
 0x541   :  { %v2124_v33 = vpack.c.bf16 %v2106_v42, %v2103_v62  ;;  %4722 = vmatpush3.bf16.msra.mxu1 %v5006_v14  ;;  %v5010_v42 = vld [vmem:[#allocation24 + $0x8] sm:$0xff]  }
 0x542   :  { %4723 = vmatprep.subr.bf16.mxu1 %v5007_v15 }
 0x543   :  { %4611 = vmatprep.mubr.bf16.mxu1 %v2124_v33 }
 0x544   :  { %4612 = vmatmul.mubr.bf16.gmra.mrb[76].mxu1 %v2125_v9 }
 0x545   :  { %4724 = vmatpush3.bf16.msra.mxu1 %v5007_v15 }
 0x546   :  { %4725 = vmatprep.subr.bf16.mxu1 %v5008_v10 }
 0x549   :  { %4726 = vmatpush3.bf16.msra.mxu1 %v5008_v10 }
 0x54a   :  { %4743 = vmatprep.subr.bf16.mxu1 %v5009_v31 }
 0x5de   :  { %v4697_v0 = vpop.f32.mrb[64].mxu0 }
 0x5df   :  { %v2915_v58 = vadd.f32 %v4697_v0, %v6528_v30  ;;  %v2843_v48 = vpop.f32.mrb[65].mxu0 }
 0x5e0   :  { %v2913_v28 = vadd.f32 %v6528_v30, %v2843_v48  ;;  %v4698_v27 = vpop.f32.mrb[66].mxu0 }
 0x5e1   :  { %vm2995_vm0 = vcmp.gt.f32.partialorder %v2915_v58, 0.0  ;;  %v3011_v36 = vmul.f32 0.01, %v2915_v58  ;;  %v2916_v38 = vadd.f32 %v4698_v27, %v6528_v30  ;;  %v2846_v37 = vpop.f32.mrb[67].mxu0 }
 0x5e2   :  { %vm2993_vm1 = vcmp.gt.f32.partialorder %v2913_v28, 0.0  ;;  %v3009_v4 = vmul.f32 0.01, %v2913_v28  ;;  %v2914_v59 = vadd.f32 %v6528_v30, %v2846_v37 }
 0x5e3   :  { %v3027_v60 = vsel %vm2995_vm0, %v2915_v58, %v3011_v36  ;;  %vm2996_vm2 = vcmp.gt.f32.partialorder %v2916_v38, 0.0  ;;  %v3012_v43 = vmul.f32 0.01, %v2916_v38 }
 0x5e4   :  { %v3025_v2 = vsel %vm2993_vm1, %v2913_v28, %v3009_v4  ;;  %vm2994_vm3 = vcmp.gt.f32.partialorder %v2914_v59, 0.0  ;;  %v3010_v44 = vmul.f32 0.01, %v2914_v59  ;;  %v3043_v45 = vadd.f32 %v3027_v60, %v6402_v56  ;;  %v5011_v28 = vld [vmem:[#allocation24 + $0x10] sm:$0xff]  }
 0x5e5   :  { %v3028_v8 = vsel %vm2996_vm2, %v2916_v38, %v3012_v43  ;;  %v3041_v24 = vadd.f32 %v3025_v2, %v6387_v13 }
 0x5e6   :  { %v3044_v18 = vadd.f32 %v3028_v8, %v6393_v40  ;;  %v3026_v17 = vsel %vm2994_vm3, %v2914_v59, %v3010_v44  ;;  %v4701_v53 = vpop.f32.mrb[68].mxu0  ;;  %v5012_v8 = vld [vmem:[#allocation24 + $0x18] sm:$0xff]  }
 0x5e7   :  { %v2919_v5 = vadd.f32 %v4701_v53, %v6528_v30  ;;  %v2859_v7 = vpop.f32.mrb[69].mxu0  ;;  %v3042_v49 = vadd.f32 %v3026_v17, %v6390_v21 }
 0x5e8   :  { %v3058_v50 = vpack.c.bf16 %v3044_v18, %v3043_v45  ;;  %v2917_v6 = vadd.f32 %v6528_v30, %v2859_v7  ;;  %v4702_v41 = vpop.f32.mrb[70].mxu0 }
 0x5e9   :  { %vm2999_vm4 = vcmp.gt.f32.partialorder %v2919_v5, 0.0  ;;  %v3015_v61 = vmul.f32 0.01, %v2919_v5  ;;  %v2920_v62 = vadd.f32 %v4702_v41, %v6528_v30  ;;  %v2862_v56 = vpop.f32.mrb[71].mxu0  ;;  %v3057_v32 = vpack.c.bf16 %v3042_v49, %v3041_v24  ;;  %v5013_v49 = vld [vmem:[#allocation24 + $0x20] sm:$0xff]  }
 0x5ea   :  { %vm2997_vm5 = vcmp.gt.f32.partialorder %v2917_v6, 0.0  ;;  %v3013_v40 = vmul.f32 0.01, %v2917_v6  ;;  %v2918_v9 = vadd.f32 %v6528_v30, %v2862_v56 }
 0x5eb   :  { %v3031_v33 = vsel %vm2999_vm4, %v2919_v5, %v3015_v61  ;;  %vm3000_vm6 = vcmp.gt.f32.partialorder %v2920_v62, 0.0  ;;  %v3016_v13 = vmul.f32 0.01, %v2920_v62  ;;  %4727 = vmatprep.mubr.bf16.mxu1 %v3057_v32 }
 0x5ec   :  { %v3029_v21 = vsel %vm2997_vm5, %v2917_v6, %v3013_v40  ;;  %vm2998_vm7 = vcmp.gt.f32.partialorder %v2918_v9, 0.0  ;;  %v3014_v14 = vmul.f32 0.01, %v2918_v9  ;;  %4728 = vmatmul.mubr.bf16.vlgmr.msra.gmra.mrb[80].mxu1 %v3058_v50  ;;  %v3047_v58 = vadd.f32 %v3031_v33, %v6432_v11 }
 0x5ed   :  { %v3032_v15 = vsel %vm3000_vm6, %v2920_v62, %v3016_v13  ;;  %4744 = vmatpush3.bf16.msra.mxu1 %v5009_v31  ;;  %v3045_v38 = vadd.f32 %v3029_v21, %v6416_v3  ;;  %v5014_v13 = vld [vmem:[#allocation24 + $0x28] sm:$0xff]  }
 0x5ee   :  { %v3030_v10 = vsel %vm2998_vm7, %v2918_v9, %v3014_v14  ;;  %v4705_v0 = vpop.f32.mrb[72].mxu0  ;;  %4745 = vmatprep.subr.bf16.mxu1 %v5010_v42  ;;  %v3048_v48 = vadd.f32 %v3032_v15, %v6422_v46 }
 0x5ef   :  { %v2923_v27 = vadd.f32 %v4705_v0, %v6528_v30  ;;  %v2875_v36 = vpop.f32.mrb[73].mxu0  ;;  %v3046_v37 = vadd.f32 %v3030_v10, %v6419_v51  ;;  %v6558_v10 = vld [vmem:[#allocation15] ss:$0 sm:$0xff] }
 0x5f0   :  { %v2921_v4 = vadd.f32 %v6528_v30, %v2875_v36  ;;  %v4706_v59 = vpop.f32.mrb[74].mxu0  ;;  %v3060_v60 = vpack.c.bf16 %v3048_v48, %v3047_v58  ;;  %v5015_v48 = vld [vmem:[#allocation24 + $0x30] sm:$0xff]  }
 0x5f1   :  { %vm3003_vm8 = vcmp.gt.f32.partialorder %v2923_v27, 0.0  ;;  %v3019_v31 = vmul.f32 0.01, %v2923_v27  ;;  %v2924_v43 = vadd.f32 %v4706_v59, %v6528_v30  ;;  %v2878_v2 = vpop.f32.mrb[75].mxu0  ;;  %4746 = vmatpush3.bf16.msra.mxu1 %v5010_v42  ;;  %v3059_v11 = vpack.c.bf16 %v3046_v37, %v3045_v38 }
 0x5f2   :  { %vm3001_vm9 = vcmp.gt.f32.partialorder %v2921_v4, 0.0  ;;  %v3017_v46 = vmul.f32 0.01, %v2921_v4  ;;  %v2922_v44 = vadd.f32 %v6528_v30, %v2878_v2  ;;  %4747 = vmatprep.subr.bf16.mxu1 %v5011_v28  ;;  %v5016_v2 = vld [vmem:[#allocation24 + $0x38] sm:$0xff]  }
 0x5f3   :  { %v3035_v3 = vsel %vm3003_vm8, %v2923_v27, %v3019_v31  ;;  %vm3004_vm10 = vcmp.gt.f32.partialorder %v2924_v43, 0.0  ;;  %v3020_v51 = vmul.f32 0.01, %v2924_v43  ;;  %4731 = vmatprep.mubr.bf16.mxu1 %v3059_v11 }
 0x5f4   :  { %v3033_v45 = vsel %vm3001_vm9, %v2921_v4, %v3017_v46  ;;  %vm3002_vm11 = vcmp.gt.f32.partialorder %v2922_v44, 0.0  ;;  %v3018_v18 = vmul.f32 0.01, %v2922_v44  ;;  %4732 = vmatmul.mubr.bf16.gmra.mrb[84].mxu1 %v3060_v60  ;;  %v3051_v7 = vadd.f32 %v3035_v3, %v6462_v29 }
 0x5f5   :  { %v3036_v17 = vsel %vm3004_vm10, %v2924_v43, %v3020_v51  ;;  %4748 = vmatpush3.bf16.msra.mxu1 %v5011_v28  ;;  %v3049_v41 = vadd.f32 %v3033_v45, %v6446_v16 }
 0x5f6   :  { %v3034_v53 = vsel %vm3002_vm11, %v2922_v44, %v3018_v18  ;;  %v4709_v5 = vpop.f32.mrb[76].mxu0  ;;  %4749 = vmatprep.subr.bf16.mxu1 %v5012_v8  ;;  %v3052_v24 = vadd.f32 %v3036_v17, %v6452_v12 }
 0x5f7   :  { %v2927_v50 = vadd.f32 %v4709_v5, %v6528_v30  ;;  %v2891_v6 = vpop.f32.mrb[77].mxu0  ;;  %v3050_v61 = vadd.f32 %v3034_v53, %v6449_v57 }
 0x5f8   :  { %v2925_v62 = vadd.f32 %v6528_v30, %v2891_v6  ;;  %v4710_v56 = vpop.f32.mrb[78].mxu0  ;;  %v3062_v32 = vpack.c.bf16 %v3052_v24, %v3051_v7 }
 0x5f9   :  { %vm3007_vm12 = vcmp.gt.f32.partialorder %v2927_v50, 0.0  ;;  %v3023_v40 = vmul.f32 0.01, %v2927_v50  ;;  %v2928_v9 = vadd.f32 %v4710_v56, %v6528_v30  ;;  %v2894_v42 = vpop.f32.mrb[79].mxu0  ;;  %4750 = vmatpush3.bf16.msra.mxu1 %v5012_v8  ;;  %v3061_v29 = vpack.c.bf16 %v3050_v61, %v3049_v41 }
 0x5fa   :  { %vm3005_vm13 = vcmp.gt.f32.partialorder %v2925_v62, 0.0  ;;  %v3021_v12 = vmul.f32 0.01, %v2925_v62  ;;  %v2926_v33 = vadd.f32 %v6528_v30, %v2894_v42  ;;  %4751 = vmatprep.subr.bf16.mxu1 %v5013_v49 }
 0x5fb   :  { %v3039_v16 = vsel %vm3007_vm12, %v2927_v50, %v3023_v40  ;;  %vm3008_vm14 = vcmp.gt.f32.partialorder %v2928_v9, 0.0  ;;  %v3024_v57 = vmul.f32 0.01, %v2928_v9  ;;  %4735 = vmatprep.mubr.bf16.mxu1 %v3061_v29 }
 0x5fc   :  { %v3037_v21 = vsel %vm3005_vm13, %v2925_v62, %v3021_v12  ;;  %vm3006_vm15 = vcmp.gt.f32.partialorder %v2926_v33, 0.0  ;;  %v3022_v14 = vmul.f32 0.01, %v2926_v33  ;;  %4736 = vmatmul.mubr.bf16.gmra.mrb[88].mxu1 %v3062_v32  ;;  %v3055_v58 = vadd.f32 %v3039_v16, %v6487_v52 }
 0x5fd   :  { %v3040_v15 = vsel %vm3008_vm14, %v2928_v9, %v3024_v57  ;;  %4752 = vmatpush3.bf16.msra.mxu1 %v5013_v49  ;;  %v3053_v27 = vadd.f32 %v3037_v21, %v6475_v25 }
 0x5fe   :  { %v3038_v0 = vsel %vm3006_vm15, %v2926_v33, %v3022_v14  ;;  %4753 = vmatprep.subr.bf16.mxu1 %v5014_v13  ;;  %v3056_v30 = vadd.f32 %v3040_v15, %v6481_v35 }
 0x5ff   :  { %v4601_v28 = vpop.f32.mrb[64].mxu1  ;;  %v3054_v36 = vadd.f32 %v3038_v0, %v6478_v55 }
 0x600   :  { %v2465_v38 = vadd.f32 %v4601_v28, %v6558_v10  ;;  %v2393_v37 = vpop.f32.mrb[65].mxu1  ;;  %v3064_v4 = vpack.c.bf16 %v3056_v30, %v3055_v58 }
 0x601   :  { %v2463_v59 = vadd.f32 %v6558_v10, %v2393_v37  ;;  %v4602_v60 = vpop.f32.mrb[66].mxu1  ;;  %4754 = vmatpush3.bf16.msra.mxu1 %v5014_v13  ;;  %v3063_v31 = vpack.c.bf16 %v3054_v36, %v3053_v27 }
 0x602   :  { %vm2931_vm0 = vcmp.gt.f32.partialorder %v2465_v38, 0.0  ;;  %v2947_v43 = vmul.f32 0.01, %v2465_v38  ;;  %v2466_v52 = vadd.f32 %v4602_v60, %v6558_v10  ;;  %v2396_v35 = vpop.f32.mrb[67].mxu1  ;;  %4755 = vmatprep.subr.bf16.mxu1 %v5015_v48 }
 0x603   :  { %vm2929_vm1 = vcmp.gt.f32.partialorder %v2463_v59, 0.0  ;;  %v2945_v25 = vmul.f32 0.01, %v2463_v59  ;;  %v2464_v55 = vadd.f32 %v6558_v10, %v2396_v35  ;;  %4739 = vmatprep.mubr.bf16.mxu1 %v3063_v31  ;;  %v6915_v35 = vld [vmem:[#allocation36_spill] sm:$0xff] }
 0x604   :  { %v2963_v11 = vsel %vm2931_vm0, %v2465_v38, %v2947_v43  ;;  %vm2932_vm2 = vcmp.gt.f32.partialorder %v2466_v52, 0.0  ;;  %v2948_v46 = vmul.f32 0.01, %v2466_v52  ;;  %4740 = vmatmul.mubr.bf16.gmra.mrb[92].mxu1 %v3064_v4 }
 0x605   :  { %v2961_v44 = vsel %vm2929_vm1, %v2463_v59, %v2945_v25  ;;  %vm2930_vm3 = vcmp.gt.f32.partialorder %v2464_v55, 0.0  ;;  %v2946_v8 = vmul.f32 0.01, %v2464_v55  ;;  %4756 = vmatpush3.bf16.msra.mxu1 %v5015_v48  ;;  %v2979_v51 = vadd.f32 %v2963_v11, %v6288_v63 }
 0x606   :  { %v2964_v3 = vsel %vm2932_vm2, %v2466_v52, %v2948_v46  ;;  %4757 = vmatprep.subr.bf16.mxu1 %v5016_v2  ;;  %v2977_v7 = vadd.f32 %v2961_v44, %v6273_v20 }
 0x607   :  { %v2980_v45 = vadd.f32 %v2964_v3, %v6279_v23  ;;  %v2962_v18 = vsel %vm2930_vm3, %v2464_v55, %v2946_v8  ;;  %v4605_v17 = vpop.f32.mrb[68].mxu1 }
 0x608   :  { %v2469_v53 = vadd.f32 %v4605_v17, %v6558_v10  ;;  %v2409_v5 = vpop.f32.mrb[69].mxu1  ;;  %v2978_v24 = vadd.f32 %v2962_v18, %v6276_v22 }
 0x609   :  { %v3234_v49 = vpack.c.bf16 %v2980_v45, %v2979_v51  ;;  %v2467_v50 = vadd.f32 %v6558_v10, %v2409_v5  ;;  %v4606_v6 = vpop.f32.mrb[70].mxu1  ;;  %4758 = vmatpush3.bf16.msra.mxu1 %v5016_v2  ;;  %v6916_v5 = vld [vmem:[#allocation40_spill] sm:$0xff] }
 0x60a   :  { %vm2935_vm4 = vcmp.gt.f32.partialorder %v2469_v53, 0.0  ;;  %v2951_v41 = vmul.f32 0.01, %v2469_v53  ;;  %v2470_v63 = vadd.f32 %v4606_v6, %v6558_v10  ;;  %v2412_v61 = vpop.f32.mrb[71].mxu1  ;;  %v3233_v23 = vpack.c.bf16 %v2978_v24, %v2977_v7  ;;  %v6917_v24 = vld [vmem:[#allocation37_spill] sm:$0xff] }
 0x60b   :  { %vm2933_vm5 = vcmp.gt.f32.partialorder %v2467_v50, 0.0  ;;  %v2949_v62 = vmul.f32 0.01, %v2467_v50  ;;  %v2468_v56 = vadd.f32 %v6558_v10, %v2412_v61 }
 0x60c   :  { %v2967_v32 = vsel %vm2935_vm4, %v2469_v53, %v2951_v41  ;;  %vm2936_vm6 = vcmp.gt.f32.partialorder %v2470_v63, 0.0  ;;  %v2952_v20 = vmul.f32 0.01, %v2470_v63  ;;  %4759 = vmatprep.mubr.bf16.mxu1 %v3233_v23  ;;  %v6919_v41 = vld [vmem:[#allocation39_spill] sm:$0xff] }
 0x60d   :  { %v2965_v22 = vsel %vm2933_vm5, %v2467_v50, %v2949_v62  ;;  %vm2934_vm7 = vcmp.gt.f32.partialorder %v2468_v56, 0.0  ;;  %v2950_v40 = vmul.f32 0.01, %v2468_v56  ;;  %4760 = vmatmul.mubr.bf16.vlgmr.msra.gmra.mrb[96].mxu1 %v3234_v49  ;;  %v2983_v12 = vadd.f32 %v2967_v32, %v6316_v47  ;;  %v6918_v50 = vld [vmem:[#allocation38_spill] sm:$0xff] }
 0x60e   :  { %v2968_v9 = vsel %vm2936_vm6, %v2470_v63, %v2952_v20  ;;  %v2981_v57 = vadd.f32 %v2965_v22, %v6300_v54 }
 0x60f   :  { %v2966_v42 = vsel %vm2934_vm7, %v2468_v56, %v2950_v40  ;;  %v4609_v29 = vpop.f32.mrb[72].mxu1  ;;  %v2984_v33 = vadd.f32 %v2968_v9, %v6306_v19 }
 0x610   :  { %v2473_v13 = vadd.f32 %v4609_v29, %v6558_v10  ;;  %v2425_v16 = vpop.f32.mrb[73].mxu1  ;;  %v2982_v21 = vadd.f32 %v2966_v42, %v6303_v1 }
 0x611   :  { %v2471_v14 = vadd.f32 %v6558_v10, %v2425_v16  ;;  %v4610_v15 = vpop.f32.mrb[74].mxu1  ;;  %v3236_v0 = vpack.c.bf16 %v2984_v33, %v2983_v12 }
 0x612   :  { %vm2939_vm8 = vcmp.gt.f32.partialorder %v2473_v13, 0.0  ;;  %v2955_v58 = vmul.f32 0.01, %v2473_v13  ;;  %v2474_v30 = vadd.f32 %v4610_v15, %v6558_v10  ;;  %v2428_v48 = vpop.f32.mrb[75].mxu1  ;;  %v3235_v28 = vpack.c.bf16 %v2982_v21, %v2981_v57 }
 0x613   :  { %vm2937_vm9 = vcmp.gt.f32.partialorder %v2471_v14, 0.0  ;;  %v2953_v47 = vmul.f32 0.01, %v2471_v14  ;;  %v2472_v19 = vadd.f32 %v6558_v10, %v2428_v48 }
 0x614   :  { %v2971_v27 = vsel %vm2939_vm8, %v2473_v13, %v2955_v58  ;;  %vm2940_vm10 = vcmp.gt.f32.partialorder %v2474_v30, 0.0  ;;  %v2956_v36 = vmul.f32 0.01, %v2474_v30  ;;  %4763 = vmatprep.mubr.bf16.mxu1 %v3235_v28 }
 0x615   :  { %v2969_v54 = vsel %vm2937_vm9, %v2471_v14, %v2953_v47  ;;  %vm2938_vm11 = vcmp.gt.f32.partialorder %v2472_v19, 0.0  ;;  %v2954_v1 = vmul.f32 0.01, %v2472_v19  ;;  %4764 = vmatmul.mubr.bf16.gmra.mrb[100].mxu1 %v3236_v0  ;;  %v2987_v59 = vadd.f32 %v2971_v27, %v6344_v26  ;;  %v3966_v14 = vld [vmem:[#allocation25] ss:$0 sm:$0xff] }
 0x616   :  { %v2972_v38 = vsel %vm2940_vm10, %v2474_v30, %v2956_v36  ;;  %v2985_v52 = vadd.f32 %v2969_v54, %v6328_v39 }
 0x617   :  { %v2970_v37 = vsel %vm2938_vm11, %v2472_v19, %v2954_v1  ;;  %v4613_v4 = vpop.f32.mrb[76].mxu1  ;;  %v2988_v60 = vadd.f32 %v2972_v38, %v6334_v34 }
 0x618   :  { %v2477_v31 = vadd.f32 %v4613_v4, %v6558_v10  ;;  %v2441_v43 = vpop.f32.mrb[77].mxu1  ;;  %v2986_v2 = vadd.f32 %v2970_v37, %v6915_v35 }
 0x619   :  { %v2475_v25 = vadd.f32 %v6558_v10, %v2441_v43  ;;  %v4614_v55 = vpop.f32.mrb[78].mxu1  ;;  %v3238_v11 = vpack.c.bf16 %v2988_v60, %v2987_v59 }
 0x61a   :  { %vm2943_vm12 = vcmp.gt.f32.partialorder %v2477_v31, 0.0  ;;  %v2959_v46 = vmul.f32 0.01, %v2477_v31  ;;  %v2478_v44 = vadd.f32 %v4614_v55, %v6558_v10  ;;  %v2444_v8 = vpop.f32.mrb[79].mxu1  ;;  %v3237_v3 = vpack.c.bf16 %v2986_v2, %v2985_v52 }
 0x61b   :  { %vm2941_vm13 = vcmp.gt.f32.partialorder %v2475_v25, 0.0  ;;  %v2957_v26 = vmul.f32 0.01, %v2475_v25  ;;  %v2476_v34 = vadd.f32 %v6558_v10, %v2444_v8 }
 0x61c   :  { %v2975_v51 = vsel %vm2943_vm12, %v2477_v31, %v2959_v46  ;;  %vm2944_vm14 = vcmp.gt.f32.partialorder %v2478_v44, 0.0  ;;  %v2960_v45 = vmul.f32 0.01, %v2478_v44  ;;  %4767 = vmatprep.mubr.bf16.mxu1 %v3237_v3 }
 0x61d   :  { %v2973_v39 = vsel %vm2941_vm13, %v2475_v25, %v2957_v26  ;;  %vm2942_vm15 = vcmp.gt.f32.partialorder %v2476_v34, 0.0  ;;  %v2958_v18 = vmul.f32 0.01, %v2476_v34  ;;  %4768 = vmatmul.mubr.bf16.gmra.mrb[104].mxu1 %v3238_v11  ;;  %v2991_v7 = vadd.f32 %v2975_v51, %v6916_v5 }
 0x61e   :  { %v2976_v17 = vsel %vm2944_vm14, %v2478_v44, %v2960_v45  ;;  %v2989_v6 = vadd.f32 %v2973_v39, %v6918_v50 }
 0x61f   :  { %v2974_v53 = vsel %vm2942_vm15, %v2476_v34, %v2958_v18  ;;  %v2992_v49 = vadd.f32 %v2976_v17, %v6917_v24 }
 0x620   :  { %v2990_v63 = vadd.f32 %v2974_v53, %v6919_v41 }
 0x621   :  { %v3240_v61 = vpack.c.bf16 %v2992_v49, %v2991_v7 }
 0x622   :  { %v3239_v10 = vpack.c.bf16 %v2990_v63, %v2989_v6  ;;  %v3957_v63 = vld [vmem:[#allocation22] ss:$0 sm:$0xff] }
 0x624   :  { %4771 = vmatprep.mubr.bf16.mxu1 %v3239_v10 }
 0x625   :  { %4772 = vmatmul.mubr.bf16.gmra.mrb[108].mxu1 %v3240_v61 }
 0x6bf   :  { %v6596_v23 = vpop.f32.mrb[80].mxu1 }
 0x6c0   :  { %v6598_v62 = vpop.f32.mrb[81].mxu1 }
 0x6c1   :  { %v6600_v56 = vpop.f32.mrb[82].mxu1 }
 0x6c2   :  { %v6602_v32 = vpop.f32.mrb[83].mxu1 }
 0x6c7   :  { %v6604_v20 = vpop.f32.mrb[84].mxu1 }
 0x6c8   :  { %v6606_v22 = vpop.f32.mrb[85].mxu1 }
 0x6c9   :  { %v6608_v40 = vpop.f32.mrb[86].mxu1 }
 0x6ca   :  { %v6610_v9 = vpop.f32.mrb[87].mxu1 }
 0x6cf   :  { %v6612_v42 = vpop.f32.mrb[88].mxu1 }
 0x6d0   :  { %v6614_v29 = vpop.f32.mrb[89].mxu1 }
 0x6d1   :  { %v6616_v12 = vpop.f32.mrb[90].mxu1 }
 0x6d2   :  { %v6618_v33 = vpop.f32.mrb[91].mxu1 }
 0x6d7   :  { %v6620_v13 = vpop.f32.mrb[92].mxu1 }
 0x6d8   :  { %v6622_v16 = vpop.f32.mrb[93].mxu1 }
 0x6d9   :  { %v6624_v57 = vpop.f32.mrb[94].mxu1 }
 0x6da   :  { %v6626_v21 = vpop.f32.mrb[95].mxu1 }
 0x6e0   :  { %v4761_v15 = vpop.f32.mrb[96].mxu1 }
 0x6e1   :  { %v6628_v0 = vadd.f32 %v4761_v15, %v3966_v14  ;;  %v3346_v58 = vpop.f32.mrb[97].mxu1  ;;  %v6689_v15 = vadd.f32 %v3957_v63, %v6598_v62  ;;  %v6704_v62 = vadd.f32 %v6600_v56, %v3957_v63  ;;  %v6719_v56 = vadd.f32 %v6604_v20, %v3957_v63 }
 0x6e2   :  { %v6630_v30 = vadd.f32 %v3966_v14, %v3346_v58  ;;  %v4762_v48 = vpop.f32.mrb[98].mxu1  ;;  %v6734_v20 = vadd.f32 %v3957_v63, %v6618_v33  ;;  %v6749_v33 = vadd.f32 %v3957_v63, %v6622_v16  ;;  %v6764_v16 = vadd.f32 %v6624_v57, %v3957_v63 }
 0x6e3   :  { %v6632_v28 = vadd.f32 %v4762_v48, %v3966_v14  ;;  %v3349_v47 = vpop.f32.mrb[99].mxu1  ;;  %v3507_v19 = vmul.f32 %v6628_v0, %v6628_v0  ;;  %v6694_v48 = vadd.f32 %v3957_v63, %v6602_v32  ;;  %v6709_v32 = vadd.f32 %v3957_v63, %v6606_v22 }
 0x6e4   :  { %v6636_v27 = vadd.f32 %v3966_v14, %v3349_v47  ;;  %v3505_v36 = vmul.f32 %v6630_v30, %v6630_v30  ;;  %v6724_v22 = vadd.f32 %v6608_v40, %v3957_v63  ;;  %v6739_v40 = vadd.f32 %v6612_v42, %v3957_v63 }
 0x6e5   :  { %3525 = vadd.xlane.f32.xlu1 %v3507_v19  ;;  %v3508_v54 = vmul.f32 %v6632_v28, %v6632_v28  ;;  %v3409_v19 = vmul.f32 %v6689_v15, %v6689_v15  ;;  %v6754_v42 = vadd.f32 %v3957_v63, %v6626_v21 }
 0x6e6   :  { %3521 = vadd.xlane.f32.xlu0 %v3505_v36  ;;  %v3506_v38 = vmul.f32 %v6636_v27, %v6636_v27  ;;  %v3410_v36 = vmul.f32 %v6694_v48, %v6694_v48 }
 0x6e8   :  { %v4765_v1 = vpop.f32.mrb[100].mxu1 }
 0x6e9   :  { %3527 = vadd.xlane.f32.xlu1 %v3508_v54  ;;  %v3362_v37 = vpop.f32.mrb[101].mxu1  ;;  %v6646_v31 = vadd.f32 %v4765_v1, %v3966_v14  ;;  %v3412_v1 = vmul.f32 %v6704_v62, %v6704_v62 }
 0x6ea   :  { %v6644_v4 = vadd.f32 %v3966_v14, %v3362_v37  ;;  %v4766_v59 = vpop.f32.mrb[102].mxu1  ;;  %3523 = vadd.xlane.f32.xlu0 %v3506_v38  ;;  %v3413_v38 = vmul.f32 %v6709_v32, %v6709_v32 }
 0x6eb   :  { %v3365_v60 = vpop.f32.mrb[103].mxu1  ;;  %v6652_v35 = vadd.f32 %v4766_v59, %v3966_v14  ;;  %v3511_v55 = vmul.f32 %v6646_v31, %v6646_v31  ;;  %v3415_v59 = vmul.f32 %v6719_v56, %v6719_v56 }
 0x6ec   :  { %v6648_v43 = vadd.f32 %v3966_v14, %v3365_v60  ;;  %v3509_v52 = vmul.f32 %v6644_v4, %v6644_v4  ;;  %v3416_v60 = vmul.f32 %v6724_v22, %v6724_v22 }
 0x6ed   :  { %v3512_v8 = vmul.f32 %v6652_v35, %v6652_v35 }
 0x6ee   :  { %3529 = vadd.xlane.f32.xlu0 %v3509_v52  ;;  %v3510_v2 = vmul.f32 %v6648_v43, %v6648_v43 }
 0x6f0   :  { %v4769_v25 = vpop.f32.mrb[104].mxu1  ;;  %3531 = vadd.xlane.f32.xlu1 %v3510_v2  ;;  %v3418_v2 = vmul.f32 %v6734_v20, %v6734_v20 }
 0x6f1   :  { %v3378_v11 = vpop.f32.mrb[105].mxu1  ;;  %v6662_v26 = vadd.f32 %v4769_v25, %v3966_v14  ;;  %v3419_v25 = vmul.f32 %v6739_v40, %v6739_v40 }
 0x6f2   :  { %v6658_v46 = vadd.f32 %v3966_v14, %v3378_v11  ;;  %v4770_v44 = vpop.f32.mrb[106].mxu1  ;;  %3533 = vadd.xlane.f32.xlu0 %v3511_v55  ;;  %v3421_v11 = vmul.f32 %v6749_v33, %v6749_v33 }
 0x6f3   :  { %v3381_v3 = vpop.f32.mrb[107].mxu1  ;;  %v6668_v45 = vadd.f32 %v4770_v44, %v3966_v14  ;;  %v3515_v17 = vmul.f32 %v6662_v26, %v6662_v26  ;;  %v3422_v44 = vmul.f32 %v6754_v42, %v6754_v42 }
 0x6f4   :  { %v6664_v34 = vadd.f32 %v3966_v14, %v3381_v3  ;;  %3535 = vadd.xlane.f32.xlu1 %v3512_v8  ;;  %v3513_v51 = vmul.f32 %v6658_v46, %v6658_v46 }
 0x6f5   :  { %v3516_v24 = vmul.f32 %v6668_v45, %v6668_v45 }
 0x6f6   :  { %3537 = vadd.xlane.f32.xlu0 %v3513_v51  ;;  %v3514_v39 = vmul.f32 %v6664_v34, %v6664_v34 }
 0x6f8   :  { %3539 = vadd.xlane.f32.xlu1 %v3514_v39  ;;  %v4773_v18 = vpop.f32.mrb[108].mxu1 }
 0x6f9   :  { %v3394_v53 = vpop.f32.mrb[109].mxu1  ;;  %v6678_v50 = vadd.f32 %v4773_v18, %v3966_v14 }
 0x6fa   :  { %v6674_v5 = vadd.f32 %v3966_v14, %v3394_v53  ;;  %3541 = vadd.xlane.f32.xlu0 %v3515_v17  ;;  %v4774_v7 = vpop.f32.mrb[110].mxu1 }
 0x6fb   :  { %v3397_v49 = vpop.f32.mrb[111].mxu1  ;;  %v6684_v61 = vadd.f32 %v4774_v7, %v3966_v14  ;;  %v3519_v58 = vmul.f32 %v6678_v50, %v6678_v50 }
 0x6fc   :  { %v6680_v6 = vadd.f32 %v3966_v14, %v3397_v49  ;;  %3543 = vadd.xlane.f32.xlu1 %v3516_v24  ;;  %v3517_v41 = vmul.f32 %v6674_v5, %v6674_v5  ;;  %v6699_v14 = vadd.f32 %v6596_v23, %v3957_v63  ;;  %v6714_v23 = vadd.f32 %v3957_v63, %v6610_v9 }
 0x6fd   :  { %v3520_v47 = vmul.f32 %v6684_v61, %v6684_v61  ;;  %v6729_v9 = vadd.f32 %v3957_v63, %v6614_v29  ;;  %v6744_v29 = vadd.f32 %v6616_v12, %v3957_v63  ;;  %v6759_v12 = vadd.f32 %v6620_v13, %v3957_v63 }
 0x6fe   :  { %3545 = vadd.xlane.f32.xlu0 %v3517_v41  ;;  %v3518_v10 = vmul.f32 %v6680_v6, %v6680_v6  ;;  %v3411_v54 = vmul.f32 %v6699_v14, %v6699_v14  ;;  %v3414_v37 = vmul.f32 %v6714_v23, %v6714_v23  ;;  %v3424_v13 = vmul.f32 %v6764_v16, %v6764_v16 }
 0x6ff   :  { %v3417_v52 = vmul.f32 %v6729_v9, %v6729_v9  ;;  %v3420_v55 = vmul.f32 %v6744_v29, %v6744_v29  ;;  %v3423_v21 = vmul.f32 %v6759_v12, %v6759_v12 }
 0x700   :  { %3547 = vadd.xlane.f32.xlu1 %v3518_v10 }
 0x702   :  { %3549 = vadd.xlane.f32.xlu0 %v3519_v58 }
 0x704   :  { %3551 = vadd.xlane.f32.xlu1 %v3520_v47 }
 0x706   :  { %3425 = vadd.xlane.f32.xlu0 %v3409_v19 }
 0x708   :  { %3427 = vadd.xlane.f32.xlu1 %v3410_v36 }
 0x70a   :  { %3429 = vadd.xlane.f32.xlu0 %v3411_v54 }
 0x70c   :  { %3431 = vadd.xlane.f32.xlu1 %v3412_v1 }
 0x70e   :  { %3433 = vadd.xlane.f32.xlu0 %v3413_v38 }
 0x710   :  { %3435 = vadd.xlane.f32.xlu1 %v3414_v37 }
 0x712   :  { %3437 = vadd.xlane.f32.xlu0 %v3415_v59 }
 0x714   :  { %3439 = vadd.xlane.f32.xlu1 %v3416_v60 }
 0x716   :  { %3441 = vadd.xlane.f32.xlu0 %v3417_v52 }
 0x718   :  { %3443 = vadd.xlane.f32.xlu1 %v3418_v2 }
 0x71a   :  { %3445 = vadd.xlane.f32.xlu0 %v3419_v25 }
 0x71c   :  { %3447 = vadd.xlane.f32.xlu1 %v3420_v55 }
 0x71e   :  { %3449 = vadd.xlane.f32.xlu0 %v3421_v11 }
 0x720   :  { %3451 = vadd.xlane.f32.xlu1 %v3422_v44 }
 0x722   :  { %3453 = vadd.xlane.f32.xlu0 %v3423_v21 }
 0x724   :  { %3455 = vadd.xlane.f32.xlu1 %v3424_v13 }
 0x772   :  { %v3526_v8 = vpop.xlane.xlu1 %3525 }
 0x773   :  { %v3555_v3 = vmax.f32 %v3526_v8, 1e-24  ;;  %v3522_v51 = vpop.xlane.xlu0 %3521 }
 0x774   :  { %v3553_v39 = vmax.f32 %v3522_v51, 1e-24 }
 0x775   :  { %5017 = vrsqrt.f32 %v3555_v3 }
 0x776   :  { %v3528_v18 = vpop.xlane.xlu1 %3527  ;;  %5019 = vrsqrt.f32 %v3553_v39 }
 0x777   :  { %v3556_v57 = vmax.f32 %v3528_v18, 1e-24  ;;  %v3524_v17 = vpop.xlane.xlu0 %3523 }
 0x778   :  { %v3554_v53 = vmax.f32 %v3524_v17, 1e-24 }
 0x779   :  { %5021 = vrsqrt.f32 %v3556_v57 }
 0x77a   :  { %5023 = vrsqrt.f32 %v3554_v53 }
 0x77b   :  { %v3530_v7 = vpop.xlane.xlu0 %3529 }
 0x77c   :  { %v3557_v49 = vmax.f32 %v3530_v7, 1e-24 }
 0x77d   :  { %v3532_v24 = vpop.xlane.xlu1 %3531 }
 0x77e   :  { %v3558_v41 = vmax.f32 %v3532_v24, 1e-24 }
 0x77f   :  { %v3534_v63 = vpop.xlane.xlu0 %3533  ;;  %v5018_v10 = vpop.eup %5017 }
 0x780   :  { %5025 = vrsqrt.f32 %v3558_v41  ;;  %v5020_v47 = vpop.eup %5019  ;;  %v3559_v52 = vmax.f32 %v3534_v63, 1e-24  ;;  %v3587_v55 = vmul.f32 %v5018_v10, %v6628_v0 }
 0x781   :  { %v3536_v58 = vpop.xlane.xlu1 %3535  ;;  %5027 = vrsqrt.f32 %v3557_v49  ;;  %v3585_v37 = vmul.f32 %v5020_v47, %v6630_v30 }
 0x782   :  { %v3560_v1 = vmax.f32 %v3536_v58, 1e-24 }
 0x783   :  { %v5022_v19 = vpop.eup %5021  ;;  %v3538_v36 = vpop.xlane.xlu0 %3537 }
 0x784   :  { %v5024_v54 = vpop.eup %5023  ;;  %v3588_v60 = vmul.f32 %v5022_v19, %v6632_v28  ;;  %5029 = vrsqrt.f32 %v3560_v1  ;;  %v3561_v28 = vmax.f32 %v3538_v36, 1e-24 }
 0x785   :  { %v3540_v38 = vpop.xlane.xlu1 %3539  ;;  %v3586_v59 = vmul.f32 %v5024_v54, %v6636_v27  ;;  %5031 = vrsqrt.f32 %v3559_v52 }
 0x786   :  { %v3610_v44 = vpack.c.bf16 %v3588_v60, %v3587_v55  ;;  %v3562_v30 = vmax.f32 %v3540_v38, 1e-24 }
 0x787   :  { %v3542_v2 = vpop.xlane.xlu0 %3541  ;;  %v3609_v25 = vpack.c.bf16 %v3586_v59, %v3585_v37 }
 0x788   :  { %5033 = vrsqrt.f32 %v3562_v30  ;;  %v3563_v63 = vmax.f32 %v3542_v2, 1e-24 }
 0x789   :  { %v3544_v11 = vpop.xlane.xlu1 %3543  ;;  %4775 = vmatprep.subr.bf16.mxu0 %v3609_v25  ;;  %5035 = vrsqrt.f32 %v3561_v28 }
 0x78a   :  { %v5026_v21 = vpop.eup %5025  ;;  %4776 = vmatpush3.bf16.xpose.msra.mxu0 %v3609_v25  ;;  %v3564_v17 = vmax.f32 %v3544_v11, 1e-24 }
 0x78b   :  { %4777 = vmatprep.subr.bf16.mxu0 %v3610_v44  ;;  %v3546_v13 = vpop.xlane.xlu0 %3545  ;;  %v5028_v8 = vpop.eup %5027  ;;  %v3590_v27 = vmul.f32 %v5026_v21, %v6648_v43 }
 0x78c   :  { %v3589_v39 = vmul.f32 %v5028_v8, %v6644_v4  ;;  %v3565_v54 = vmax.f32 %v3546_v13, 1e-24 }
 0x78d   :  { %v3548_v3 = vpop.xlane.xlu1 %3547 }
 0x78e   :  { %v3611_v18 = vpack.c.bf16 %v3590_v27, %v3589_v39  ;;  %v5030_v57 = vpop.eup %5029  ;;  %v3566_v19 = vmax.f32 %v3548_v3, 1e-24 }
 0x78f   :  { %v3550_v51 = vpop.xlane.xlu0 %3549  ;;  %v5032_v7 = vpop.eup %5031  ;;  %v3592_v41 = vmul.f32 %v5030_v57, %v6652_v35 }
 0x790   :  { %v3591_v4 = vmul.f32 %v5032_v7, %v6646_v31 }
 0x791   :  { %v3552_v0 = vpop.xlane.xlu1 %3551 }
 0x792   :  { %4778 = vmatpush3.bf16.xpose.msra.mxu0 %v3610_v44  ;;  %v3612_v10 = vpack.c.bf16 %v3592_v41, %v3591_v4  ;;  %v5034_v58 = vpop.eup %5033  ;;  %v3568_v25 = vmax.f32 %v3552_v0, 1e-24 }
 0x793   :  { %4779 = vmatprep.subr.bf16.mxu0 %v3611_v18  ;;  %v3426_v53 = vpop.xlane.xlu0 %3425  ;;  %v5036_v47 = vpop.eup %5035  ;;  %v3594_v36 = vmul.f32 %v5034_v58, %v6664_v34 }
 0x794   :  { %v3457_v24 = vmax.f32 %v3426_v53, 1e-24  ;;  %v3593_v1 = vmul.f32 %v5036_v47, %v6658_v46  ;;  %v3567_v46 = vmax.f32 %v3550_v51, 1e-24 }
 0x795   :  { %v3428_v49 = vpop.xlane.xlu1 %3427 }
 0x796   :  { %5037 = vrsqrt.f32 %v3457_v24  ;;  %v3458_v43 = vmax.f32 %v3428_v49, 1e-24  ;;  %v3613_v37 = vpack.c.bf16 %v3594_v36, %v3593_v1 }
 0x797   :  { %5039 = vrsqrt.f32 %v3564_v17  ;;  %v3430_v55 = vpop.xlane.xlu0 %3429 }
 0x798   :  { %5041 = vrsqrt.f32 %v3458_v43 }
 0x799   :  { %5043 = vrsqrt.f32 %v3563_v63  ;;  %v3432_v31 = vpop.xlane.xlu1 %3431 }
 0x79a   :  { %4780 = vmatpush3.bf16.xpose.msra.mxu0 %v3611_v18  ;;  %5045 = vrsqrt.f32 %v3566_v19  ;;  %v3460_v39 = vmax.f32 %v3432_v31, 1e-24  ;;  %v3459_v18 = vmax.f32 %v3430_v55, 1e-24 }
 0x79b   :  { %4781 = vmatprep.subr.bf16.mxu0 %v3612_v10  ;;  %5047 = vrsqrt.f32 %v3565_v54  ;;  %v3434_v30 = vpop.xlane.xlu0 %3433 }
 0x79c   :  { %5049 = vrsqrt.f32 %v3568_v25  ;;  %v3461_v17 = vmax.f32 %v3434_v30, 1e-24 }
 0x79d   :  { %v3436_v21 = vpop.xlane.xlu1 %3435  ;;  %5051 = vrsqrt.f32 %v3567_v46 }
 0x79e   :  { %5053 = vrsqrt.f32 %v3460_v39 }
 0x79f   :  { %v3438_v28 = vpop.xlane.xlu0 %3437 }
 0x7a0   :  { %v5038_v35 = vpop.eup %5037  ;;  %v3463_v63 = vmax.f32 %v3438_v28, 1e-24 }
 0x7a1   :  { %v5040_v38 = vpop.eup %5039  ;;  %v3489_v60 = vmul.f32 %v5038_v35, %v6689_v15  ;;  %v3440_v3 = vpop.xlane.xlu1 %3439 }
 0x7a2   :  { %v5042_v59 = vpop.eup %5041  ;;  %4782 = vmatpush3.bf16.xpose.msra.mxu0 %v3612_v10  ;;  %v3596_v11 = vmul.f32 %v5040_v38, %v6668_v45  ;;  %v3464_v24 = vmax.f32 %v3440_v3, 1e-24 }
 0x7a3   :  { %4783 = vmatprep.subr.bf16.mxu0 %v3613_v37  ;;  %v3490_v52 = vmul.f32 %v5042_v59, %v6694_v48  ;;  %v5044_v2 = vpop.eup %5043  ;;  %v3442_v7 = vpop.xlane.xlu0 %3441 }
 0x7a4   :  { %v3595_v44 = vmul.f32 %v5044_v2, %v6662_v26  ;;  %v5046_v8 = vpop.eup %5045  ;;  %v3462_v26 = vmax.f32 %v3436_v21, 1e-24  ;;  %v3465_v4 = vmax.f32 %v3442_v7, 1e-24 }
 0x7a5   :  { %v3601_v34 = vpack.c.bf16 %v3490_v52, %v3489_v60  ;;  %v5048_v15 = vpop.eup %5047  ;;  %v3598_v48 = vmul.f32 %v5046_v8, %v6680_v6  ;;  %v3444_v57 = vpop.xlane.xlu1 %3443 }
 0x7a6   :  { %v3614_v13 = vpack.c.bf16 %v3596_v11, %v3595_v44  ;;  %v3597_v27 = vmul.f32 %v5048_v15, %v6674_v5  ;;  %v5050_v51 = vpop.eup %5049  ;;  %5055 = vrsqrt.f32 %v3462_v26  ;;  %v3466_v41 = vmax.f32 %v3444_v57, 1e-24 }
 0x7a7   :  { %4791 = vmatprep.mubr.bf16.mxu0 %v3601_v34  ;;  %v5052_v0 = vpop.eup %5051  ;;  %v3600_v53 = vmul.f32 %v5050_v51, %v6684_v61  ;;  %5057 = vrsqrt.f32 %v3459_v18  ;;  %v3446_v43 = vpop.xlane.xlu0 %3445 }
 0x7a8   :  { %v3615_v45 = vpack.c.bf16 %v3598_v48, %v3597_v27  ;;  %v3599_v6 = vmul.f32 %v5052_v0, %v6678_v50  ;;  %5059 = vrsqrt.f32 %v3461_v17  ;;  %v5054_v10 = vpop.eup %5053  ;;  %v3467_v35 = vmax.f32 %v3446_v43, 1e-24 }
 0x7a9   :  { %v3448_v49 = vpop.xlane.xlu1 %3447  ;;  %5061 = vrsqrt.f32 %v3464_v24  ;;  %v3492_v54 = vmul.f32 %v5054_v10, %v6704_v62 }
 0x7aa   :  { %4784 = vmatpush3.bf16.xpose.msra.mxu0 %v3613_v37  ;;  %v3616_v5 = vpack.c.bf16 %v3600_v53, %v3599_v6  ;;  %5063 = vrsqrt.f32 %v3466_v41  ;;  %v3468_v50 = vmax.f32 %v3448_v49, 1e-24 }
 0x7ab   :  { %4785 = vmatprep.subr.bf16.mxu0 %v3614_v13  ;;  %5065 = vrsqrt.f32 %v3463_v63  ;;  %v3450_v19 = vpop.xlane.xlu0 %3449 }
 0x7ac   :  { %5067 = vrsqrt.f32 %v3465_v4  ;;  %v3469_v59 = vmax.f32 %v3450_v19, 1e-24 }
 0x7ad   :  { %v3452_v61 = vpop.xlane.xlu1 %3451  ;;  %5069 = vrsqrt.f32 %v3468_v50 }
 0x7ae   :  { %v3470_v1 = vmax.f32 %v3452_v61, 1e-24 }
 0x7af   :  { %v3454_v34 = vpop.xlane.xlu0 %3453 }
 0x7b0   :  { %v5056_v58 = vpop.eup %5055  ;;  %5071 = vrsqrt.f32 %v3470_v1  ;;  %v3471_v46 = vmax.f32 %v3454_v34, 1e-24 }
 0x7b1   :  { %v5058_v47 = vpop.eup %5057  ;;  %v3494_v38 = vmul.f32 %v5056_v58, %v6714_v23  ;;  %v3456_v60 = vpop.xlane.xlu1 %3455  ;;  %5073 = vrsqrt.f32 %v3467_v35 }
 0x7b2   :  { %4786 = vmatpush3.bf16.xpose.msra.mxu0 %v3614_v13  ;;  %v5060_v36 = vpop.eup %5059  ;;  %v3491_v37 = vmul.f32 %v5058_v47, %v6699_v14  ;;  %5075 = vrsqrt.f32 %v3469_v59  ;;  %v3472_v11 = vmax.f32 %v3456_v60, 1e-24 }
 0x7b3   :  { %4787 = vmatprep.subr.bf16.mxu0 %v3615_v45  ;;  %v3493_v31 = vmul.f32 %v5060_v36, %v6709_v32  ;;  %v5062_v2 = vpop.eup %5061 }
 0x7b4   :  { %v3602_v52 = vpack.c.bf16 %v3492_v54, %v3491_v37  ;;  %v5064_v55 = vpop.eup %5063  ;;  %v3496_v14 = vmul.f32 %v5062_v2, %v6724_v22  ;;  %5077 = vrsqrt.f32 %v3472_v11 }
 0x7b5   :  { %v3603_v25 = vpack.c.bf16 %v3494_v38, %v3493_v31  ;;  %v5066_v62 = vpop.eup %5065  ;;  %v3498_v44 = vmul.f32 %v5064_v55, %v6734_v20  ;;  %5079 = vrsqrt.f32 %v3471_v46 }
 0x7b6   :  { %v5068_v23 = vpop.eup %5067  ;;  %v3495_v32 = vmul.f32 %v5066_v62, %v6719_v56 }
 0x7b7   :  { %v3497_v21 = vmul.f32 %v5068_v23, %v6729_v9  ;;  %v5070_v8 = vpop.eup %5069 }
 0x7b8   :  { %v3604_v13 = vpack.c.bf16 %v3496_v14, %v3495_v32  ;;  %v3500_v27 = vmul.f32 %v5070_v8, %v6744_v29 }
 0x7b9   :  { %v3605_v30 = vpack.c.bf16 %v3498_v44, %v3497_v21 }
 0x7ba   :  { %4788 = vmatpush3.bf16.xpose.msra.mxu0 %v3615_v45  ;;  %v5072_v15 = vpop.eup %5071 }
 0x7bb   :  { %4789 = vmatprep.subr.bf16.mxu0 %v3616_v5  ;;  %v5074_v48 = vpop.eup %5073  ;;  %v3502_v22 = vmul.f32 %v5072_v15, %v6754_v42 }
 0x7bc   :  { %v5076_v3 = vpop.eup %5075  ;;  %v3499_v20 = vmul.f32 %v5074_v48, %v6739_v40 }
 0x7bd   :  { %v3501_v56 = vmul.f32 %v5076_v3, %v6749_v33 }
 0x7be   :  { %v3606_v28 = vpack.c.bf16 %v3500_v27, %v3499_v20  ;;  %v5078_v45 = vpop.eup %5077 }
 0x7bf   :  { %v3607_v9 = vpack.c.bf16 %v3502_v22, %v3501_v56  ;;  %v5080_v51 = vpop.eup %5079  ;;  %v3504_v39 = vmul.f32 %v5078_v45, %v6764_v16 }
 0x7c0   :  { %v3503_v26 = vmul.f32 %v5080_v51, %v6759_v12 }
 0x7c2   :  { %4790 = vmatpush3.bf16.xpose.msra.mxu0 %v3616_v5  ;;  %v3608_v0 = vpack.c.bf16 %v3504_v39, %v3503_v26 }
 0x7c9   :  { %4792 = vmatmul.mubr.bf16.vlgmr.msra.gmra.mrb[80].mxu0 %v3602_v52 }
 0x7ca   :  { %4795 = vmatprep.mubr.bf16.mxu0 %v3603_v25 }
 0x7d1   :  { %4796 = vmatmul.mubr.bf16.gmra.mrb[84].mxu0 %v3604_v13 }
 0x7d2   :  { %4799 = vmatprep.mubr.bf16.mxu0 %v3605_v30 }
 0x7d9   :  { %4800 = vmatmul.mubr.bf16.gmra.mrb[88].mxu0 %v3606_v28 }
 0x7da   :  { %4803 = vmatprep.mubr.bf16.mxu0 %v3607_v9 }
 0x7e1   :  { %4804 = vmatmul.mubr.bf16.gmra.mrb[92].mxu0 %v3608_v0 }
 0x89c   :  { %v4793_v18 = vpop.f32.mrb[80].mxu0 }
 0x89d   :  { %v3977_v29 = vmul.f32 -1.442695, %v4793_v18  ;;  %v3651_v57 = vpop.f32.mrb[81].mxu0 }
 0x89e   :  { %v3975_v42 = vmul.f32 -1.442695, %v3651_v57  ;;  %v4794_v17 = vpop.f32.mrb[82].mxu0 }
 0x89f   :  { %5081 = vpow2.f32 %v3977_v29  ;;  %v3978_v40 = vmul.f32 -1.442695, %v4794_v17  ;;  %v3654_v33 = vpop.f32.mrb[83].mxu0 }
 0x8a0   :  { %5083 = vpow2.f32 %v3975_v42  ;;  %v3976_v53 = vmul.f32 -1.442695, %v3654_v33 }
 0x8a1   :  { %5085 = vpow2.f32 %v3978_v40 }
 0x8a2   :  { %5087 = vpow2.f32 %v3976_v53 }
 0x8a4   :  { %v4797_v7 = vpop.f32.mrb[84].mxu0 }
 0x8a5   :  { %v3981_v6 = vmul.f32 -1.442695, %v4797_v7  ;;  %v3667_v5 = vpop.f32.mrb[85].mxu0 }
 0x8a6   :  { %v3979_v16 = vmul.f32 -1.442695, %v3667_v5  ;;  %v4798_v24 = vpop.f32.mrb[86].mxu0 }
 0x8a7   :  { %5089 = vpow2.f32 %v3981_v6  ;;  %v3982_v12 = vmul.f32 -1.442695, %v4798_v24  ;;  %v3670_v49 = vpop.f32.mrb[87].mxu0 }
 0x8a8   :  { %5091 = vpow2.f32 %v3979_v16  ;;  %v3980_v41 = vmul.f32 -1.442695, %v3670_v49 }
 0x8a9   :  { %v5082_v63 = vpop.eup %5081  ;;  %5093 = vpow2.f32 %v3982_v12 }
 0x8aa   :  { %v5084_v43 = vpop.eup %5083  ;;  %v3764_v4 = vadd.f32 1.0, %v5082_v63  ;;  %5095 = vpow2.f32 %v3980_v41 }
 0x8ab   :  { %v5086_v10 = vpop.eup %5085  ;;  %v3762_v61 = vadd.f32 1.0, %v5084_v43 }
 0x8ac   :  { %v5088_v58 = vpop.eup %5087  ;;  %5097 = vrcp.f32 %v3764_v4  ;;  %v3765_v47 = vadd.f32 1.0, %v5086_v10  ;;  %v4801_v50 = vpop.f32.mrb[88].mxu0 }
 0x8ad   :  { %5099 = vrcp.f32 %v3762_v61  ;;  %v3763_v19 = vadd.f32 1.0, %v5088_v58  ;;  %v3985_v36 = vmul.f32 -1.442695, %v4801_v50  ;;  %v3683_v54 = vpop.f32.mrb[89].mxu0 }
 0x8ae   :  { %5101 = vrcp.f32 %v3765_v47  ;;  %v3983_v1 = vmul.f32 -1.442695, %v3683_v54  ;;  %v4802_v35 = vpop.f32.mrb[90].mxu0 }
 0x8af   :  { %5103 = vrcp.f32 %v3763_v19  ;;  %v3986_v38 = vmul.f32 -1.442695, %v4802_v35  ;;  %v3686_v37 = vpop.f32.mrb[91].mxu0 }
 0x8b0   :  { %5105 = vpow2.f32 %v3985_v36  ;;  %v3984_v59 = vmul.f32 -1.442695, %v3686_v37 }
 0x8b1   :  { %v5090_v31 = vpop.eup %5089  ;;  %5107 = vpow2.f32 %v3983_v1 }
 0x8b2   :  { %v5092_v60 = vpop.eup %5091  ;;  %v3768_v52 = vadd.f32 1.0, %v5090_v31  ;;  %5109 = vpow2.f32 %v3986_v38 }
 0x8b3   :  { %v5094_v2 = vpop.eup %5093  ;;  %v3766_v25 = vadd.f32 1.0, %v5092_v60  ;;  %5111 = vpow2.f32 %v3984_v59 }
 0x8b4   :  { %v5096_v55 = vpop.eup %5095  ;;  %5113 = vrcp.f32 %v3768_v52  ;;  %v3769_v34 = vadd.f32 1.0, %v5094_v2  ;;  %v4805_v62 = vpop.f32.mrb[92].mxu0 }
 0x8b5   :  { %5115 = vrcp.f32 %v3766_v25  ;;  %v3767_v11 = vadd.f32 1.0, %v5096_v55  ;;  %v3989_v23 = vmul.f32 -1.442695, %v4805_v62  ;;  %v3699_v14 = vpop.f32.mrb[93].mxu0 }
 0x8b6   :  { %v5098_v46 = vpop.eup %5097  ;;  %5117 = vrcp.f32 %v3769_v34  ;;  %v3987_v44 = vmul.f32 -1.442695, %v3699_v14  ;;  %v4806_v32 = vpop.f32.mrb[94].mxu0 }
 0x8b7   :  { %v5100_v21 = vpop.eup %5099  ;;  %3812 = vst [vmem:[%s6920_s5 + $0x10] sm:$0xff] %v5098_v46  ;;  %5119 = vrcp.f32 %v3767_v11  ;;  %v3990_v13 = vmul.f32 -1.442695, %v4806_v32  ;;  %v3702_v8 = vpop.f32.mrb[95].mxu0 }
 0x8b8   :  { %v5102_v30 = vpop.eup %5101  ;;  %3810 = vst [vmem:[%s6920_s5] sm:$0xff] %v5100_v21  ;;  %5121 = vpow2.f32 %v3989_v23  ;;  %v3988_v15 = vmul.f32 -1.442695, %v3702_v8 }
 0x8b9   :  { %v5104_v48 = vpop.eup %5103  ;;  %3813 = vst [vmem:[%s6920_s5 + $0x18] sm:$0xff] %v5102_v30  ;;  %5123 = vpow2.f32 %v3987_v44 }
 0x8ba   :  { %v5106_v3 = vpop.eup %5105  ;;  %3811 = vst [vmem:[%s6920_s5 + $0x8] sm:$0xff] %v5104_v48  ;;  %5125 = vpow2.f32 %v3990_v13 }
 0x8bb   :  { %v5108_v27 = vpop.eup %5107  ;;  %v3772_v22 = vadd.f32 1.0, %v5106_v3  ;;  %5127 = vpow2.f32 %v3988_v15 }
 0x8bc   :  { %v5110_v20 = vpop.eup %5109  ;;  %v3770_v56 = vadd.f32 1.0, %v5108_v27 }
 0x8bd   :  { %v5112_v28 = vpop.eup %5111  ;;  %5129 = vrcp.f32 %v3772_v22  ;;  %v3773_v45 = vadd.f32 1.0, %v5110_v20 }
 0x8be   :  { %v5114_v9 = vpop.eup %5113  ;;  %5131 = vrcp.f32 %v3770_v56  ;;  %v3771_v51 = vadd.f32 1.0, %v5112_v28 }
 0x8bf   :  { %v5116_v39 = vpop.eup %5115  ;;  %3816 = vst [vmem:[%s6920_s5 + $0x30] sm:$0xff] %v5114_v9  ;;  %5133 = vrcp.f32 %v3773_v45 }
 0x8c0   :  { %v5118_v26 = vpop.eup %5117  ;;  %3814 = vst [vmem:[%s6920_s5 + $0x20] sm:$0xff] %v5116_v39  ;;  %5135 = vrcp.f32 %v3771_v51 }
 0x8c1   :  { %v5120_v0 = vpop.eup %5119  ;;  %3817 = vst [vmem:[%s6920_s5 + $0x38] sm:$0xff] %v5118_v26 }
 0x8c2   :  { %v5122_v18 = vpop.eup %5121  ;;  %3815 = vst [vmem:[%s6920_s5 + $0x28] sm:$0xff] %v5120_v0 }
 0x8c3   :  { %v5124_v29 = vpop.eup %5123  ;;  %v3776_v57 = vadd.f32 1.0, %v5122_v18 }
 0x8c4   :  { %v5126_v42 = vpop.eup %5125  ;;  %v3774_v17 = vadd.f32 1.0, %v5124_v29 }
 0x8c5   :  { %v5128_v40 = vpop.eup %5127  ;;  %5137 = vrcp.f32 %v3776_v57  ;;  %v3777_v33 = vadd.f32 1.0, %v5126_v42 }
 0x8c6   :  { %5139 = vrcp.f32 %v3774_v17  ;;  %v3775_v53 = vadd.f32 1.0, %v5128_v40 }
 0x8c7   :  { %v5130_v7 = vpop.eup %5129  ;;  %5141 = vrcp.f32 %v3777_v33 }
 0x8c8   :  { %v5132_v6 = vpop.eup %5131  ;;  %3820 = vst [vmem:[%s6920_s5 + $0x50] sm:$0xff] %v5130_v7  ;;  %5143 = vrcp.f32 %v3775_v53 }
 0x8c9   :  { %v5134_v5 = vpop.eup %5133  ;;  %3818 = vst [vmem:[%s6920_s5 + $0x40] sm:$0xff] %v5132_v6 }
 0x8ca   :  { %v5136_v16 = vpop.eup %5135  ;;  %3821 = vst [vmem:[%s6920_s5 + $0x58] sm:$0xff] %v5134_v5 }
 0x8cb   :  { %3819 = vst [vmem:[%s6920_s5 + $0x48] sm:$0xff] %v5136_v16 }
 0x8cf   :  { %v5138_v24 = vpop.eup %5137 }
 0x8d0   :  { %v5140_v12 = vpop.eup %5139  ;;  %3824 = vst [vmem:[%s6920_s5 + $0x70] sm:$0xff] %v5138_v24 }
 0x8d1   :  { %v5142_v49 = vpop.eup %5141  ;;  %3822 = vst [vmem:[%s6920_s5 + $0x60] sm:$0xff] %v5140_v12 }
 0x8d2   :  { %v5144_v41 = vpop.eup %5143  ;;  %3825 = vst [vmem:[%s6920_s5 + $0x78] sm:$0xff] %v5142_v49 }
 0x8d3   :  { %3823 = vst [vmem:[%s6920_s5 + $0x68] sm:$0xff] %v5144_v41 }
 0x8d4   :  { %3830 = vsyncpa [#allocation3], 1 }
 0x8d5   :  { %3831 = vsyncpa [#allocation5], 1 }
 0x8d6   :  { %3832 = vsyncpa [#allocation8], 1 }
 0x8d7   :  { %3833 = vsyncpa [#allocation11], 1 }
 0x8d8   :  { %3834 = vsyncpa [#allocation14], 1 }
 0x8d9   :  { %3835 = vsyncpa [#allocation17], 1 }
 0x8da   :  { %3836 = vsyncpa [#allocation20], 1 }
 0x8db   :  { %3837 = vsyncpa [#allocation23], 1 }
 0x8dc   :  { %3838 = vsyncpa [#allocation26], 1 }

</bundles_post_ra>
